<compile_context>
chip_gen: v6e
topology: v6e:2x2x1
jax: 0.10.0
libtpu: 0.0.40
codegen_flags: <defaults>
</compile_context>

<pallas_src>
import functools

import jax
import jax.numpy as jnp
from jax.experimental import pallas as pl
from jax.experimental.pallas import tpu as pltpu

FEAT_DIM = 1280          # EfficientNet encoder output channels
CLIN_EMB = 128
HIDDEN = 256
NUM_CLASSES = 2
CLIN_DIM = 2


# ---------------------------------------------------------------------------
# Fully fused kernel: encoder tile -> pool accumulate -> (last tile) head
# ---------------------------------------------------------------------------
def _fused_kernel(x_ref, clin_ref, w_enc_ref, b_enc_ref,
                  w1_ref, b1_ref, w2_ref, b2_ref,
                  w3a_ref, w3b_ref, b3_ref, w4_ref, b4_ref,
                  out_ref, acc_ref, *, inv_hw, true_hw, hw_tile, needs_mask):
    t = pl.program_id(1)
    n_t = pl.num_programs(1)

    @pl.when(t == 0)
    def _():
        acc_ref[...] = jnp.zeros_like(acc_ref)

    w_enc = w_enc_ref[...]                        # (C, 1280) bf16
    b_enc = b_enc_ref[...]                        # (1, 1280) f32

    if needs_mask:
        # HW was zero-padded up to a tile multiple; padded positions would
        # contribute ReLU(b_enc) to the pool, so mask them out.
        pos = t * hw_tile + jax.lax.broadcasted_iota(
            jnp.int32, (hw_tile, 1), 0)
        pos_mask = pos < true_hw                  # (hw_tile, 1) bool

    # ---- stand-in encoder + pool partial-sum, one batch row at a time ------
    # (2-D dots only: Mosaic-friendly, and the Bb*hw_tile <= 2048 budget keeps
    #  the f32 (hw_tile, 1280) intermediates bounded even when all are live.)
    for b in range(acc_ref.shape[0]):             # static unroll over Bb
        x_b = x_ref[b]                            # (C, hw_tile)
        if x_b.dtype != w_enc.dtype:
            # Only taken when the caller streams f32 images: cheap in-VMEM
            # narrowing; the HBM stream itself is untouched.
            x_b = x_b.astype(w_enc.dtype)
        # bf16 x bf16 -> f32 accumulate, contract over channels (MXU native).
        feat = jax.lax.dot_general(
            x_b, w_enc,
            dimension_numbers=(((0,), (0,)), ((), ())),   # -> (hw_tile, 1280)
            preferred_element_type=jnp.float32)
        feat = jnp.maximum(feat + b_enc, 0.0)
        if needs_mask:
            feat = jnp.where(pos_mask, feat, 0.0)
        # Global-average-pool partial sum on the (otherwise idle) XLU slot.
        acc_ref[pl.ds(b, 1), :] += jnp.sum(feat, axis=0, keepdims=True)

    # ---- head: runs once per batch block, on its last HW tile --------------
    @pl.when(t == n_t - 1)
    def _():
        pooled = acc_ref[...] * inv_hw                        # (Bb, 1280) f32
        clin = clin_ref[...]                                  # (Bb, 2)    f32

        # clinical_proj: Linear(2,64) -> ReLU -> Linear(64,128) -> ReLU
        h1 = jnp.maximum(
            jnp.dot(clin, w1_ref[...], preferred_element_type=jnp.float32)
            + b1_ref[...], 0.0)
        emb = jnp.maximum(
            jnp.dot(h1, w2_ref[...], preferred_element_type=jnp.float32)
            + b2_ref[...], 0.0)

        # concat([pooled, emb], dim=1) @ W3  ==  pooled @ W3a + emb @ W3b
        h = (jnp.dot(pooled, w3a_ref[...], preferred_element_type=jnp.float32)
             + jnp.dot(emb, w3b_ref[...], preferred_element_type=jnp.float32)
             + b3_ref[...])
        h = jnp.maximum(h, 0.0)

        # Dropout(p=0.4) is identity at inference time.
        out_ref[...] = (jnp.dot(h, w4_ref[...],
                                preferred_element_type=jnp.float32)
                        + b4_ref[...])


# ---------------------------------------------------------------------------
# Tiling heuristics
# ---------------------------------------------------------------------------
def _pick_hw_tile(hw, cap=2048):
    """HW tile = min(cap, HW rounded up to a multiple of 128).

    cap=2048 keeps the (hw_tile, 1280) f32 feature intermediate ~10.5 MiB:
    safe inside the 32 MiB scoped-VMEM default on v5e/v6e/v7x.  (v5e/v6e's
    128 MiB VMEM could take 4096+, but gains past ~2048 are marginal.)
    """
    hw128 = -(-hw // 128) * 128
    return min(cap, hw128)


def _pick_batch_block(batch, hw_tile, elem_budget=2048):
    """Largest divisor of `batch` such that batch_block * hw_tile <= budget."""
    cap = max(1, elem_budget // hw_tile)
    for bb in range(min(batch, cap), 0, -1):
        if batch % bb == 0:
            return bb
    return 1


# ---------------------------------------------------------------------------
# Full forward (matches EfficientNetClinical.forward)
# ---------------------------------------------------------------------------
def efficientnet_clinical_forward(x_nchw, clinical_features, params,
                                  hw_tile=None, batch_block=None):
    B, C, H, W = x_nchw.shape
    HW = H * W

    if hw_tile is None:
        hw_tile = _pick_hw_tile(HW)
    assert hw_tile % 128 == 0, "hw_tile must be a multiple of 128"
    if batch_block is None:
        batch_block = _pick_batch_block(B, hw_tile)
    assert B % batch_block == 0, (B, batch_block)

    hw_pad = -(-HW // hw_tile) * hw_tile
    n_t = hw_pad // hw_tile
    needs_mask = hw_pad != HW

    # NCHW -> (B, C, H*W): pure reshape (no host transpose, no dtype cast —
    # the image stream travels to the kernel in whatever dtype it arrives).
    x_flat = x_nchw.reshape(B, C, HW)
    if needs_mask:
        x_flat = jnp.pad(x_flat, ((0, 0), (0, 0), (0, hw_pad - HW)))

    # gated_clinical = cat([clin[:,0:1], clin[:,1:2]], 1) == clinical_features
    # (a no-op concat in the reference module), so it is dropped here.
    clin = clinical_features.astype(jnp.float32)

    kernel = functools.partial(
        _fused_kernel, inv_hw=1.0 / HW, true_hw=HW, hw_tile=hw_tile,
        needs_mask=needs_mask)
    const = lambda b, t: (0, 0)

    class_logits = pl.pallas_call(
        kernel,
        out_shape=jax.ShapeDtypeStruct((B, NUM_CLASSES), jnp.float32),
        grid_spec=pltpu.PrefetchScalarGridSpec(
            num_scalar_prefetch=0,
            grid=(B // batch_block, n_t),            # HW reduction axis last
            in_specs=[
                pl.BlockSpec((batch_block, C, hw_tile),
                             lambda b, t: (b, 0, t)),
                pl.BlockSpec((batch_block, CLIN_DIM), lambda b, t: (b, 0)),
                pl.BlockSpec((C, FEAT_DIM), const),          # w_enc (bf16)
                pl.BlockSpec((1, FEAT_DIM), const),          # b_enc
                pl.BlockSpec((CLIN_DIM, 64), const),         # w1
                pl.BlockSpec((1, 64), const),                # b1
                pl.BlockSpec((64, CLIN_EMB), const),         # w2
                pl.BlockSpec((1, CLIN_EMB), const),          # b2
                pl.BlockSpec((FEAT_DIM, HIDDEN), const),     # w3a (f32)
                pl.BlockSpec((CLIN_EMB, HIDDEN), const),     # w3b
                pl.BlockSpec((1, HIDDEN), const),            # b3
                pl.BlockSpec((HIDDEN, NUM_CLASSES), const),  # w4
                pl.BlockSpec((1, NUM_CLASSES), const),       # b4
            ],
            out_specs=pl.BlockSpec((batch_block, NUM_CLASSES),
                                   lambda b, t: (b, 0)),
            scratch_shapes=[pltpu.VMEM((batch_block, FEAT_DIM), jnp.float32)],
        ),
        compiler_params=pltpu.CompilerParams(
            dimension_semantics=("parallel", "arbitrary")),
    )(x_flat, clin,
      params["w_enc"], params["b_enc"],
      params["w1"], params["b1"], params["w2"], params["b2"],
      params["w3a"], params["w3b"], params["b3"],
      params["w4"], params["b4"])

    return None, class_logits


def init_params(key, c_in):
    ks = jax.random.split(key, 6)

    def lin(k, fi, fo, dtype=jnp.float32):
        return (0.02 * jax.random.normal(k, (fi, fo), jnp.float32)).astype(dtype)

    w3 = lin(ks[3], FEAT_DIM + CLIN_EMB, HIDDEN)
    return {
        # The big encoder stream is bf16 (pairs with a bf16 image stream for
        # native-rate MXU); the head stays f32 for bit-closeness to PyTorch.
        "w_enc": lin(ks[0], c_in, FEAT_DIM, jnp.bfloat16),
        "b_enc": jnp.zeros((1, FEAT_DIM), jnp.float32),
        "w1": lin(ks[1], CLIN_DIM, 64),
        "b1": 0.01 * jnp.ones((1, 64), jnp.float32),
        "w2": lin(ks[2], 64, CLIN_EMB),
        "b2": 0.01 * jnp.ones((1, CLIN_EMB), jnp.float32),
        "w3a": w3[:FEAT_DIM],
        "w3b": w3[FEAT_DIM:],
        "b3": 0.01 * jnp.ones((1, HIDDEN), jnp.float32),
        "w4": lin(ks[4], HIDDEN, NUM_CLASSES),
        "b4": jnp.zeros((1, NUM_CLASSES), jnp.float32),
    }


def _reference_forward(x_nchw, clinical_features, params):
    """Pure-JAX mirror of the fused kernel (same dtype policy)."""
    B, C, H, W = x_nchw.shape
    xf = x_nchw.reshape(B, C, H * W).astype(params["w_enc"].dtype)
    feat = jnp.einsum("bcm,cf->bmf", xf, params["w_enc"],
                      preferred_element_type=jnp.float32)
    feat = jnp.maximum(feat + params["b_enc"], 0.0)
    pooled = jnp.mean(feat, axis=1)
    clin = clinical_features.astype(jnp.float32)
    h1 = jnp.maximum(clin @ params["w1"] + params["b1"], 0.0)
    emb = jnp.maximum(h1 @ params["w2"] + params["b2"], 0.0)
    h = jnp.maximum(pooled @ params["w3a"] + emb @ params["w3b"]
                    + params["b3"], 0.0)
    return h @ params["w4"] + params["b4"]


if __name__ == "__main__":
    key = jax.random.PRNGKey(0)
    k_x, k_c, k_p = jax.random.split(key, 3)

    B, C, H, W = 2, 4, 16, 16
    # Image stream arrives in bf16 (halves HBM bytes on the dominant stream);
    # f32 callers are handled too (in-VMEM narrowing, no extra HBM pass).
    x = jax.random.normal(k_x, (B, C, H, W), jnp.bfloat16)
    clinical = jax.random.normal(k_c, (B, CLIN_DIM), jnp.float32)
    params = init_params(k_p, c_in=C)

    # hw_tile=128 forces 2 HW tiles to exercise the pooled accumulator path;
    # production uses the default cap of 2048.
    fwd = jax.jit(functools.partial(efficientnet_clinical_forward,
                                    hw_tile=128))
    seg_out, logits = fwd(x, clinical, params)
    logits = jax.block_until_ready(logits)

    assert seg_out is None
    assert logits.shape == (B, NUM_CLASSES)
    assert bool(jnp.all(jnp.isfinite(logits)))

    ref = _reference_forward(x, clinical, params)
    assert bool(jnp.allclose(logits, ref, rtol=5e-2, atol=1e-3)), (logits, ref)

    print("KERNEL_OK")
</pallas_src>

<mosaic_0001>
module attributes {stable_mosaic.version = 11 : i64} {
  func.func @_fused_kernel(%arg0: i32, %arg1: i32, %arg2: memref<2x4x128xbf16, #tpu.memory_space<vmem>>, %arg3: memref<2x2xf32, #tpu.memory_space<vmem>>, %arg4: memref<4x1280xbf16, #tpu.memory_space<vmem>>, %arg5: memref<1x1280xf32, #tpu.memory_space<vmem>>, %arg6: memref<2x64xf32, #tpu.memory_space<vmem>>, %arg7: memref<1x64xf32, #tpu.memory_space<vmem>>, %arg8: memref<64x128xf32, #tpu.memory_space<vmem>>, %arg9: memref<1x128xf32, #tpu.memory_space<vmem>>, %arg10: memref<1280x256xf32, #tpu.memory_space<vmem>>, %arg11: memref<128x256xf32, #tpu.memory_space<vmem>>, %arg12: memref<1x256xf32, #tpu.memory_space<vmem>>, %arg13: memref<256x2xf32, #tpu.memory_space<vmem>>, %arg14: memref<1x2xf32, #tpu.memory_space<vmem>>, %arg15: memref<2x2xf32, #tpu.memory_space<vmem>>, %arg16: memref<2x1280xf32, #tpu.memory_space<vmem>>) attributes {dimension_semantics = [#tpu.dimension_semantics<parallel>, #tpu.dimension_semantics<arbitrary>], iteration_bounds = array<i64: 1, 2>, scalar_prefetch = 0 : i64, scratch_operands = 1 : i64, tpu.core_type = #tpu.core_type<tc>, window_params = [{transform_indices = @transform_0, window_bounds = array<i64: 2, 4, 128>}, {transform_indices = @transform_1, window_bounds = array<i64: 2, 2>}, {pipeline_mode = #tpu.pipeline_mode<synchronous>, transform_indices = @transform_2, window_bounds = array<i64: 4, 1280>}, {pipeline_mode = #tpu.pipeline_mode<synchronous>, transform_indices = @transform_3, window_bounds = array<i64: 1, 1280>}, {pipeline_mode = #tpu.pipeline_mode<synchronous>, transform_indices = @transform_4, window_bounds = array<i64: 2, 64>}, {pipeline_mode = #tpu.pipeline_mode<synchronous>, transform_indices = @transform_5, window_bounds = array<i64: 1, 64>}, {pipeline_mode = #tpu.pipeline_mode<synchronous>, transform_indices = @transform_6, window_bounds = array<i64: 64, 128>}, {pipeline_mode = #tpu.pipeline_mode<synchronous>, transform_indices = @transform_7, window_bounds = array<i64: 1, 128>}, {pipeline_mode = #tpu.pipeline_mode<synchronous>, transform_indices = @transform_8, window_bounds = array<i64: 1280, 256>}, {pipeline_mode = #tpu.pipeline_mode<synchronous>, transform_indices = @transform_9, window_bounds = array<i64: 128, 256>}, {pipeline_mode = #tpu.pipeline_mode<synchronous>, transform_indices = @transform_10, window_bounds = array<i64: 1, 256>}, {pipeline_mode = #tpu.pipeline_mode<synchronous>, transform_indices = @transform_11, window_bounds = array<i64: 256, 2>}, {pipeline_mode = #tpu.pipeline_mode<synchronous>, transform_indices = @transform_12, window_bounds = array<i64: 1, 2>}, {transform_indices = @transform_13, window_bounds = array<i64: 2, 2>}]} {
    %c0_i32 = arith.constant 0 : i32
    %0 = arith.cmpi eq, %arg1, %c0_i32 : i32
    %1 = arith.extui %0 : i1 to i32
    %c0_i32_0 = arith.constant 0 : i32
    %2 = arith.cmpi ne, %1, %c0_i32_0 : i32
    scf.if %2 {
      %cst_23 = arith.constant 0.000000e+00 : f32
      %32 = vector.broadcast %cst_23 : f32 to vector<2x1280xf32>
      %c0_24 = arith.constant 0 : index
      %c0_25 = arith.constant 0 : index
      %33 = vector.load %arg16[%c0_24, %c0_25] : memref<2x1280xf32, #tpu.memory_space<vmem>>, vector<2x1280xf32>
      tpu.vector_store %arg16[%c0_24, %c0_25], %32 {strides = array<i32>} : memref<2x1280xf32, #tpu.memory_space<vmem>>, vector<2x1280xf32>,
    } else {
    }
    %c0 = arith.constant 0 : index
    %c0_1 = arith.constant 0 : index
    %3 = vector.load %arg4[%c0, %c0_1] : memref<4x1280xbf16, #tpu.memory_space<vmem>>, vector<4x1280xbf16>
    %c0_2 = arith.constant 0 : index
    %c0_3 = arith.constant 0 : index
    %4 = vector.load %arg5[%c0_2, %c0_3] : memref<1x1280xf32, #tpu.memory_space<vmem>>, vector<1x1280xf32>
    %c0_4 = arith.constant 0 : index
    %c0_5 = arith.constant 0 : index
    %c0_6 = arith.constant 0 : index
    %5 = vector.load %arg2[%c0_4, %c0_5, %c0_6] : memref<2x4x128xbf16, #tpu.memory_space<vmem>>, vector<1x4x128xbf16>
    %6 = vector.shape_cast %5 : vector<1x4x128xbf16> to vector<4x128xbf16>
    %cst = arith.constant dense<0.000000e+00> : vector<128x1280xf32>
    %7 = tpu.matmul %6, %3, %cst {dimension_numbers = #tpu.dot_dimension_numbers<[0], [0], [1], [1], [0, 1, 1, 1], [], []>} : vector<4x128xbf16>, vector<4x1280xbf16>, vector<128x1280xf32> -> vector<128x1280xf32>
    %8 = vector.broadcast %4 : vector<1x1280xf32> to vector<128x1280xf32>
    %9 = arith.addf %7, %8 : vector<128x1280xf32>
    %cst_7 = arith.constant 0.000000e+00 : f32
    %10 = vector.broadcast %cst_7 : f32 to vector<128x1280xf32>
    %11 = arith.maximumf %9, %10 : vector<128x1280xf32>
    %c0_8 = arith.constant 0 : index
    %c0_9 = arith.constant 0 : index
    %12 = vector.load %arg16[%c0_8, %c0_9] : memref<2x1280xf32, #tpu.memory_space<vmem>>, vector<1x1280xf32>
    %cst_10 = arith.constant dense<0.000000e+00> : vector<1280xf32>
    %13 = vector.multi_reduction <add>, %11, %cst_10 [0] : vector<128x1280xf32> to vector<1280xf32>
    %14 = vector.shape_cast %13 : vector<1280xf32> to vector<1x1280xf32>
    %15 = arith.addf %12, %14 : vector<1x1280xf32>
    %c0_11 = arith.constant 0 : index
    %c0_12 = arith.constant 0 : index
    %16 = vector.load %arg16[%c0_11, %c0_12] : memref<2x1280xf32, #tpu.memory_space<vmem>>, vector<1x1280xf32>
    tpu.vector_store %arg16[%c0_11, %c0_12], %15 {strides = array<i32>} : memref<2x1280xf32, #tpu.memory_space<vmem>>, vector<1x1280xf32>,
    %c1 = arith.constant 1 : index
    %c0_13 = arith.constant 0 : index
    %c0_14 = arith.constant 0 : index
    %17 = vector.load %arg2[%c1, %c0_13, %c0_14] : memref<2x4x128xbf16, #tpu.memory_space<vmem>>, vector<1x4x128xbf16>
    %18 = vector.shape_cast %17 : vector<1x4x128xbf16> to vector<4x128xbf16>
    %cst_15 = arith.constant dense<0.000000e+00> : vector<128x1280xf32>
    %19 = tpu.matmul %18, %3, %cst_15 {dimension_numbers = #tpu.dot_dimension_numbers<[0], [0], [1], [1], [0, 1, 1, 1], [], []>} : vector<4x128xbf16>, vector<4x1280xbf16>, vector<128x1280xf32> -> vector<128x1280xf32>
    %20 = vector.broadcast %4 : vector<1x1280xf32> to vector<128x1280xf32>
    %21 = arith.addf %19, %20 : vector<128x1280xf32>
    %cst_16 = arith.constant 0.000000e+00 : f32
    %22 = vector.broadcast %cst_16 : f32 to vector<128x1280xf32>
    %23 = arith.maximumf %21, %22 : vector<128x1280xf32>
    %c1_17 = arith.constant 1 : index
    %c0_18 = arith.constant 0 : index
    %24 = vector.load %arg16[%c1_17, %c0_18] : memref<2x1280xf32, #tpu.memory_space<vmem>>, vector<1x1280xf32>
    %cst_19 = arith.constant dense<0.000000e+00> : vector<1280xf32>
    %25 = vector.multi_reduction <add>, %23, %cst_19 [0] : vector<128x1280xf32> to vector<1280xf32>
    %26 = vector.shape_cast %25 : vector<1280xf32> to vector<1x1280xf32>
    %27 = arith.addf %24, %26 : vector<1x1280xf32>
    %c1_20 = arith.constant 1 : index
    %c0_21 = arith.constant 0 : index
    %28 = vector.load %arg16[%c1_20, %c0_21] : memref<2x1280xf32, #tpu.memory_space<vmem>>, vector<1x1280xf32>
    tpu.vector_store %arg16[%c1_20, %c0_21], %27 {strides = array<i32>} : memref<2x1280xf32, #tpu.memory_space<vmem>>, vector<1x1280xf32>,
    %c1_i32 = arith.constant 1 : i32
    %29 = arith.cmpi eq, %arg1, %c1_i32 : i32
    %30 = arith.extui %29 : i1 to i32
    %c0_i32_22 = arith.constant 0 : i32
    %31 = arith.cmpi ne, %30, %c0_i32_22 : i32
    scf.if %31 {
      %c0_23 = arith.constant 0 : index
      %c0_24 = arith.constant 0 : index
      %32 = vector.load %arg16[%c0_23, %c0_24] : memref<2x1280xf32, #tpu.memory_space<vmem>>, vector<2x1280xf32>
      %cst_25 = arith.constant 3.906250e-03 : f32
      %33 = vector.broadcast %cst_25 : f32 to vector<2x1280xf32>
      %34 = arith.mulf %32, %33 : vector<2x1280xf32>
      %c0_26 = arith.constant 0 : index
      %c0_27 = arith.constant 0 : index
      %35 = vector.load %arg3[%c0_26, %c0_27] : memref<2x2xf32, #tpu.memory_space<vmem>>, vector<2x2xf32>
      %c0_28 = arith.constant 0 : index
      %c0_29 = arith.constant 0 : index
      %36 = vector.load %arg6[%c0_28, %c0_29] : memref<2x64xf32, #tpu.memory_space<vmem>>, vector<2x64xf32>
      %cst_30 = arith.constant dense<0.000000e+00> : vector<2x64xf32>
      %37 = tpu.matmul %35, %36, %cst_30 {dimension_numbers = #tpu.dot_dimension_numbers<[1], [0], [0], [1], [0, 0, 1, 1], [], []>} : vector<2x2xf32>, vector<2x64xf32>, vector<2x64xf32> -> vector<2x64xf32>
      %c0_31 = arith.constant 0 : index
      %c0_32 = arith.constant 0 : index
      %38 = vector.load %arg7[%c0_31, %c0_32] : memref<1x64xf32, #tpu.memory_space<vmem>>, vector<1x64xf32>
      %39 = vector.broadcast %38 : vector<1x64xf32> to vector<2x64xf32>
      %40 = arith.addf %37, %39 : vector<2x64xf32>
      %cst_33 = arith.constant 0.000000e+00 : f32
      %41 = vector.broadcast %cst_33 : f32 to vector<2x64xf32>
      %42 = arith.maximumf %40, %41 : vector<2x64xf32>
      %c0_34 = arith.constant 0 : index
      %c0_35 = arith.constant 0 : index
      %43 = vector.load %arg8[%c0_34, %c0_35] : memref<64x128xf32, #tpu.memory_space<vmem>>, vector<64x128xf32>
      %cst_36 = arith.constant dense<0.000000e+00> : vector<2x128xf32>
      %44 = tpu.matmul %42, %43, %cst_36 {dimension_numbers = #tpu.dot_dimension_numbers<[1], [0], [0], [1], [0, 0, 1, 1], [], []>} : vector<2x64xf32>, vector<64x128xf32>, vector<2x128xf32> -> vector<2x128xf32>
      %c0_37 = arith.constant 0 : index
      %c0_38 = arith.constant 0 : index
      %45 = vector.load %arg9[%c0_37, %c0_38] : memref<1x128xf32, #tpu.memory_space<vmem>>, vector<1x128xf32>
      %46 = vector.broadcast %45 : vector<1x128xf32> to vector<2x128xf32>
      %47 = arith.addf %44, %46 : vector<2x128xf32>
      %cst_39 = arith.constant 0.000000e+00 : f32
      %48 = vector.broadcast %cst_39 : f32 to vector<2x128xf32>
      %49 = arith.maximumf %47, %48 : vector<2x128xf32>
      %c0_40 = arith.constant 0 : index
      %c0_41 = arith.constant 0 : index
      %50 = vector.load %arg10[%c0_40, %c0_41] : memref<1280x256xf32, #tpu.memory_space<vmem>>, vector<1280x256xf32>
      %cst_42 = arith.constant dense<0.000000e+00> : vector<2x256xf32>
      %51 = tpu.matmul %34, %50, %cst_42 {dimension_numbers = #tpu.dot_dimension_numbers<[1], [0], [0], [1], [0, 0, 1, 1], [], []>} : vector<2x1280xf32>, vector<1280x256xf32>, vector<2x256xf32> -> vector<2x256xf32>
      %c0_43 = arith.constant 0 : index
      %c0_44 = arith.constant 0 : index
      %52 = vector.load %arg11[%c0_43, %c0_44] : memref<128x256xf32, #tpu.memory_space<vmem>>, vector<128x256xf32>
      %cst_45 = arith.constant dense<0.000000e+00> : vector<2x256xf32>
      %53 = tpu.matmul %49, %52, %cst_45 {dimension_numbers = #tpu.dot_dimension_numbers<[1], [0], [0], [1], [0, 0, 1, 1], [], []>} : vector<2x128xf32>, vector<128x256xf32>, vector<2x256xf32> -> vector<2x256xf32>
      %54 = arith.addf %51, %53 : vector<2x256xf32>
      %c0_46 = arith.constant 0 : index
      %c0_47 = arith.constant 0 : index
      %55 = vector.load %arg12[%c0_46, %c0_47] : memref<1x256xf32, #tpu.memory_space<vmem>>, vector<1x256xf32>
      %56 = vector.broadcast %55 : vector<1x256xf32> to vector<2x256xf32>
      %57 = arith.addf %54, %56 : vector<2x256xf32>
      %cst_48 = arith.constant 0.000000e+00 : f32
      %58 = vector.broadcast %cst_48 : f32 to vector<2x256xf32>
      %59 = arith.maximumf %57, %58 : vector<2x256xf32>
      %c0_49 = arith.constant 0 : index
      %c0_50 = arith.constant 0 : index
      %60 = vector.load %arg13[%c0_49, %c0_50] : memref<256x2xf32, #tpu.memory_space<vmem>>, vector<256x2xf32>
      %cst_51 = arith.constant dense<0.000000e+00> : vector<2x2xf32>
      %61 = tpu.matmul %59, %60, %cst_51 {dimension_numbers = #tpu.dot_dimension_numbers<[1], [0], [0], [1], [0, 0, 1, 1], [], []>} : vector<2x256xf32>, vector<256x2xf32>, vector<2x2xf32> -> vector<2x2xf32>
      %c0_52 = arith.constant 0 : index
      %c0_53 = arith.constant 0 : index
      %62 = vector.load %arg14[%c0_52, %c0_53] : memref<1x2xf32, #tpu.memory_space<vmem>>, vector<1x2xf32>
      %63 = vector.broadcast %62 : vector<1x2xf32> to vector<2x2xf32>
      %64 = arith.addf %61, %63 : vector<2x2xf32>
      %c0_54 = arith.constant 0 : index
      %c0_55 = arith.constant 0 : index
      %65 = vector.load %arg15[%c0_54, %c0_55] : memref<2x2xf32, #tpu.memory_space<vmem>>, vector<2x2xf32>
      tpu.vector_store %arg15[%c0_54, %c0_55], %64 {strides = array<i32>} : memref<2x2xf32, #tpu.memory_space<vmem>>, vector<2x2xf32>,
    } else {
    }
    return
  }
  func.func @transform_0(%arg0: i32, %arg1: i32) -> (i32, i32, i32) {
    %c0_i32 = arith.constant 0 : i32
    %c0_i32_0 = arith.constant 0 : i32
    return %arg0, %c0_i32, %arg1 : i32, i32, i32
  }
  func.func @transform_1(%arg0: i32, %arg1: i32) -> (i32, i32) {
    %c0_i32 = arith.constant 0 : i32
    %c0_i32_0 = arith.constant 0 : i32
    return %arg0, %c0_i32 : i32, i32
  }
  func.func @transform_2(%arg0: i32, %arg1: i32) -> (i32, i32) {
    %c0_i32 = arith.constant 0 : i32
    %c0_i32_0 = arith.constant 0 : i32
    %c0_i32_1 = arith.constant 0 : i32
    return %c0_i32, %c0_i32_0 : i32, i32
  }
  func.func @transform_3(%arg0: i32, %arg1: i32) -> (i32, i32) {
    %c0_i32 = arith.constant 0 : i32
    %c0_i32_0 = arith.constant 0 : i32
    %c0_i32_1 = arith.constant 0 : i32
    return %c0_i32, %c0_i32_0 : i32, i32
  }
  func.func @transform_4(%arg0: i32, %arg1: i32) -> (i32, i32) {
    %c0_i32 = arith.constant 0 : i32
    %c0_i32_0 = arith.constant 0 : i32
    %c0_i32_1 = arith.constant 0 : i32
    return %c0_i32, %c0_i32_0 : i32, i32
  }
  func.func @transform_5(%arg0: i32, %arg1: i32) -> (i32, i32) {
    %c0_i32 = arith.constant 0 : i32
    %c0_i32_0 = arith.constant 0 : i32
    %c0_i32_1 = arith.constant 0 : i32
    return %c0_i32, %c0_i32_0 : i32, i32
  }
  func.func @transform_6(%arg0: i32, %arg1: i32) -> (i32, i32) {
    %c0_i32 = arith.constant 0 : i32
    %c0_i32_0 = arith.constant 0 : i32
    %c0_i32_1 = arith.constant 0 : i32
    return %c0_i32, %c0_i32_0 : i32, i32
  }
  func.func @transform_7(%arg0: i32, %arg1: i32) -> (i32, i32) {
    %c0_i32 = arith.constant 0 : i32
    %c0_i32_0 = arith.constant 0 : i32
    %c0_i32_1 = arith.constant 0 : i32
    return %c0_i32, %c0_i32_0 : i32, i32
  }
  func.func @transform_8(%arg0: i32, %arg1: i32) -> (i32, i32) {
    %c0_i32 = arith.constant 0 : i32
    %c0_i32_0 = arith.constant 0 : i32
    %c0_i32_1 = arith.constant 0 : i32
    return %c0_i32, %c0_i32_0 : i32, i32
  }
  func.func @transform_9(%arg0: i32, %arg1: i32) -> (i32, i32) {
    %c0_i32 = arith.constant 0 : i32
    %c0_i32_0 = arith.constant 0 : i32
    %c0_i32_1 = arith.constant 0 : i32
    return %c0_i32, %c0_i32_0 : i32, i32
  }
  func.func @transform_10(%arg0: i32, %arg1: i32) -> (i32, i32) {
    %c0_i32 = arith.constant 0 : i32
    %c0_i32_0 = arith.constant 0 : i32
    %c0_i32_1 = arith.constant 0 : i32
    return %c0_i32, %c0_i32_0 : i32, i32
  }
  func.func @transform_11(%arg0: i32, %arg1: i32) -> (i32, i32) {
    %c0_i32 = arith.constant 0 : i32
    %c0_i32_0 = arith.constant 0 : i32
    %c0_i32_1 = arith.constant 0 : i32
    return %c0_i32, %c0_i32_0 : i32, i32
  }
  func.func @transform_12(%arg0: i32, %arg1: i32) -> (i32, i32) {
    %c0_i32 = arith.constant 0 : i32
    %c0_i32_0 = arith.constant 0 : i32
    %c0_i32_1 = arith.constant 0 : i32
    return %c0_i32, %c0_i32_0 : i32, i32
  }
  func.func @transform_13(%arg0: i32, %arg1: i32) -> (i32, i32) {
    %c0_i32 = arith.constant 0 : i32
    %c0_i32_0 = arith.constant 0 : i32
    return %arg0, %c0_i32 : i32, i32
  }
}

</mosaic_0001>

<bundles_post_ra>
// kernel: efficientnet_clinical_forward.1
= control target key start
LH: loop header
LB: loop body
LE: loop exit
PB: predicated region body
PF: predicated region fallthrough
CT: control target
= control target key end

     0   :  { %s6234_s0 = inlined_call_operand.vmem [shape: bf16[2,4,256], index: 0, kind: input, shape index: {}]   ;;  %s6235_s1 = inlined_call_operand.hbm [shape: f32[2,2], index: 1, kind: input, shape index: {}]   ;;  %s6236_s2 = inlined_call_operand.hbm [shape: bf16[4,1280], index: 2, kind: input, shape index: {}]   ;;  %s6237_s3 = inlined_call_operand.hbm [shape: f32[1,1280], index: 3, kind: input, shape index: {}]   ;;  %s6238_s4 = inlined_call_operand.hbm [shape: f32[2,64], index: 4, kind: input, shape index: {}]   ;;  %s6239_s5 = inlined_call_operand.hbm [shape: f32[1,64], index: 5, kind: input, shape index: {}]   ;;  %s6240_s6 = inlined_call_operand.hbm [shape: f32[64,128], index: 6, kind: input, shape index: {}]   ;;  %s6241_s7 = inlined_call_operand.hbm [shape: f32[1,128], index: 7, kind: input, shape index: {}]   ;;  %s6242_s8 = inlined_call_operand.hbm [shape: f32[1280,256], index: 8, kind: input, shape index: {}]   ;;  %s6243_s9 = inlined_call_operand.hbm [shape: f32[128,256], index: 9, kind: input, shape index: {}]   ;;  %s6244_s10 = inlined_call_operand.hbm [shape: f32[1,256], index: 10, kind: input, shape index: {}]   ;;  %s6245_s11 = inlined_call_operand.vmem [shape: f32[256,2], index: 11, kind: input, shape index: {}]   ;;  %s6246_s12 = inlined_call_operand.hbm [shape: f32[1,2], index: 12, kind: input, shape index: {}]   ;;  %s6247_s13 = inlined_call_operand.hbm [shape: f32[2,2], index: 13, kind: output, shape index: {}]  }
   0x1   :  { %6255 = sst [smem:[#allocation32_spill]] %s6236_s2 }
   0x2   :  { %6256 = sst [smem:[#allocation33_spill]] %s6238_s4 }
   0x3   :  { %6257 = sst [smem:[#allocation34_spill]] %s6247_s13 }
   0x4   :  { %18 = vsyncpa [#allocation5], 0 }
   0x5   :  { %19 = vsyncpa [#allocation8], 0 }
   0x6   :  { %20 = vsyncpa [#allocation11], 0 }
   0x7   :  { %21 = vsyncpa [#allocation14], 0 }
   0x8   :  { %22 = vsyncpa [#allocation17], 0 }
   0x9   :  { %23 = vsyncpa [#allocation20], 0 }
   0xa   :  { %24 = vsyncpa [#allocation6], 0  ;;  %s5072_s25 = smov 0   ;;  %s5074_s26 = smov 0  }
   0xb   :  { %s5076_s27 = smov 0   ;;  %s5078_s28 = smov 0  }
   0xc   :  { %s5080_s29 = smov 0  }
   0xd LB: > { %s6248_s30 = sadd.s32 4294967295, %s4978_s29   ;;  %s39_s14 = sadd.s32 1, %s4974_s28  ;;  %s4978_s29 = sphi %s5080_s29, %s30_s29   ;;  %s4974_s28 = sphi %s5078_s28, %s6282_s28   ;;  %s4970_s27 = sphi %s5076_s27, %s6281_s27   ;;  %s4966_s26 = sphi %s5074_s26, %s6280_s26   ;;  %s4962_s25 = sphi %s5072_s25, %s6279_s25  }
   0xe   : > { %p40_p0 = scmp.ge.s32.totalorder %s39_s14, 2  ;;  %s51_s15 = sadd.s32 1, %s4966_s26 }
   0xf   : > { %p58_p1 = scmp.ne.s32.totalorder %s4966_s26, %s4962_s25  ;;  %p59_p2 = scmp.eq.s32.totalorder %s4978_s29, 0 }
  0x10   : > { %s6284_s14 = smov (%p40_p0, %s39_s14), 0  ;;  %p4230_p4 = scmp.ge.s32.totalorder %s4978_s29, 1 }
  0x11   : > { %6258 = sst [smem:[#allocation30_spill]] %s6284_s14  ;;  %p5105_p3 = por %p59_p2, %p58_p1 }
  0x12   : > { %s47_s17 = ssub.s32 %s4974_s28, %s6284_s14  ;;  %p358_p5 = scmp.lt.s32.totalorder %s4978_s29, 3 }
  0x13   : > { %s6259_s16 = scalar_select %p5105_p3, 1, 0 }
  0x14   : > { %p49_p6 = scmp.eq.s32.totalorder %s47_s17, 0  ;;  %p5113_p7 = pnand %p4230_p4, %p358_p5 }
  0x15   : > { %p5119_p8 = scmp.eq.s32.totalorder %s6248_s30, 0  ;;  %s4980_s21 = smov [#allocation7]  }
  0x16   : > { %s6260_s18 = scalar_select %p5113_p7, 1, 0 }
  0x17   : > { %s6261_s19 = scalar_select %p5119_p8, 1, 0 }
  0x18   : > { %s5124_s20 = scalar_select %p49_p6, %s4966_s26, %s51_s15  }
  0x19   : > { %p4480_p9 = pneg %p5113_p7  ;;  %s384_s22 = sshll.u32 %s4980_s21, 4  ;;  %s385_s22 = int_to_ptr.vmem [resolvable:$true] %s384_s22 }
  0x1a   : > { %6262 = sst [smem:[#allocation31_spill]] %s5124_s20  ;;  %s4981_s24 = smov [#allocation10]  }
  0x1b   : > { %p5130_p10 = pnand %p5119_p8, %p4480_p9  ;;  %s406_s17 = sshll.u32 %s4981_s24, 4  ;;  %s407_s17 = int_to_ptr.vmem [resolvable:$true] %s406_s17 }
  0x1c   : > { %s4613_s15 = scalar_lea.vmem %s385_s22, 320  ;;  %p4621_p1 = scmp.lt.s32.totalorder %s385_s22, %s385_s22 }
  0x1d   : > { %p5136_p11 = pneg %p5130_p10  ;;  %p4614_p12 = scmp.ne.s32.totalorder %s385_s22, %s4613_s15 }
  0x1e   : > { %p4622_p2 = scmp.lt.s32.totalorder %s4613_s15, %s4613_s15 }
  0x1f   : > { %p4616_p13 = pnand %p4614_p12, %p5136_p11 }
  0x20   : > { %p4623_p4 = por %p4622_p2, %p4621_p1 }
  0x21   : > { %p4617_p0 = pneg %p4616_p13 }
  0x23   : > { %p4624_p5 = pnand %p4623_p4, %p4617_p0 }
  0x25   : > { %4627 = shalt.err (!%p4624_p5)
}
  0x26   : > { %s6265_s2 = sld [smem:[#allocation32_spill]]  ;;  %s4639_s14 = scalar_lea.vmem %s407_s17, 32 }
  0x27   : > { %p4640_p6 = scmp.ne.s32.totalorder %s407_s17, %s4639_s14  ;;  %p4647_p7 = scmp.lt.s32.totalorder %s407_s17, %s407_s17 }
  0x28   : > { %p4648_p12 = scmp.lt.s32.totalorder %s4639_s14, %s4639_s14 }
  0x29   : > { %p4642_p9 = pnand %p4640_p6, %p5136_p11 }
  0x2a   : > { %p4649_p13 = por %p4648_p12, %p4647_p7 }
  0x2b   : > { %p4643_p8 = pneg %p4642_p9 }
  0x2c   : > { %4486 = dma.hbm_to_vmem [thread:$0]  (!%p5130_p10), %s6265_s2, 320, %s385_s22, [#allocation8]  }
  0x2d   : > { %p4650_p3 = pnand %p4649_p13, %p4643_p8 }
  0x2f   : > { %4653 = shalt.err (!%p4650_p3)
}
  0x30   : > { %s6266_s4 = sld [smem:[#allocation33_spill]]  ;;  %s4982_s21 = smov [#allocation13]  }
  0x31   : > { %s427_s24 = sshll.u32 %s4982_s21, 4  ;;  %s428_s24 = int_to_ptr.vmem [resolvable:$true] %s427_s24 }
  0x32   : > { %s4665_s22 = scalar_lea.vmem %s428_s24, 1024  ;;  %p4673_p4 = scmp.lt.s32.totalorder %s428_s24, %s428_s24 }
  0x33   : > { %p4666_p0 = scmp.ne.s32.totalorder %s428_s24, %s4665_s22  ;;  %p4674_p5 = scmp.lt.s32.totalorder %s4665_s22, %s4665_s22 }
  0x35   : > { %p4668_p1 = pnand %p4666_p0, %p5136_p11  ;;  %p4675_p7 = por %p4674_p5, %p4673_p4 }
  0x36   : > { %4492 = dma.hbm_to_vmem [thread:$0]  (!%p5130_p10), %s6266_s4, 32, %s407_s17, [#allocation11]  }
  0x37   : > { %p4669_p2 = pneg %p4668_p1 }
  0x39   : > { %p4676_p8 = pnand %p4675_p7, %p4669_p2 }
  0x3b   : > { %4679 = shalt.err (!%p4676_p8)
}
  0x3c   : > { %s4983_s14 = smov 128   ;;  %s4984_s2 = smov 8  }
  0x3d   : > { %4498 = dma.hbm_to_vmem [thread:$0]  (!%p5130_p10), %s6240_s6, 1024, %s428_s24, [#allocation14], %s4983_s14, %s4983_s14, %s4984_s2  }
  0x3e   : > { %s4985_s15 = smov [#allocation16]  }
  0x3f   : > { %s451_s21 = sshll.u32 %s4985_s15, 4  ;;  %s452_s21 = int_to_ptr.vmem [resolvable:$true] %s451_s21 }
  0x40   : > { %s4691_s4 = scalar_lea.vmem %s452_s21, 40960  ;;  %p4699_p12 = scmp.lt.s32.totalorder %s452_s21, %s452_s21 }
  0x41   : > { %p4692_p3 = scmp.ne.s32.totalorder %s452_s21, %s4691_s4  ;;  %p4700_p13 = scmp.lt.s32.totalorder %s4691_s4, %s4691_s4 }
  0x43   : > { %p4694_p6 = pnand %p4692_p3, %p5136_p11  ;;  %p4701_p0 = por %p4700_p13, %p4699_p12 }
  0x45   : > { %p4695_p9 = pneg %p4694_p6 }
  0x47   : > { %p4702_p1 = pnand %p4701_p0, %p4695_p9 }
  0x49   : > { %4705 = shalt.err (!%p4702_p1)
}
  0x4a   : > { %s6253_s22 = smov 256   ;;  %s6254_s13 = smov 16  }
  0x4b   : > { %4504 = dma.hbm_to_vmem [thread:$0]  (!%p5130_p10), %s6242_s8, 40960, %s452_s21, [#allocation17], %s6253_s22, %s6253_s22, %s6254_s13  }
  0x4c   : > { %s4988_s14 = smov [#allocation19]  }
  0x4d   : > { %s478_s20 = sshll.u32 %s4988_s14, 4  ;;  %s479_s20 = int_to_ptr.vmem [resolvable:$true] %s478_s20 }
  0x4e   : > { %s4717_s17 = scalar_lea.vmem %s479_s20, 32  ;;  %p4725_p7 = scmp.lt.s32.totalorder %s479_s20, %s479_s20 }
  0x4f   : > { %p4718_p2 = scmp.ne.s32.totalorder %s479_s20, %s4717_s17  ;;  %p4726_p8 = scmp.lt.s32.totalorder %s4717_s17, %s4717_s17 }
  0x51   : > { %p4720_p4 = pnand %p4718_p2, %p5136_p11  ;;  %p4727_p3 = por %p4726_p8, %p4725_p7 }
  0x53   : > { %p4721_p5 = pneg %p4720_p4 }
  0x55   : > { %p4728_p6 = pnand %p4727_p3, %p4721_p5 }
  0x57   : > { %4731 = shalt.err (!%p4728_p6)
}
  0x58   : > { %4510 = dma.hbm_to_vmem [thread:$0]  (!%p5130_p10), %s6244_s10, 32, %s479_s20, [#allocation20]  }
  0x59   : > { %s4989_s21 = smov [#allocation4]   ;;  %s4990_s24 = smov [#allocation9]  }
  0x5a   : > { %s373_s2 = sshll.u32 %s4989_s21, 4  ;;  %s395_s14 = sshll.u32 %s4990_s24, 4  ;;  %s374_s2 = int_to_ptr.vmem [resolvable:$true] %s373_s2  ;;  %s396_s14 = int_to_ptr.vmem [resolvable:$true] %s395_s14 }
  0x5b   : > { %s4743_s22 = scalar_lea.vmem %s374_s2, 32  ;;  %p4751_p0 = scmp.lt.s32.totalorder %s374_s2, %s374_s2 }
  0x5c   : > { %p4744_p9 = scmp.ne.s32.totalorder %s374_s2, %s4743_s22  ;;  %p4752_p1 = scmp.lt.s32.totalorder %s4743_s22, %s4743_s22 }
  0x5e   : > { %p4746_p12 = pnand %p4744_p9, %p5136_p11  ;;  %p4753_p2 = por %p4752_p1, %p4751_p0 }
  0x60   : > { %p4747_p13 = pneg %p4746_p12 }
  0x62   : > { %p4754_p4 = pnand %p4753_p2, %p4747_p13 }
  0x64   : > { %4757 = shalt.err (!%p4754_p4)
}
  0x65   : > { %4483 = dma.hbm_to_vmem [thread:$0]  (!%p5130_p10), %s6235_s1, 32, %s374_s2, [#allocation5]  }
  0x66   : > { %s4769_s4 = scalar_lea.vmem %s396_s14, 160  ;;  %p4777_p3 = scmp.lt.s32.totalorder %s396_s14, %s396_s14 }
  0x67   : > { %p4770_p5 = scmp.ne.s32.totalorder %s396_s14, %s4769_s4  ;;  %p4778_p6 = scmp.lt.s32.totalorder %s4769_s4, %s4769_s4 }
  0x69   : > { %p4772_p7 = pnand %p4770_p5, %p5136_p11  ;;  %p4779_p9 = por %p4778_p6, %p4777_p3 }
  0x6b   : > { %p4773_p8 = pneg %p4772_p7 }
  0x6d   : > { %p4780_p12 = pnand %p4779_p9, %p4773_p8 }
  0x6f   : > { %4783 = shalt.err (!%p4780_p12)
}
  0x70   : > { %4489 = dma.hbm_to_vmem [thread:$0]  (!%p5130_p10), %s6237_s3, 160, %s396_s14, [#allocation8]  }
  0x71   : > { %s4991_s21 = smov [#allocation12]   ;;  %s4992_s2 = smov [#allocation15]  }
  0x72   : > { %s417_s24 = sshll.u32 %s4991_s21, 4  ;;  %s441_s17 = sshll.u32 %s4992_s2, 4  ;;  %s418_s24 = int_to_ptr.vmem [resolvable:$true] %s417_s24  ;;  %s442_s17 = int_to_ptr.vmem [resolvable:$true] %s441_s17 }
  0x73   : > { %s4795_s20 = scalar_lea.vmem %s418_s24, 16  ;;  %s4802_s4 = scalar_lea.vmem %s418_s24, 32 }
  0x74   : > { %p4796_p13 = scmp.ne.s32.totalorder %s418_s24, %s4795_s20  ;;  %p4803_p2 = scmp.lt.s32.totalorder %s418_s24, %s418_s24 }
  0x75   : > { %p4804_p4 = scmp.lt.s32.totalorder %s4802_s4, %s4795_s20 }
  0x76   : > { %p4798_p0 = pnand %p4796_p13, %p5136_p11 }
  0x77   : > { %p4805_p5 = por %p4804_p4, %p4803_p2 }
  0x78   : > { %p4799_p1 = pneg %p4798_p0 }
  0x7a   : > { %p4806_p7 = pnand %p4805_p5, %p4799_p1 }
  0x7c   : > { %4809 = shalt.err (!%p4806_p7)
}
  0x7d   : > { %4495 = dma.hbm_to_vmem [thread:$0]  (!%p5130_p10), %s6239_s5, 16, %s418_s24, [#allocation11]  }
  0x7e   : > { %s4821_s15 = scalar_lea.vmem %s442_s17, 16  ;;  %s4828_s21 = scalar_lea.vmem %s442_s17, 32 }
  0x7f   : > { %p4822_p8 = scmp.ne.s32.totalorder %s442_s17, %s4821_s15  ;;  %p4829_p9 = scmp.lt.s32.totalorder %s442_s17, %s442_s17 }
  0x80   : > { %p4830_p12 = scmp.lt.s32.totalorder %s4828_s21, %s4821_s15 }
  0x81   : > { %p4824_p3 = pnand %p4822_p8, %p5136_p11 }
  0x82   : > { %p4831_p13 = por %p4830_p12, %p4829_p9 }
  0x83   : > { %p4825_p6 = pneg %p4824_p3 }
  0x85   : > { %p4832_p0 = pnand %p4831_p13, %p4825_p6 }
  0x87   : > { %4835 = shalt.err (!%p4832_p0)
}
  0x88   : > { %4501 = dma.hbm_to_vmem [thread:$0]  (!%p5130_p10), %s6241_s7, 16, %s442_s17, [#allocation14]  }
  0x89   : > { %s4993_s4 = smov [#allocation18]   ;;  %s4994_s14 = smov [#allocation21]  }
  0x8a   : > { %s464_s24 = sshll.u32 %s4993_s4, 4  ;;  %s492_s22 = sshll.u32 %s4994_s14, 4  ;;  %s465_s24 = int_to_ptr.vmem [resolvable:$true] %s464_s24  ;;  %s493_s22 = int_to_ptr.vmem [resolvable:$true] %s492_s22 }
  0x8b   : > { %s4847_s13 = scalar_lea.vmem %s465_s24, 4096  ;;  %p4855_p5 = scmp.lt.s32.totalorder %s465_s24, %s465_s24 }
  0x8c   : > { %p4848_p1 = scmp.ne.s32.totalorder %s465_s24, %s4847_s13  ;;  %p4856_p7 = scmp.lt.s32.totalorder %s4847_s13, %s4847_s13 }
  0x8e   : > { %p4850_p2 = pnand %p4848_p1, %p5136_p11  ;;  %p4857_p8 = por %p4856_p7, %p4855_p5 }
  0x90   : > { %p4851_p4 = pneg %p4850_p2 }
  0x92   : > { %p4858_p3 = pnand %p4857_p8, %p4851_p4 }
  0x94   : > { %4861 = shalt.err (!%p4858_p3)
}
  0x95   : > { %s6267_s15 = smov 16   ;;  %s6268_s17 = smov 256  }
  0x96   : > { %4507 = dma.hbm_to_vmem [thread:$0]  (!%p5130_p10), %s6243_s9, 4096, %s465_s24, [#allocation17], %s6268_s17, %s6268_s17, %s6267_s15  }
  0x97   : > { %s4873_s20 = scalar_lea.vmem %s493_s22, 16  ;;  %s4880_s4 = scalar_lea.vmem %s493_s22, 32 }
  0x98   : > { %p4874_p6 = scmp.ne.s32.totalorder %s493_s22, %s4873_s20  ;;  %p4881_p13 = scmp.lt.s32.totalorder %s493_s22, %s493_s22 }
  0x99   : > { %p4882_p0 = scmp.lt.s32.totalorder %s4880_s4, %s4873_s20 }
  0x9a   : > { %p4876_p9 = pnand %p4874_p6, %p5136_p11 }
  0x9b   : > { %p4883_p1 = por %p4882_p0, %p4881_p13 }
  0x9c   : > { %p4877_p12 = pneg %p4876_p9 }
  0x9e   : > { %p4884_p2 = pnand %p4883_p1, %p4877_p12 }
  0xa0   : > { %4887 = shalt.err (!%p4884_p2)
}
  0xa1   : > { %4513 = dma.hbm_to_vmem [thread:$0]  (!%p5130_p10), %s6246_s12, 16, %s493_s22, [#allocation20]  }
  0xa2   : > { %p4242_p4 = scmp.ge.s32.totalorder %s4978_s29, 2 }
  0xa3   : > { %p6269_p5 = scmp.ne.s32.totalorder (!%p4242_p4), %s6259_s16, 0 }
  0xa4   : > { %499 = sbr.rel (%p4242_p4) target bundleno = 174 (0xae), region = 64 }
  0xa9   : > { %502 = sbr.rel (!%p6269_p5) target bundleno = 174 (0xae), region = 68  ;;  %s504_s30 = sand.u32 (%p6269_p5), 1, %s4966_s26  }
  0xaa   : > { %s4244_s24 = sshll.u32 (%p6269_p5), %s4974_s28, 1  ;;  %s4243_s15 = sshll.u32 (%p6269_p5), %s504_s30, 2 }
  0xab   : > { %s511_s2 = scalar_lea.vmem (%p6269_p5), %s6234_s0, %s4244_s24  ;;  %s506_s23 = scalar_lea.vmem (%p6269_p5), [#allocation3], %s4243_s15 }
  0xac   : > { %v528_v0 = vld [vmem:[%s511_s2] sm:$0x3] (%p6269_p5)  ;;  %v530_v1 = vld [vmem:[%s511_s2 + $0x4] sm:$0x3] (%p6269_p5) }
  0xad   : > { %529 = vst [vmem:[%s506_s23] sm:$0x3] (%p6269_p5), %v528_v0  ;;  %531 = vst [vmem:[%s506_s23 + $0x2] sm:$0x3] (%p6269_p5), %v530_v1 }
  0xae PF: > { %p6270_p10 = scmp.ne.s32.totalorder %s6260_s18, 0 }
  0xaf   : > { %s557_s16 = sand.u32 (!%p6270_p10), 1, %s4962_s25   ;;  %p6271_p11 = scmp.ne.s32.totalorder (!%p6270_p10), %s6261_s19, 0 }
  0xb0   : > { %554 = sbr.rel (%p6270_p10) target bundleno = 1794 (0x702), region = 102  ;;  %s5234_s22 = sshll.u32 (!%p6270_p10), %s557_s16, 2 }
  0xb1   : > { %s559_s20 = scalar_lea.vmem (!%p6270_p10), [#allocation3], %s5234_s22 }
  0xb5   : > { %4933 = dma.done.wait (%p6271_p11), [#allocation5], 32  }
  0xb6   : > { %4935 = vsyncadd (%p6271_p11), [#allocation5], 4294967264 }
  0xb7   : > { %4937 = dma.done.wait (%p6271_p11), [#allocation8], 480  }
  0xb8   : > { %4939 = vsyncadd (%p6271_p11), [#allocation8], 4294966816 }
  0xb9   : > { %4941 = dma.done.wait (%p6271_p11), [#allocation11], 48  }
  0xba   : > { %4943 = vsyncadd (%p6271_p11), [#allocation11], 4294967248 }
  0xbb   : > { %4945 = dma.done.wait (%p6271_p11), [#allocation14], 1040  }
  0xbc   : > { %4947 = vsyncadd (%p6271_p11), [#allocation14], 4294966256 }
  0xbd   : > { %4949 = dma.done.wait (%p6271_p11), [#allocation17], 45056  }
  0xbe   : > { %4951 = vsyncadd (%p6271_p11), [#allocation17], 4294922240 }
  0xbf   : > { %4953 = dma.done.wait (%p6271_p11), [#allocation20], 48  }
  0xc0   : > { %4955 = vsyncadd (%p6271_p11), [#allocation20], 4294967248  ;;  %p4258_p7 = scmp.ne.s32.totalorder %s4970_s27, 0 }
  0xc2   : > { %644 = sbr.rel (%p4258_p7) target bundleno = 202 (0xca), region = 154 }
  0xc7   : > { %v4995_v2 = vmov 0.0  }
  0xc8   : > { %645 = vst [vmem:[#allocation2] sm:$0xff] %v4995_v2  ;;  %646 = vst [vmem:[#allocation2 + $0x8] sm:$0xff] %v4995_v2 }
  0xc9   : > { %647 = vst [vmem:[#allocation2 + $0x10] sm:$0xf] %v4995_v2 }
  0xca PF: > { %v653_v3 = vld [vmem:[%s559_s20] sm:$0x3]  ;;  %v648_v4 = vld [vmem:[#allocation7] sm:$0xff]  ;;  %v656_v5 = vlaneseq  ;;  %v4996_v6 = vmov 1983009808   ;;  %v649_v8 = vld [vmem:[#allocation7 + $0x8] sm:$0xff] }
  0xcb   : > { %706 = vxpose.xlu0.c.b16.start.end [1/1] (short) %v653_v3, 128  ;;  %v727_v7 = vunpack.c.l.s4 %v4996_v6  ;;  %v4997_v10 = vmov 0   ;;  %v725_v12 = vcombine.high %v648_v4, %v648_v4  ;;  %v742_v13 = vcombine.high %v649_v8, %v649_v8  ;;  %v4305_v25 = vld [vmem:[%s559_s20 + $0x2] sm:$0x3]  ;;  %p4351_p8 = scmp.ne.s32.totalorder %s4970_s27, 1 }
  0xcc   : > { %v5265_v9 = vshrl.u32 %v656_v5, 7  ;;  %855 = vmatprep.mubr.bf16.mxu0 %v4997_v10  ;;  %968 = vmatprep.mubr.bf16.mxu1 %v4997_v10  ;;  %vm792_vm0 = vcmask 1041408   ;;  %v4259_v26 = vld.sshfl [vmem:[#allocation7 + $0x10] sm:$0x33 pattern:$0x76325410] }
  0xcd   : > { %v728_v11 = vunpack.c.0.s8 %v727_v7  ;;  %vm767_vm1 = vcmask 31744   ;;  %v5307_v30 = vcombine.high %v4259_v26, %v4259_v26  ;;  %v5377_v38 = vsel %vm792_vm0, %v4259_v26, 0  ;;  %v5507_v49 = vld [vmem:[#allocation9] sm:$0xff] }
  0xce   : > { %v5504_v47 = vsub.s32 0, %v5265_v9  ;;  %v666_v48 = vsub.s32 2, %v5265_v9  ;;  %v5510_v50 = vsub.s32 1, %v5265_v9  ;;  %v670_v51 = vsub.s32 3, %v5265_v9 }
  0xcf   : > { %v5270_v14 = vsub.s32 %v728_v11, %v5265_v9  ;;  %vm5927_vm2 = vcmp.lt.s32.totalorder %v656_v5, 256 }
  0xd0   : > { %v5515_v52 = vrot.slane %v5507_v49, %v5504_v47  ;;  %v5518_v53 = vrot.slane %v5507_v49, %v666_v48  ;;  %v5526_v56 = vrot.slane %v5507_v49, %v5510_v50  ;;  %v5529_v57 = vrot.slane %v5507_v49, %v670_v51 }
  0xd1   : > { %v732_v15 = vrot.slane %v648_v4, %v5270_v14  ;;  %v739_v16 = vrot.slane %v725_v12, %v5270_v14  ;;  %v749_v17 = vrot.slane %v649_v8, %v5270_v14  ;;  %v756_v18 = vrot.slane %v742_v13, %v5270_v14 }
  0xd3   : > { %v740_v19 = vcombine.high %v732_v15, %v732_v15  ;;  %v5277_v20 = vsel %vm792_vm0, %v732_v15, 0  ;;  %v5279_v21 = vcombine.high %v739_v16, %v739_v16  ;;  %v5282_v22 = vsel %vm792_vm0, %v739_v16, 0 }
  0xd4   : > { %v5284_v23 = vcombine.high %v749_v17, %v749_v17  ;;  %v5286_v24 = vcombine.high %v756_v18, %v756_v18  ;;  %v5300_v27 = vsel %vm792_vm0, %v749_v17, 0  ;;  %v5303_v28 = vsel %vm792_vm0, %v756_v18, 0 }
  0xd5   : > { %4260 = vmatprep.subr.msk.bf16.mxu0 %vm792_vm0, %v740_v19  ;;  %4269 = vmatprep.subr.msk.bf16.mxu1 %vm792_vm0, %v5279_v21 }
  0xd6   : > { %838 = vmatpush1.bf16.msra.mxu0 %v5277_v20  ;;  %951 = vmatpush1.bf16.msra.mxu1 %v5282_v22 }
  0xd7   : > { %4278 = vmatprep.subr.msk.bf16.mxu0 %vm792_vm0, %v5284_v23  ;;  %4287 = vmatprep.subr.msk.bf16.mxu1 %vm792_vm0, %v5286_v24 }
  0xe8   : > { %1847 = vxpose.xlu0.c.b16.start.end [1/1] (short) %v4305_v25, 128 }
 0x12d   : > { %v5305_v29 = vpop.trf.xlu0 }
 0x12e   : > { %4261 = vmatmul.mubr.msk.bf16.vlgmr.msra.gmra.mxu0 %vm767_vm1, %v5305_v29  ;;  %4270 = vmatmul.mubr.msk.bf16.vlgmr.msra.gmra.mxu1 %vm767_vm1, %v5305_v29 }
 0x12f   : > { %1064 = vmatpush1.bf16.msra.mxu0 %v5300_v27  ;;  %1177 = vmatpush1.bf16.msra.mxu1 %v5303_v28 }
 0x130   : > { %865 = vmatprep.mubr.bf16.mxu0 %v4997_v10  ;;  %978 = vmatprep.mubr.bf16.mxu1 %v4997_v10 }
 0x131   : > { %4296 = vmatprep.subr.msk.bf16.mxu0 %vm792_vm0, %v5307_v30  ;;  %4306 = vmatprep.subr.msk.bf16.mxu1 %vm792_vm0, %v740_v19  ;;  %v5320_v31 = vpop.trf.xlu0 }
 0x135   : > { %v5328_v32 = vpop.trf.xlu0 }
 0x136   : > { %4262 = vmatmul.mubr.msk.bf16.gmra.mxu0 %vm767_vm1, %v5320_v31  ;;  %4271 = vmatmul.mubr.msk.bf16.gmra.mxu1 %vm767_vm1, %v5320_v31 }
 0x137   : > { %875 = vmatprep.mubr.bf16.mxu0 %v4997_v10  ;;  %988 = vmatprep.mubr.bf16.mxu1 %v4997_v10 }
 0x139   : > { %v5336_v33 = vpop.trf.xlu0 }
 0x13d   : > { %v5344_v34 = vpop.trf.xlu0 }
 0x13e   : > { %4263 = vmatmul.mubr.msk.bf16.gmra.mxu0 %vm767_vm1, %v5328_v32  ;;  %4272 = vmatmul.mubr.msk.bf16.gmra.mxu1 %vm767_vm1, %v5328_v32 }
 0x13f   : > { %885 = vmatprep.mubr.bf16.mxu0 %v4997_v10  ;;  %998 = vmatprep.mubr.bf16.mxu1 %v4997_v10 }
 0x141   : > { %v5352_v35 = vpop.trf.xlu0 }
 0x145   : > { %v5360_v36 = vpop.trf.xlu0 }
 0x146   : > { %4264 = vmatmul.mubr.msk.bf16.gmra.mxu0 %vm767_vm1, %v5336_v33  ;;  %4273 = vmatmul.mubr.msk.bf16.gmra.mxu1 %vm767_vm1, %v5336_v33 }
 0x147   : > { %895 = vmatprep.mubr.bf16.mxu0 %v4997_v10  ;;  %1008 = vmatprep.mubr.bf16.mxu1 %v4997_v10 }
 0x149   : > { %v5368_v37 = vpop.trf.xlu0 }
 0x14d   : > { %v5433_v39 = vpop.trf.xlu0 }
 0x14e   : > { %4265 = vmatmul.mubr.msk.bf16.gmra.mxu0 %vm767_vm1, %v5344_v34  ;;  %4274 = vmatmul.mubr.msk.bf16.gmra.mxu1 %vm767_vm1, %v5344_v34 }
 0x14f   : > { %905 = vmatprep.mubr.bf16.mxu0 %v4997_v10  ;;  %1018 = vmatprep.mubr.bf16.mxu1 %v4997_v10 }
 0x151   : > { %v5447_v40 = vpop.trf.xlu0 }
 0x155   : > { %v5455_v41 = vpop.trf.xlu0 }
 0x156   : > { %4266 = vmatmul.mubr.msk.bf16.gmra.mxu0 %vm767_vm1, %v5352_v35  ;;  %4275 = vmatmul.mubr.msk.bf16.gmra.mxu1 %vm767_vm1, %v5352_v35 }
 0x157   : > { %915 = vmatprep.mubr.bf16.mxu0 %v4997_v10  ;;  %1028 = vmatprep.mubr.bf16.mxu1 %v4997_v10 }
 0x159   : > { %v5463_v42 = vpop.trf.xlu0 }
 0x15d   : > { %v5471_v43 = vpop.trf.xlu0 }
 0x15e   : > { %4267 = vmatmul.mubr.msk.bf16.gmra.mxu0 %vm767_vm1, %v5360_v36  ;;  %4276 = vmatmul.mubr.msk.bf16.gmra.mxu1 %vm767_vm1, %v5360_v36 }
 0x15f   : > { %925 = vmatprep.mubr.bf16.mxu0 %v4997_v10  ;;  %1038 = vmatprep.mubr.bf16.mxu1 %v4997_v10 }
 0x161   : > { %v5479_v44 = vpop.trf.xlu0 }
 0x165   : > { %v5487_v45 = vpop.trf.xlu0 }
 0x166   : > { %4268 = vmatmul.mubr.msk.bf16.gmra.mxu0 %vm767_vm1, %v5368_v37  ;;  %4277 = vmatmul.mubr.msk.bf16.gmra.mxu1 %vm767_vm1, %v5368_v37 }
 0x167   : > { %1081 = vmatprep.mubr.bf16.mxu0 %v4997_v10  ;;  %1194 = vmatprep.mubr.bf16.mxu1 %v4997_v10 }
 0x169   : > { %v5495_v46 = vpop.trf.xlu0 }
 0x16e   : > { %4279 = vmatmul.mubr.msk.bf16.vlgmr.msra.gmra.mxu0 %vm767_vm1, %v5305_v29  ;;  %4288 = vmatmul.mubr.msk.bf16.vlgmr.msra.gmra.mxu1 %vm767_vm1, %v5305_v29 }
 0x16f   : > { %1290 = vmatpush1.bf16.msra.mxu0 %v5377_v38  ;;  %1902 = vmatpush1.bf16.msra.mxu1 %v5277_v20 }
 0x170   : > { %1091 = vmatprep.mubr.bf16.mxu0 %v4997_v10  ;;  %1204 = vmatprep.mubr.bf16.mxu1 %v4997_v10 }
 0x171   : > { %4315 = vmatprep.subr.msk.bf16.mxu0 %vm792_vm0, %v5279_v21  ;;  %4324 = vmatprep.subr.msk.bf16.mxu1 %vm792_vm0, %v5284_v23 }
 0x176   : > { %4280 = vmatmul.mubr.msk.bf16.gmra.mxu0 %vm767_vm1, %v5320_v31  ;;  %4289 = vmatmul.mubr.msk.bf16.gmra.mxu1 %vm767_vm1, %v5320_v31 }
 0x177   : > { %1101 = vmatprep.mubr.bf16.mxu0 %v4997_v10  ;;  %1214 = vmatprep.mubr.bf16.mxu1 %v4997_v10 }
 0x17e   : > { %4281 = vmatmul.mubr.msk.bf16.gmra.mxu0 %vm767_vm1, %v5328_v32  ;;  %4290 = vmatmul.mubr.msk.bf16.gmra.mxu1 %vm767_vm1, %v5328_v32 }
 0x17f   : > { %1111 = vmatprep.mubr.bf16.mxu0 %v4997_v10  ;;  %1224 = vmatprep.mubr.bf16.mxu1 %v4997_v10 }
 0x186   : > { %4282 = vmatmul.mubr.msk.bf16.gmra.mxu0 %vm767_vm1, %v5336_v33  ;;  %4291 = vmatmul.mubr.msk.bf16.gmra.mxu1 %vm767_vm1, %v5336_v33 }
 0x187   : > { %1121 = vmatprep.mubr.bf16.mxu0 %v4997_v10  ;;  %1234 = vmatprep.mubr.bf16.mxu1 %v4997_v10 }
 0x18e   : > { %4283 = vmatmul.mubr.msk.bf16.gmra.mxu0 %vm767_vm1, %v5344_v34  ;;  %4292 = vmatmul.mubr.msk.bf16.gmra.mxu1 %vm767_vm1, %v5344_v34 }
 0x18f   : > { %1131 = vmatprep.mubr.bf16.mxu0 %v4997_v10  ;;  %1244 = vmatprep.mubr.bf16.mxu1 %v4997_v10 }
 0x196   : > { %4284 = vmatmul.mubr.msk.bf16.gmra.mxu0 %vm767_vm1, %v5352_v35  ;;  %4293 = vmatmul.mubr.msk.bf16.gmra.mxu1 %vm767_vm1, %v5352_v35 }
 0x197   : > { %1141 = vmatprep.mubr.bf16.mxu0 %v4997_v10  ;;  %1254 = vmatprep.mubr.bf16.mxu1 %v4997_v10 }
 0x19e   : > { %4285 = vmatmul.mubr.msk.bf16.gmra.mxu0 %vm767_vm1, %v5360_v36  ;;  %4294 = vmatmul.mubr.msk.bf16.gmra.mxu1 %vm767_vm1, %v5360_v36 }
 0x19f   : > { %1151 = vmatprep.mubr.bf16.mxu0 %v4997_v10  ;;  %1264 = vmatprep.mubr.bf16.mxu1 %v4997_v10 }
 0x1a6   : > { %4286 = vmatmul.mubr.msk.bf16.gmra.mxu0 %vm767_vm1, %v5368_v37  ;;  %4295 = vmatmul.mubr.msk.bf16.gmra.mxu1 %vm767_vm1, %v5368_v37 }
 0x1a7   : > { %1307 = vmatprep.mubr.bf16.mxu0 %v4997_v10  ;;  %1919 = vmatprep.mubr.bf16.mxu1 %v4997_v10 }
 0x1ae   : > { %4297 = vmatmul.mubr.msk.bf16.vlgmr.msra.gmra.mxu0 %vm767_vm1, %v5305_v29  ;;  %4307 = vmatmul.mubr.msk.bf16.vlgmr.msra.gmra.mxu1 %vm767_vm1, %v5433_v39 }
 0x1af   : > { %2015 = vmatpush1.bf16.msra.mxu0 %v5282_v22  ;;  %2128 = vmatpush1.bf16.msra.mxu1 %v5300_v27 }
 0x1b0   : > { %1317 = vmatprep.mubr.bf16.mxu0 %v4997_v10  ;;  %1929 = vmatprep.mubr.bf16.mxu1 %v4997_v10 }
 0x1b1   : > { %4333 = vmatprep.subr.msk.bf16.mxu0 %vm792_vm0, %v5286_v24  ;;  %4342 = vmatprep.subr.msk.bf16.mxu1 %vm792_vm0, %v5307_v30 }
 0x1b6   : > { %4298 = vmatmul.mubr.msk.bf16.gmra.mxu0 %vm767_vm1, %v5320_v31  ;;  %4308 = vmatmul.mubr.msk.bf16.gmra.mxu1 %vm767_vm1, %v5447_v40 }
 0x1b7   : > { %1327 = vmatprep.mubr.bf16.mxu0 %v4997_v10  ;;  %1939 = vmatprep.mubr.bf16.mxu1 %v4997_v10 }
 0x1be   : > { %4299 = vmatmul.mubr.msk.bf16.gmra.mxu0 %vm767_vm1, %v5328_v32  ;;  %4309 = vmatmul.mubr.msk.bf16.gmra.mxu1 %vm767_vm1, %v5455_v41 }
 0x1bf   : > { %1337 = vmatprep.mubr.bf16.mxu0 %v4997_v10  ;;  %1949 = vmatprep.mubr.bf16.mxu1 %v4997_v10 }
 0x1c6   : > { %4300 = vmatmul.mubr.msk.bf16.gmra.mxu0 %vm767_vm1, %v5336_v33  ;;  %4310 = vmatmul.mubr.msk.bf16.gmra.mxu1 %vm767_vm1, %v5463_v42 }
 0x1c7   : > { %1347 = vmatprep.mubr.bf16.mxu0 %v4997_v10  ;;  %1959 = vmatprep.mubr.bf16.mxu1 %v4997_v10 }
 0x1ce   : > { %4301 = vmatmul.mubr.msk.bf16.gmra.mxu0 %vm767_vm1, %v5344_v34  ;;  %4311 = vmatmul.mubr.msk.bf16.gmra.mxu1 %vm767_vm1, %v5471_v43 }
 0x1cf   : > { %1357 = vmatprep.mubr.bf16.mxu0 %v4997_v10  ;;  %1969 = vmatprep.mubr.bf16.mxu1 %v4997_v10 }
 0x1d6   : > { %4302 = vmatmul.mubr.msk.bf16.gmra.mxu0 %vm767_vm1, %v5352_v35  ;;  %4312 = vmatmul.mubr.msk.bf16.gmra.mxu1 %vm767_vm1, %v5479_v44 }
 0x1d7   : > { %1367 = vmatprep.mubr.bf16.mxu0 %v4997_v10  ;;  %1979 = vmatprep.mubr.bf16.mxu1 %v4997_v10 }
 0x1de   : > { %4303 = vmatmul.mubr.msk.bf16.gmra.mxu0 %vm767_vm1, %v5360_v36  ;;  %4313 = vmatmul.mubr.msk.bf16.gmra.mxu1 %vm767_vm1, %v5487_v45 }
 0x1df   : > { %1377 = vmatprep.mubr.bf16.mxu0 %v4997_v10  ;;  %1989 = vmatprep.mubr.bf16.mxu1 %v4997_v10 }
 0x1e6   : > { %4304 = vmatmul.mubr.msk.bf16.gmra.mxu0 %vm767_vm1, %v5368_v37  ;;  %4314 = vmatmul.mubr.msk.bf16.gmra.mxu1 %vm767_vm1, %v5495_v46 }
 0x1e7   : > { %2032 = vmatprep.mubr.bf16.mxu0 %v4997_v10  ;;  %2145 = vmatprep.mubr.bf16.mxu1 %v4997_v10 }
 0x1ee   : > { %v857_v54 = vpop.f32.mrf.mxu0  ;;  %v970_v55 = vpop.f32.mrf.mxu1  ;;  %4316 = vmatmul.mubr.msk.bf16.vlgmr.msra.gmra.mxu0 %vm767_vm1, %v5433_v39  ;;  %4325 = vmatmul.mubr.msk.bf16.vlgmr.msra.gmra.mxu1 %vm767_vm1, %v5433_v39 }
 0x1ef   : > { %2241 = vmatpush1.bf16.msra.mxu0 %v5303_v28  ;;  %2354 = vmatpush1.bf16.msra.mxu1 %v5377_v38  ;;  %v858_v58 = vadd.f32 %v857_v54, %v5515_v52  ;;  %v971_v59 = vadd.f32 %v970_v55, %v5518_v53 }
 0x1f0   : > { %v859_v60 = vpop.f32.mrf.mxu0  ;;  %v972_v61 = vpop.f32.mrf.mxu1  ;;  %2042 = vmatprep.mubr.bf16.mxu0 %v4997_v10  ;;  %2155 = vmatprep.mubr.bf16.mxu1 %v4997_v10 }
 0x1f1   : > { %v860_v62 = vadd.f32 %v859_v60, %v5526_v56  ;;  %v973_v63 = vadd.f32 %v972_v61, %v5529_v57  ;;  %v1388_v4 = vmax.f32 %v858_v58, 0.0  ;;  %v1390_v6 = vmax.f32 %v971_v59, 0.0 }
 0x1f2   : > { %v861_v0 = vpop.f32.mrf.mxu0  ;;  %v974_v1 = vpop.f32.mrf.mxu1 }
 0x1f3   : > { %v862_v2 = vadd.f32 %v861_v0, %v5515_v52  ;;  %v975_v3 = vadd.f32 %v974_v1, %v5518_v53  ;;  %v1389_v16 = vmax.f32 %v860_v62, 0.0  ;;  %v1391_v17 = vmax.f32 %v973_v63, 0.0 }
 0x1f4   : > { %v863_v7 = vpop.f32.mrf.mxu0  ;;  %v976_v8 = vpop.f32.mrf.mxu1 }
 0x1f5   : > { %v1398_v11 = vmax.f32 %v862_v2, 0.0  ;;  %v1400_v12 = vmax.f32 %v975_v3, 0.0  ;;  %v864_v13 = vadd.f32 %v863_v7, %v5526_v56  ;;  %v977_v15 = vadd.f32 %v976_v8, %v5529_v57 }
 0x1f6   : > { %v867_v18 = vpop.f32.mrf.mxu0  ;;  %v980_v19 = vpop.f32.mrf.mxu1  ;;  %4317 = vmatmul.mubr.msk.bf16.gmra.mxu0 %vm767_vm1, %v5447_v40  ;;  %4326 = vmatmul.mubr.msk.bf16.gmra.mxu1 %vm767_vm1, %v5447_v40 }
 0x1f7   : > { %v1551_v20 = vadd.f32 %v1398_v11, %v1388_v4  ;;  %v1593_v21 = vadd.f32 %v1400_v12, %v1390_v6  ;;  %v1399_v22 = vmax.f32 %v864_v13, 0.0  ;;  %v1401_v23 = vmax.f32 %v977_v15, 0.0  ;;  %2052 = vmatprep.mubr.bf16.mxu0 %v4997_v10  ;;  %2165 = vmatprep.mubr.bf16.mxu1 %v4997_v10 }
 0x1f8   : > { %v868_v24 = vadd.f32 %v867_v18, %v5515_v52  ;;  %v981_v25 = vadd.f32 %v980_v19, %v5518_v53  ;;  %v869_v26 = vpop.f32.mrf.mxu0  ;;  %v982_v27 = vpop.f32.mrf.mxu1 }
 0x1f9   : > { %v1572_v28 = vadd.f32 %v1399_v22, %v1389_v16  ;;  %v1614_v29 = vadd.f32 %v1401_v23, %v1391_v17  ;;  %v870_v30 = vadd.f32 %v869_v26, %v5526_v56  ;;  %v983_v31 = vadd.f32 %v982_v27, %v5529_v57 }
 0x1fa   : > { %v1408_v32 = vmax.f32 %v868_v24, 0.0  ;;  %v1410_v33 = vmax.f32 %v981_v25, 0.0  ;;  %v871_v34 = vpop.f32.mrf.mxu0  ;;  %v984_v35 = vpop.f32.mrf.mxu1 }
 0x1fb   : > { %v1409_v36 = vmax.f32 %v870_v30, 0.0  ;;  %v1411_v37 = vmax.f32 %v983_v31, 0.0  ;;  %v872_v38 = vadd.f32 %v871_v34, %v5515_v52  ;;  %v985_v48 = vadd.f32 %v984_v35, %v5518_v53 }
 0x1fc   : > { %v1552_v51 = vadd.f32 %v1551_v20, %v1408_v32  ;;  %v1594_v54 = vadd.f32 %v1593_v21, %v1410_v33  ;;  %v873_v55 = vpop.f32.mrf.mxu0  ;;  %v986_v58 = vpop.f32.mrf.mxu1 }
 0x1fd   : > { %v1573_v59 = vadd.f32 %v1572_v28, %v1409_v36  ;;  %v1615_v60 = vadd.f32 %v1614_v29, %v1411_v37  ;;  %v1418_v61 = vmax.f32 %v872_v38, 0.0  ;;  %v1420_v62 = vmax.f32 %v985_v48, 0.0 }
 0x1fe   : > { %v874_v63 = vadd.f32 %v873_v55, %v5526_v56  ;;  %v987_v0 = vadd.f32 %v986_v58, %v5529_v57  ;;  %v877_v1 = vpop.f32.mrf.mxu0  ;;  %v990_v2 = vpop.f32.mrf.mxu1  ;;  %4318 = vmatmul.mubr.msk.bf16.gmra.mxu0 %vm767_vm1, %v5455_v41  ;;  %4327 = vmatmul.mubr.msk.bf16.gmra.mxu1 %vm767_vm1, %v5455_v41 }
 0x1ff   : > { %v1553_v3 = vadd.f32 %v1552_v51, %v1418_v61  ;;  %v1595_v4 = vadd.f32 %v1594_v54, %v1420_v62  ;;  %v878_v6 = vadd.f32 %v877_v1, %v5515_v52  ;;  %v991_v7 = vadd.f32 %v990_v2, %v5518_v53  ;;  %2062 = vmatprep.mubr.bf16.mxu0 %v4997_v10 }
 0x200   : > { %v1419_v8 = vmax.f32 %v874_v63, 0.0  ;;  %v1421_v11 = vmax.f32 %v987_v0, 0.0  ;;  %v879_v12 = vpop.f32.mrf.mxu0  ;;  %v992_v13 = vpop.f32.mrf.mxu1  ;;  %2175 = vmatprep.mubr.bf16.mxu1 %v4997_v10 }
 0x201   : > { %v1428_v15 = vmax.f32 %v878_v6, 0.0  ;;  %v1430_v16 = vmax.f32 %v991_v7, 0.0  ;;  %v880_v17 = vadd.f32 %v879_v12, %v5526_v56  ;;  %v993_v18 = vadd.f32 %v992_v13, %v5529_v57 }
 0x202   : > { %v1574_v19 = vadd.f32 %v1573_v59, %v1419_v8  ;;  %v1616_v20 = vadd.f32 %v1615_v60, %v1421_v11  ;;  %v881_v21 = vpop.f32.mrf.mxu0  ;;  %v994_v22 = vpop.f32.mrf.mxu1 }
 0x203   : > { %v1554_v23 = vadd.f32 %v1553_v3, %v1428_v15  ;;  %v1596_v24 = vadd.f32 %v1595_v4, %v1430_v16  ;;  %v1429_v25 = vmax.f32 %v880_v17, 0.0  ;;  %v1431_v26 = vmax.f32 %v993_v18, 0.0 }
 0x204   : > { %v882_v27 = vadd.f32 %v881_v21, %v5515_v52  ;;  %v995_v28 = vadd.f32 %v994_v22, %v5518_v53  ;;  %v883_v29 = vpop.f32.mrf.mxu0  ;;  %v996_v30 = vpop.f32.mrf.mxu1 }
 0x205   : > { %v1575_v31 = vadd.f32 %v1574_v19, %v1429_v25  ;;  %v1617_v32 = vadd.f32 %v1616_v20, %v1431_v26  ;;  %v884_v33 = vadd.f32 %v883_v29, %v5526_v56  ;;  %v997_v34 = vadd.f32 %v996_v30, %v5529_v57 }
 0x206   : > { %v1438_v35 = vmax.f32 %v882_v27, 0.0  ;;  %v1440_v36 = vmax.f32 %v995_v28, 0.0  ;;  %v887_v37 = vpop.f32.mrf.mxu0  ;;  %v1000_v38 = vpop.f32.mrf.mxu1  ;;  %4319 = vmatmul.mubr.msk.bf16.gmra.mxu0 %vm767_vm1, %v5463_v42  ;;  %4328 = vmatmul.mubr.msk.bf16.gmra.mxu1 %vm767_vm1, %v5463_v42 }
 0x207   : > { %v1439_v48 = vmax.f32 %v884_v33, 0.0  ;;  %v1441_v51 = vmax.f32 %v997_v34, 0.0  ;;  %v888_v54 = vadd.f32 %v887_v37, %v5515_v52  ;;  %v1001_v55 = vadd.f32 %v1000_v38, %v5518_v53  ;;  %2072 = vmatprep.mubr.bf16.mxu0 %v4997_v10  ;;  %2185 = vmatprep.mubr.bf16.mxu1 %v4997_v10 }
 0x208   : > { %v1555_v58 = vadd.f32 %v1554_v23, %v1438_v35  ;;  %v1597_v59 = vadd.f32 %v1596_v24, %v1440_v36  ;;  %v889_v60 = vpop.f32.mrf.mxu0  ;;  %v1002_v61 = vpop.f32.mrf.mxu1 }
 0x209   : > { %v1576_v62 = vadd.f32 %v1575_v31, %v1439_v48  ;;  %v1618_v63 = vadd.f32 %v1617_v32, %v1441_v51  ;;  %v1448_v0 = vmax.f32 %v888_v54, 0.0  ;;  %v1450_v1 = vmax.f32 %v1001_v55, 0.0 }
 0x20a   : > { %v890_v2 = vadd.f32 %v889_v60, %v5526_v56  ;;  %v1003_v3 = vadd.f32 %v1002_v61, %v5529_v57  ;;  %v891_v4 = vpop.f32.mrf.mxu0  ;;  %v1004_v6 = vpop.f32.mrf.mxu1 }
 0x20b   : > { %v1556_v7 = vadd.f32 %v1555_v58, %v1448_v0  ;;  %v1598_v8 = vadd.f32 %v1597_v59, %v1450_v1  ;;  %v892_v11 = vadd.f32 %v891_v4, %v5515_v52  ;;  %v1005_v12 = vadd.f32 %v1004_v6, %v5518_v53 }
 0x20c   : > { %v1449_v13 = vmax.f32 %v890_v2, 0.0  ;;  %v1451_v15 = vmax.f32 %v1003_v3, 0.0  ;;  %v893_v16 = vpop.f32.mrf.mxu0  ;;  %v1006_v17 = vpop.f32.mrf.mxu1 }
 0x20d   : > { %v1458_v18 = vmax.f32 %v892_v11, 0.0  ;;  %v1460_v19 = vmax.f32 %v1005_v12, 0.0  ;;  %v894_v20 = vadd.f32 %v893_v16, %v5526_v56  ;;  %v1007_v21 = vadd.f32 %v1006_v17, %v5529_v57 }
 0x20e   : > { %v1577_v22 = vadd.f32 %v1576_v62, %v1449_v13  ;;  %v1619_v23 = vadd.f32 %v1618_v63, %v1451_v15  ;;  %v897_v24 = vpop.f32.mrf.mxu0  ;;  %v1010_v25 = vpop.f32.mrf.mxu1  ;;  %4320 = vmatmul.mubr.msk.bf16.gmra.mxu0 %vm767_vm1, %v5471_v43  ;;  %4329 = vmatmul.mubr.msk.bf16.gmra.mxu1 %vm767_vm1, %v5471_v43 }
 0x20f   : > { %v1557_v26 = vadd.f32 %v1556_v7, %v1458_v18  ;;  %v1599_v27 = vadd.f32 %v1598_v8, %v1460_v19  ;;  %v1459_v28 = vmax.f32 %v894_v20, 0.0  ;;  %v1461_v29 = vmax.f32 %v1007_v21, 0.0  ;;  %2082 = vmatprep.mubr.bf16.mxu0 %v4997_v10  ;;  %2195 = vmatprep.mubr.bf16.mxu1 %v4997_v10 }
 0x210   : > { %v898_v30 = vadd.f32 %v897_v24, %v5515_v52  ;;  %v1011_v31 = vadd.f32 %v1010_v25, %v5518_v53  ;;  %v899_v32 = vpop.f32.mrf.mxu0  ;;  %v1012_v33 = vpop.f32.mrf.mxu1 }
 0x211   : > { %v1578_v34 = vadd.f32 %v1577_v22, %v1459_v28  ;;  %v1620_v35 = vadd.f32 %v1619_v23, %v1461_v29  ;;  %v900_v36 = vadd.f32 %v899_v32, %v5526_v56  ;;  %v1013_v37 = vadd.f32 %v1012_v33, %v5529_v57 }
 0x212   : > { %v1468_v38 = vmax.f32 %v898_v30, 0.0  ;;  %v1470_v48 = vmax.f32 %v1011_v31, 0.0  ;;  %v901_v51 = vpop.f32.mrf.mxu0  ;;  %v1014_v54 = vpop.f32.mrf.mxu1 }
 0x213   : > { %v1469_v55 = vmax.f32 %v900_v36, 0.0  ;;  %v1471_v58 = vmax.f32 %v1013_v37, 0.0  ;;  %v902_v59 = vadd.f32 %v901_v51, %v5515_v52  ;;  %v1015_v60 = vadd.f32 %v1014_v54, %v5518_v53 }
 0x214   : > { %v1558_v61 = vadd.f32 %v1557_v26, %v1468_v38  ;;  %v1600_v62 = vadd.f32 %v1599_v27, %v1470_v48  ;;  %v903_v63 = vpop.f32.mrf.mxu0  ;;  %v1016_v0 = vpop.f32.mrf.mxu1 }
 0x215   : > { %v1579_v1 = vadd.f32 %v1578_v34, %v1469_v55  ;;  %v1621_v2 = vadd.f32 %v1620_v35, %v1471_v58  ;;  %v1478_v3 = vmax.f32 %v902_v59, 0.0  ;;  %v1480_v4 = vmax.f32 %v1015_v60, 0.0 }
 0x216   : > { %v904_v6 = vadd.f32 %v903_v63, %v5526_v56  ;;  %v1017_v7 = vadd.f32 %v1016_v0, %v5529_v57  ;;  %v907_v8 = vpop.f32.mrf.mxu0  ;;  %v1020_v11 = vpop.f32.mrf.mxu1  ;;  %4321 = vmatmul.mubr.msk.bf16.gmra.mxu0 %vm767_vm1, %v5479_v44  ;;  %4330 = vmatmul.mubr.msk.bf16.gmra.mxu1 %vm767_vm1, %v5479_v44 }
 0x217   : > { %v1559_v12 = vadd.f32 %v1558_v61, %v1478_v3  ;;  %v1601_v13 = vadd.f32 %v1600_v62, %v1480_v4  ;;  %v908_v15 = vadd.f32 %v907_v8, %v5515_v52  ;;  %v1021_v16 = vadd.f32 %v1020_v11, %v5518_v53  ;;  %2092 = vmatprep.mubr.bf16.mxu0 %v4997_v10 }
 0x218   : > { %v1479_v17 = vmax.f32 %v904_v6, 0.0  ;;  %v1481_v18 = vmax.f32 %v1017_v7, 0.0  ;;  %v909_v19 = vpop.f32.mrf.mxu0  ;;  %v1022_v20 = vpop.f32.mrf.mxu1  ;;  %2205 = vmatprep.mubr.bf16.mxu1 %v4997_v10 }
 0x219   : > { %v1488_v21 = vmax.f32 %v908_v15, 0.0  ;;  %v1490_v22 = vmax.f32 %v1021_v16, 0.0  ;;  %v910_v23 = vadd.f32 %v909_v19, %v5526_v56  ;;  %v1023_v24 = vadd.f32 %v1022_v20, %v5529_v57 }
 0x21a   : > { %v1580_v25 = vadd.f32 %v1579_v1, %v1479_v17  ;;  %v1622_v26 = vadd.f32 %v1621_v2, %v1481_v18  ;;  %v911_v27 = vpop.f32.mrf.mxu0  ;;  %v1024_v28 = vpop.f32.mrf.mxu1 }
 0x21b   : > { %v1560_v29 = vadd.f32 %v1559_v12, %v1488_v21  ;;  %v1602_v30 = vadd.f32 %v1601_v13, %v1490_v22  ;;  %v1489_v31 = vmax.f32 %v910_v23, 0.0  ;;  %v1491_v32 = vmax.f32 %v1023_v24, 0.0 }
 0x21c   : > { %v912_v33 = vadd.f32 %v911_v27, %v5515_v52  ;;  %v1025_v34 = vadd.f32 %v1024_v28, %v5518_v53  ;;  %v913_v35 = vpop.f32.mrf.mxu0  ;;  %v1026_v36 = vpop.f32.mrf.mxu1 }
 0x21d   : > { %v1581_v37 = vadd.f32 %v1580_v25, %v1489_v31  ;;  %v1623_v38 = vadd.f32 %v1622_v26, %v1491_v32  ;;  %v914_v48 = vadd.f32 %v913_v35, %v5526_v56  ;;  %v1027_v51 = vadd.f32 %v1026_v36, %v5529_v57 }
 0x21e   : > { %v1498_v54 = vmax.f32 %v912_v33, 0.0  ;;  %v1500_v55 = vmax.f32 %v1025_v34, 0.0  ;;  %v917_v58 = vpop.f32.mrf.mxu0  ;;  %v1030_v59 = vpop.f32.mrf.mxu1  ;;  %4322 = vmatmul.mubr.msk.bf16.gmra.mxu0 %vm767_vm1, %v5487_v45  ;;  %4331 = vmatmul.mubr.msk.bf16.gmra.mxu1 %vm767_vm1, %v5487_v45 }
 0x21f   : > { %v1499_v60 = vmax.f32 %v914_v48, 0.0  ;;  %v1501_v61 = vmax.f32 %v1027_v51, 0.0  ;;  %v918_v62 = vadd.f32 %v917_v58, %v5515_v52  ;;  %v1031_v63 = vadd.f32 %v1030_v59, %v5518_v53  ;;  %2102 = vmatprep.mubr.bf16.mxu0 %v4997_v10  ;;  %2215 = vmatprep.mubr.bf16.mxu1 %v4997_v10 }
 0x220   : > { %v1561_v0 = vadd.f32 %v1560_v29, %v1498_v54  ;;  %v1603_v1 = vadd.f32 %v1602_v30, %v1500_v55  ;;  %v919_v2 = vpop.f32.mrf.mxu0  ;;  %v1032_v3 = vpop.f32.mrf.mxu1 }
 0x221   : > { %v1582_v4 = vadd.f32 %v1581_v37, %v1499_v60  ;;  %v1624_v6 = vadd.f32 %v1623_v38, %v1501_v61  ;;  %v1508_v7 = vmax.f32 %v918_v62, 0.0  ;;  %v1510_v8 = vmax.f32 %v1031_v63, 0.0 }
 0x222   : > { %v920_v11 = vadd.f32 %v919_v2, %v5526_v56  ;;  %v1033_v12 = vadd.f32 %v1032_v3, %v5529_v57  ;;  %v921_v13 = vpop.f32.mrf.mxu0  ;;  %v1034_v15 = vpop.f32.mrf.mxu1 }
 0x223   : > { %v1562_v16 = vadd.f32 %v1561_v0, %v1508_v7  ;;  %v1604_v17 = vadd.f32 %v1603_v1, %v1510_v8  ;;  %v922_v18 = vadd.f32 %v921_v13, %v5515_v52  ;;  %v1035_v19 = vadd.f32 %v1034_v15, %v5518_v53 }
 0x224   : > { %v1509_v20 = vmax.f32 %v920_v11, 0.0  ;;  %v1511_v21 = vmax.f32 %v1033_v12, 0.0  ;;  %v923_v22 = vpop.f32.mrf.mxu0  ;;  %v1036_v23 = vpop.f32.mrf.mxu1 }
 0x225   : > { %v1518_v24 = vmax.f32 %v922_v18, 0.0  ;;  %v1520_v25 = vmax.f32 %v1035_v19, 0.0  ;;  %v924_v26 = vadd.f32 %v923_v22, %v5526_v56  ;;  %v1037_v27 = vadd.f32 %v1036_v23, %v5529_v57 }
 0x226   : > { %v1583_v28 = vadd.f32 %v1582_v4, %v1509_v20  ;;  %v1625_v29 = vadd.f32 %v1624_v6, %v1511_v21  ;;  %v927_v30 = vpop.f32.mrf.mxu0  ;;  %v1040_v31 = vpop.f32.mrf.mxu1  ;;  %4323 = vmatmul.mubr.msk.bf16.gmra.mxu0 %vm767_vm1, %v5495_v46  ;;  %4332 = vmatmul.mubr.msk.bf16.gmra.mxu1 %vm767_vm1, %v5495_v46 }
 0x227   : > { %v1563_v32 = vadd.f32 %v1562_v16, %v1518_v24  ;;  %v1605_v33 = vadd.f32 %v1604_v17, %v1520_v25  ;;  %v1519_v34 = vmax.f32 %v924_v26, 0.0  ;;  %v1521_v35 = vmax.f32 %v1037_v27, 0.0  ;;  %2258 = vmatprep.mubr.bf16.mxu0 %v4997_v10  ;;  %2371 = vmatprep.mubr.bf16.mxu1 %v4997_v10 }
 0x228   : > { %v928_v36 = vadd.f32 %v927_v30, %v5515_v52  ;;  %v1041_v37 = vadd.f32 %v1040_v31, %v5518_v53  ;;  %v929_v38 = vpop.f32.mrf.mxu0  ;;  %v1042_v48 = vpop.f32.mrf.mxu1 }
 0x229   : > { %v1584_v51 = vadd.f32 %v1583_v28, %v1519_v34  ;;  %v1626_v54 = vadd.f32 %v1625_v29, %v1521_v35  ;;  %v930_v55 = vadd.f32 %v929_v38, %v5526_v56  ;;  %v1043_v58 = vadd.f32 %v1042_v48, %v5529_v57 }
 0x22a   : > { %v1528_v59 = vmax.f32 %v928_v36, 0.0  ;;  %v1530_v60 = vmax.f32 %v1041_v37, 0.0  ;;  %v931_v61 = vpop.f32.mrf.mxu0  ;;  %v1044_v62 = vpop.f32.mrf.mxu1  ;;  %v4998_v38 = vmov 1966171168  }
 0x22b   : > { %v1529_v63 = vmax.f32 %v930_v55, 0.0  ;;  %v1531_v0 = vmax.f32 %v1043_v58, 0.0  ;;  %v932_v1 = vadd.f32 %v931_v61, %v5515_v52  ;;  %v1045_v2 = vadd.f32 %v1044_v62, %v5518_v53 }
 0x22c   : > { %v1564_v3 = vadd.f32 %v1563_v32, %v1528_v59  ;;  %v1606_v4 = vadd.f32 %v1605_v33, %v1530_v60  ;;  %v933_v6 = vpop.f32.mrf.mxu0  ;;  %v1046_v7 = vpop.f32.mrf.mxu1  ;;  %v1776_v48 = vunpack.c.l.s4 %v4998_v38 }
 0x22d   : > { %v1585_v8 = vadd.f32 %v1584_v51, %v1529_v63  ;;  %v1627_v11 = vadd.f32 %v1626_v54, %v1531_v0  ;;  %v1538_v12 = vmax.f32 %v932_v1, 0.0  ;;  %v1540_v13 = vmax.f32 %v1045_v2, 0.0 }
 0x22e   : > { %v934_v15 = vadd.f32 %v933_v6, %v5526_v56  ;;  %v1047_v16 = vadd.f32 %v1046_v7, %v5529_v57  ;;  %v5641_v17 = vpop.f32.mrf.mxu0  ;;  %v5643_v18 = vpop.f32.mrf.mxu1  ;;  %4334 = vmatmul.mubr.msk.bf16.vlgmr.msra.gmra.mxu0 %vm767_vm1, %v5433_v39  ;;  %4343 = vmatmul.mubr.msk.bf16.vlgmr.msra.gmra.mxu1 %vm767_vm1, %v5433_v39  ;;  %v1777_v1 = vunpack.c.0.s8 %v1776_v48  ;;  %v674_v2 = vsub.s32 4, %v5265_v9 }
 0x22f   : > { %v1565_v19 = vadd.f32 %v1564_v3, %v1538_v12  ;;  %v1607_v20 = vadd.f32 %v1606_v4, %v1540_v13  ;;  %2268 = vmatprep.mubr.bf16.mxu0 %v4997_v10  ;;  %2381 = vmatprep.mubr.bf16.mxu1 %v4997_v10  ;;  %v682_v3 = vsub.s32 6, %v5265_v9  ;;  %v686_v13 = vsub.s32 7, %v5265_v9 }
 0x230   : > { %v1539_v21 = vmax.f32 %v934_v15, 0.0  ;;  %v1541_v22 = vmax.f32 %v1047_v16, 0.0  ;;  %v5650_v23 = vpop.f32.mrf.mxu0  ;;  %v5652_v24 = vpop.f32.mrf.mxu1 }
 0x231   : > { %v1566_v25 = vrot.slane %v1565_v19, 4  ;;  %v1608_v26 = vrot.slane %v1607_v20, 4 }
 0x232   : > { %v1586_v27 = vadd.f32 %v1585_v8, %v1539_v21  ;;  %v1628_v28 = vadd.f32 %v1627_v11, %v1541_v22  ;;  %v1087_v29 = vpop.f32.mrf.mxu0  ;;  %v1200_v30 = vpop.f32.mrf.mxu1  ;;  %v5666_v21 = vsub.s32 %v1777_v1, %v5265_v9  ;;  %v5669_v22 = vrot.slane %v5507_v49, %v674_v2 }
 0x233   : > { %v1567_v31 = vadd.f32 %v1566_v25, %v1565_v19  ;;  %v1609_v39 = vadd.f32 %v1608_v26, %v1607_v20  ;;  %v5672_v25 = vrot.slane %v5507_v49, %v682_v3 }
 0x234   : > { %v1587_v32 = vrot.slane %v1586_v27, 4  ;;  %v1629_v33 = vrot.slane %v1628_v28, 4  ;;  %v1089_v34 = vpop.f32.mrf.mxu0  ;;  %v1202_v35 = vpop.f32.mrf.mxu1  ;;  %v1088_v38 = vadd.f32 %v1087_v29, %v5669_v22 }
 0x235   : > { %v1568_v36 = vrot.slane %v1567_v31, 2  ;;  %v1610_v37 = vrot.slane %v1609_v39, 2  ;;  %v1201_v48 = vadd.f32 %v1200_v30, %v5672_v25  ;;  %v1197_v29 = vadd.f32 %v5643_v18, %v5672_v25 }
 0x236   : > { %v1588_v51 = vadd.f32 %v1587_v32, %v1586_v27  ;;  %v1630_v54 = vadd.f32 %v1629_v33, %v1628_v28  ;;  %v1093_v55 = vpop.f32.mrf.mxu0  ;;  %v1206_v58 = vpop.f32.mrf.mxu1  ;;  %4335 = vmatmul.mubr.msk.bf16.gmra.mxu0 %vm767_vm1, %v5447_v40  ;;  %4344 = vmatmul.mubr.msk.bf16.gmra.mxu1 %vm767_vm1, %v5447_v40  ;;  %v678_v40 = vsub.s32 5, %v5265_v9  ;;  %v5680_v9 = vrot.slane %v5507_v49, %v686_v13 }
 0x237   : > { %v1569_v59 = vadd.f32 %v1568_v36, %v1567_v31  ;;  %v1611_v60 = vadd.f32 %v1610_v37, %v1609_v39  ;;  %2278 = vmatprep.mubr.bf16.mxu0 %v4997_v10  ;;  %2391 = vmatprep.mubr.bf16.mxu1 %v4997_v10  ;;  %v1402_v3 = vmax.f32 %v1088_v38, 0.0 }
 0x238   : > { %v1589_v61 = vrot.slane %v1588_v51, 2  ;;  %v1631_v62 = vrot.slane %v1630_v54, 2  ;;  %v1095_v63 = vpop.f32.mrf.mxu0  ;;  %v1208_v0 = vpop.f32.mrf.mxu1  ;;  %v5677_v33 = vrot.slane %v5507_v49, %v678_v40  ;;  %v1203_v30 = vadd.f32 %v1202_v35, %v5680_v9 }
 0x239   : > { %v1570_v4 = vrot.slane %v1569_v59, 1  ;;  %v1612_v6 = vrot.slane %v1611_v60, 1  ;;  %v1209_v40 = vadd.f32 %v1208_v0, %v5680_v9 }
 0x23a   : > { %v1590_v7 = vadd.f32 %v1589_v61, %v1588_v51  ;;  %v1632_v8 = vadd.f32 %v1631_v62, %v1630_v54  ;;  %v1097_v11 = vpop.f32.mrf.mxu0  ;;  %v1210_v12 = vpop.f32.mrf.mxu1  ;;  %v1090_v49 = vadd.f32 %v1089_v34, %v5677_v33  ;;  %v1086_v1 = vadd.f32 %v5650_v23, %v5677_v33 }
 0x23b   : > { %v1571_v26 = vadd.f32 %v1570_v4, %v1569_v59  ;;  %v1613_v27 = vadd.f32 %v1612_v6, %v1611_v60  ;;  %v1084_v59 = vadd.f32 %v5641_v17, %v5669_v22  ;;  %v1199_v17 = vadd.f32 %v5652_v24, %v5680_v9 }
 0x23c   : > { %v1591_v15 = vrot.slane %v1590_v7, 1  ;;  %v1633_v16 = vrot.slane %v1632_v8, 1  ;;  %v1099_v19 = vpop.f32.mrf.mxu0  ;;  %v1212_v20 = vpop.f32.mrf.mxu1  ;;  %v1094_v34 = vadd.f32 %v1093_v55, %v5669_v22  ;;  %v1404_v4 = vmax.f32 %v1201_v48, 0.0 }
 0x23d   : > { %v1207_v6 = vadd.f32 %v1206_v58, %v5672_v25  ;;  %v1403_v35 = vmax.f32 %v1090_v49, 0.0  ;;  %v1098_v23 = vadd.f32 %v1097_v11, %v5669_v22  ;;  %v1392_v13 = vmax.f32 %v1084_v59, 0.0 }
 0x23e   : > { %v1592_v28 = vadd.f32 %v1591_v15, %v1590_v7  ;;  %v1634_v31 = vadd.f32 %v1633_v16, %v1632_v8  ;;  %v1103_v39 = vpop.f32.mrf.mxu0  ;;  %v1216_v32 = vpop.f32.mrf.mxu1  ;;  %4336 = vmatmul.mubr.msk.bf16.gmra.mxu0 %vm767_vm1, %v5455_v41  ;;  %4345 = vmatmul.mubr.msk.bf16.gmra.mxu1 %vm767_vm1, %v5455_v41  ;;  %v1096_v8 = vadd.f32 %v1095_v63, %v5677_v33  ;;  %v1394_v24 = vmax.f32 %v1197_v29, 0.0 }
 0x23f   : > { %2288 = vmatprep.mubr.bf16.mxu0 %v4997_v10  ;;  %2401 = vmatprep.mubr.bf16.mxu1 %v4997_v10  ;;  %v1405_v15 = vmax.f32 %v1203_v30, 0.0  ;;  %v1211_v55 = vadd.f32 %v1210_v12, %v5672_v25  ;;  %v1393_v58 = vmax.f32 %v1086_v1, 0.0  ;;  %v1635_v63 = vadd.f32 %v1402_v3, %v1392_v13 }
 0x240   : > { %v1771_v36 = vcombine.low %v1571_v26, %v1592_v28  ;;  %v1772_v37 = vcombine.low %v1613_v27, %v1634_v31  ;;  %v1105_v51 = vpop.f32.mrf.mxu0  ;;  %v1218_v54 = vpop.f32.mrf.mxu1  ;;  %v1395_v27 = vmax.f32 %v1199_v17, 0.0  ;;  %v1412_v28 = vmax.f32 %v1094_v34, 0.0 }
 0x241   : > { %v1100_v31 = vadd.f32 %v1099_v19, %v5677_v33  ;;  %v1677_v0 = vadd.f32 %v1404_v4, %v1394_v24  ;;  %v1414_v11 = vmax.f32 %v1207_v6, 0.0  ;;  %v1213_v12 = vadd.f32 %v1212_v20, %v5680_v9 }
 0x242   : > { %v5692_v60 = vrot.slane %v1771_v36, %v5666_v21  ;;  %v5695_v41 = vrot.slane %v1772_v37, %v5666_v21  ;;  %v1107_v61 = vpop.f32.mrf.mxu0  ;;  %v1220_v62 = vpop.f32.mrf.mxu1  ;;  %v1656_v38 = vadd.f32 %v1403_v35, %v1393_v58  ;;  %v1413_v48 = vmax.f32 %v1096_v8, 0.0 }
 0x243   : > { %v1415_v59 = vmax.f32 %v1209_v40, 0.0  ;;  %v1422_v49 = vmax.f32 %v1098_v23, 0.0  ;;  %v1698_v29 = vadd.f32 %v1405_v15, %v1395_v27  ;;  %v1424_v19 = vmax.f32 %v1211_v55, 0.0 }
 0x244   : > { %v1803_v2 = vcombine.low %v5692_v60, %v5695_v41  ;;  %v1109_v18 = vpop.f32.mrf.mxu0  ;;  %v1222_v7 = vpop.f32.mrf.mxu1  ;;  %v1104_v30 = vadd.f32 %v1103_v39, %v5669_v22  ;;  %v1636_v34 = vadd.f32 %v1635_v63, %v1412_v28  ;;  %v1423_v3 = vmax.f32 %v1100_v31, 0.0 }
 0x245   : > { %v1106_v20 = vadd.f32 %v1105_v51, %v5677_v33  ;;  %v1219_v4 = vadd.f32 %v1218_v54, %v5680_v9  ;;  %v1678_v6 = vadd.f32 %v1677_v0, %v1414_v11  ;;  %v1425_v13 = vmax.f32 %v1213_v12, 0.0 }
 0x246   : > { %v1113_v16 = vpop.f32.mrf.mxu0  ;;  %v1226_v26 = vpop.f32.mrf.mxu1  ;;  %4337 = vmatmul.mubr.msk.bf16.gmra.mxu0 %vm767_vm1, %v5463_v42  ;;  %4346 = vmatmul.mubr.msk.bf16.gmra.mxu1 %vm767_vm1, %v5463_v42  ;;  %v1217_v42 = vadd.f32 %v1216_v32, %v5672_v25  ;;  %v1108_v35 = vadd.f32 %v1107_v61, %v5669_v22  ;;  %v1221_v8 = vadd.f32 %v1220_v62, %v5672_v25  ;;  %v1432_v58 = vmax.f32 %v1104_v30, 0.0 }
 0x247   : > { %2298 = vmatprep.mubr.bf16.mxu0 %v4997_v10  ;;  %2411 = vmatprep.mubr.bf16.mxu1 %v4997_v10  ;;  %v1657_v24 = vadd.f32 %v1656_v38, %v1413_v48  ;;  %v1699_v39 = vadd.f32 %v1698_v29, %v1415_v59  ;;  %v1637_v15 = vadd.f32 %v1636_v34, %v1422_v49  ;;  %v1433_v31 = vmax.f32 %v1106_v20, 0.0 }
 0x248   : > { %v1115_v36 = vpop.f32.mrf.mxu0  ;;  %v1228_v37 = vpop.f32.mrf.mxu1  ;;  %v1110_v32 = vadd.f32 %v1109_v18, %v5677_v33  ;;  %v1679_v55 = vadd.f32 %v1678_v6, %v1424_v19  ;;  %v1434_v27 = vmax.f32 %v1217_v42, 0.0  ;;  %v1223_v51 = vadd.f32 %v1222_v7, %v5680_v9 }
 0x249   : > { %v1658_v61 = vadd.f32 %v1657_v24, %v1423_v3  ;;  %v1435_v62 = vmax.f32 %v1219_v4, 0.0  ;;  %v1114_v63 = vadd.f32 %v1113_v16, %v5669_v22  ;;  %v1700_v18 = vadd.f32 %v1699_v39, %v1425_v13 }
 0x24a   : > { %v1117_v1 = vpop.f32.mrf.mxu0  ;;  %v1230_v17 = vpop.f32.mrf.mxu1  ;;  %v1442_v0 = vmax.f32 %v1108_v35, 0.0  ;;  %v1444_v11 = vmax.f32 %v1221_v8, 0.0  ;;  %v1227_v7 = vadd.f32 %v1226_v26, %v5672_v25  ;;  %v1443_v48 = vmax.f32 %v1110_v32, 0.0 }
 0x24b   : > { %v1116_v59 = vadd.f32 %v1115_v36, %v5677_v33  ;;  %v1229_v49 = vadd.f32 %v1228_v37, %v5680_v9  ;;  %v1118_v16 = vadd.f32 %v1117_v1, %v5669_v22  ;;  %v1638_v29 = vadd.f32 %v1637_v15, %v1432_v58 }
 0x24c   : > { %v1119_v40 = vpop.f32.mrf.mxu0  ;;  %v1232_v23 = vpop.f32.mrf.mxu1  ;;  %v1445_v19 = vmax.f32 %v1223_v51, 0.0  ;;  %v1231_v30 = vadd.f32 %v1230_v17, %v5672_v25  ;;  %v1659_v3 = vadd.f32 %v1658_v61, %v1433_v31  ;;  %v1701_v26 = vadd.f32 %v1700_v18, %v1435_v62 }
 0x24d   : > { %v1452_v20 = vmax.f32 %v1114_v63, 0.0  ;;  %v1120_v4 = vadd.f32 %v1119_v40, %v5677_v33  ;;  %v1639_v6 = vadd.f32 %v1638_v29, %v1442_v0  ;;  %v1454_v35 = vmax.f32 %v1227_v7, 0.0 }
 0x24e   : > { %v1123_v28 = vpop.f32.mrf.mxu0  ;;  %v1236_v54 = vpop.f32.mrf.mxu1  ;;  %4338 = vmatmul.mubr.msk.bf16.gmra.mxu0 %vm767_vm1, %v5471_v43  ;;  %4347 = vmatmul.mubr.msk.bf16.gmra.mxu1 %vm767_vm1, %v5471_v43  ;;  %v1680_v43 = vadd.f32 %v1679_v55, %v1434_v27  ;;  %v1233_v36 = vadd.f32 %v1232_v23, %v5680_v9  ;;  %v1660_v1 = vadd.f32 %v1659_v3, %v1443_v48  ;;  %v1453_v24 = vmax.f32 %v1116_v59, 0.0 }
 0x24f   : > { %2308 = vmatprep.mubr.bf16.mxu0 %v4997_v10  ;;  %2421 = vmatprep.mubr.bf16.mxu1 %v4997_v10  ;;  %v1455_v39 = vmax.f32 %v1229_v49, 0.0  ;;  %v1462_v15 = vmax.f32 %v1118_v16, 0.0  ;;  %v1702_v32 = vadd.f32 %v1701_v26, %v1445_v19  ;;  %v1464_v17 = vmax.f32 %v1231_v30, 0.0 }
 0x250   : > { %v1125_v12 = vpop.f32.mrf.mxu0  ;;  %v1238_v38 = vpop.f32.mrf.mxu1  ;;  %v1681_v13 = vadd.f32 %v1680_v43, %v1444_v11  ;;  %v1124_v55 = vadd.f32 %v1123_v28, %v5669_v22  ;;  %v1237_v58 = vadd.f32 %v1236_v54, %v5672_v25  ;;  %v1640_v40 = vadd.f32 %v1639_v6, %v1452_v20 }
 0x251   : > { %v1463_v61 = vmax.f32 %v1120_v4, 0.0  ;;  %v1126_v23 = vadd.f32 %v1125_v12, %v5677_v33  ;;  %v1239_v31 = vadd.f32 %v1238_v38, %v5680_v9  ;;  %v1465_v28 = vmax.f32 %v1233_v36, 0.0 }
 0x252   : > { %v1127_v42 = vpop.f32.mrf.mxu0  ;;  %v1240_v34 = vpop.f32.mrf.mxu1  ;;  %v1682_v62 = vadd.f32 %v1681_v13, %v1454_v35  ;;  %v1661_v11 = vadd.f32 %v1660_v1, %v1453_v24  ;;  %v1703_v7 = vadd.f32 %v1702_v32, %v1455_v39  ;;  %v1641_v12 = vadd.f32 %v1640_v40, %v1462_v15 }
 0x253   : > { %v1128_v54 = vadd.f32 %v1127_v42, %v5669_v22  ;;  %v1241_v63 = vadd.f32 %v1240_v34, %v5672_v25  ;;  %v1472_v59 = vmax.f32 %v1124_v55, 0.0  ;;  %v1473_v19 = vmax.f32 %v1126_v23, 0.0 }
 0x254   : > { %v1129_v37 = vpop.f32.mrf.mxu0  ;;  %v1242_v8 = vpop.f32.mrf.mxu1  ;;  %v1683_v48 = vadd.f32 %v1682_v62, %v1464_v17  ;;  %v1662_v43 = vadd.f32 %v1661_v11, %v1463_v61  ;;  %v1475_v30 = vmax.f32 %v1239_v31, 0.0  ;;  %v1704_v34 = vadd.f32 %v1703_v7, %v1465_v28 }
 0x255   : > { %v1130_v38 = vadd.f32 %v1129_v37, %v5677_v33  ;;  %v1243_v49 = vadd.f32 %v1242_v8, %v5680_v9  ;;  %v1482_v3 = vmax.f32 %v1128_v54, 0.0  ;;  %v1484_v26 = vmax.f32 %v1241_v63, 0.0 }
 0x256   : > { %v1133_v27 = vpop.f32.mrf.mxu0  ;;  %v1246_v51 = vpop.f32.mrf.mxu1  ;;  %4339 = vmatmul.mubr.msk.bf16.gmra.mxu0 %vm767_vm1, %v5479_v44  ;;  %4348 = vmatmul.mubr.msk.bf16.gmra.mxu1 %vm767_vm1, %v5479_v44  ;;  %v1474_v44 = vmax.f32 %v1237_v58, 0.0  ;;  %v1642_v8 = vadd.f32 %v1641_v12, %v1472_v59  ;;  %v1663_v17 = vadd.f32 %v1662_v43, %v1473_v19  ;;  %v1705_v55 = vadd.f32 %v1704_v34, %v1475_v30 }
 0x257   : > { %2318 = vmatprep.mubr.bf16.mxu0 %v4997_v10  ;;  %2431 = vmatprep.mubr.bf16.mxu1 %v4997_v10  ;;  %v1134_v42 = vadd.f32 %v1133_v27, %v5669_v22  ;;  %v1247_v20 = vadd.f32 %v1246_v51, %v5672_v25  ;;  %v1483_v13 = vmax.f32 %v1130_v38, 0.0  ;;  %v1485_v24 = vmax.f32 %v1243_v49, 0.0 }
 0x258   : > { %v1135_v18 = vpop.f32.mrf.mxu0  ;;  %v1248_v0 = vpop.f32.mrf.mxu1  ;;  %v1684_v1 = vadd.f32 %v1683_v48, %v1474_v44  ;;  %v1643_v51 = vadd.f32 %v1642_v8, %v1482_v3 }
 0x259   : > { %v1136_v35 = vadd.f32 %v1135_v18, %v5677_v33  ;;  %v1249_v36 = vadd.f32 %v1248_v0, %v5680_v9  ;;  %v1492_v58 = vmax.f32 %v1134_v42, 0.0  ;;  %v1494_v61 = vmax.f32 %v1247_v20, 0.0 }
 0x25a   : > { %v1137_v16 = vpop.f32.mrf.mxu0  ;;  %v1250_v29 = vpop.f32.mrf.mxu1  ;;  %v1685_v40 = vadd.f32 %v1684_v1, %v1484_v26  ;;  %v1664_v28 = vadd.f32 %v1663_v17, %v1483_v13  ;;  %v1706_v0 = vadd.f32 %v1705_v55, %v1485_v24 }
 0x25b   : > { %v1138_v37 = vadd.f32 %v1137_v16, %v5669_v22  ;;  %v1251_v39 = vadd.f32 %v1250_v29, %v5672_v25  ;;  %v1493_v54 = vmax.f32 %v1136_v35, 0.0  ;;  %v1495_v63 = vmax.f32 %v1249_v36, 0.0 }
 0x25c   : > { %v1139_v4 = vpop.f32.mrf.mxu0  ;;  %v1252_v6 = vpop.f32.mrf.mxu1  ;;  %v1644_v48 = vadd.f32 %v1643_v51, %v1492_v58  ;;  %v1686_v16 = vadd.f32 %v1685_v40, %v1494_v61 }
 0x25d   : > { %v1140_v27 = vadd.f32 %v1139_v4, %v5677_v33  ;;  %v1502_v18 = vmax.f32 %v1138_v37, 0.0  ;;  %v1504_v11 = vmax.f32 %v1251_v39, 0.0  ;;  %v1253_v7 = vadd.f32 %v1252_v6, %v5680_v9 }
 0x25e   : > { %v1143_v15 = vpop.f32.mrf.mxu0  ;;  %v1256_v32 = vpop.f32.mrf.mxu1  ;;  %4340 = vmatmul.mubr.msk.bf16.gmra.mxu0 %vm767_vm1, %v5487_v45  ;;  %4349 = vmatmul.mubr.msk.bf16.gmra.mxu1 %vm767_vm1, %v5487_v45  ;;  %v1665_v42 = vadd.f32 %v1664_v28, %v1493_v54  ;;  %v1707_v34 = vadd.f32 %v1706_v0, %v1495_v63 }
 0x25f   : > { %2328 = vmatprep.mubr.bf16.mxu0 %v4997_v10  ;;  %v1144_v23 = vadd.f32 %v1143_v15, %v5669_v22  ;;  %2441 = vmatprep.mubr.bf16.mxu1 %v4997_v10  ;;  %v1257_v45 = vadd.f32 %v1256_v32, %v5672_v25  ;;  %v1503_v59 = vmax.f32 %v1140_v27, 0.0  ;;  %v1645_v3 = vadd.f32 %v1644_v48, %v1502_v18 }
 0x260   : > { %v1145_v31 = vpop.f32.mrf.mxu0  ;;  %v1258_v62 = vpop.f32.mrf.mxu1  ;;  %v1687_v20 = vadd.f32 %v1686_v16, %v1504_v11  ;;  %v1505_v4 = vmax.f32 %v1253_v7, 0.0 }
 0x261   : > { %v1146_v44 = vadd.f32 %v1145_v31, %v5677_v33  ;;  %v1512_v10 = vmax.f32 %v1144_v23, 0.0  ;;  %v1259_v29 = vadd.f32 %v1258_v62, %v5680_v9  ;;  %v1514_v6 = vmax.f32 %v1257_v45, 0.0 }
 0x262   : > { %v1147_v12 = vpop.f32.mrf.mxu0  ;;  %v1260_v38 = vpop.f32.mrf.mxu1  ;;  %v1666_v37 = vadd.f32 %v1665_v42, %v1503_v59  ;;  %v1708_v23 = vadd.f32 %v1707_v34, %v1505_v4 }
 0x263   : > { %v1148_v49 = vadd.f32 %v1147_v12, %v5669_v22  ;;  %v1261_v43 = vadd.f32 %v1260_v38, %v5672_v25  ;;  %v1513_v8 = vmax.f32 %v1146_v44, 0.0  ;;  %v1646_v39 = vadd.f32 %v1645_v3, %v1512_v10 }
 0x264   : > { %v1149_v19 = vpop.f32.mrf.mxu0  ;;  %v1262_v30 = vpop.f32.mrf.mxu1  ;;  %v1515_v15 = vmax.f32 %v1259_v29, 0.0  ;;  %v1688_v31 = vadd.f32 %v1687_v20, %v1514_v6 }
 0x265   : > { %v1150_v26 = vadd.f32 %v1149_v19, %v5677_v33  ;;  %v1263_v13 = vadd.f32 %v1262_v30, %v5680_v9  ;;  %v1522_v1 = vmax.f32 %v1148_v49, 0.0  ;;  %v1524_v32 = vmax.f32 %v1261_v43, 0.0 }
 0x266   : > { %v1153_v35 = vpop.f32.mrf.mxu0  ;;  %v1266_v36 = vpop.f32.mrf.mxu1  ;;  %4341 = vmatmul.mubr.msk.bf16.gmra.mxu0 %vm767_vm1, %v5495_v46  ;;  %4350 = vmatmul.mubr.msk.bf16.gmra.mxu1 %vm767_vm1, %v5495_v46  ;;  %v1667_v46 = vadd.f32 %v1666_v37, %v1513_v8  ;;  %v1709_v7 = vadd.f32 %v1708_v23, %v1515_v15 }
 0x267   : > { %v1154_v24 = vadd.f32 %v1153_v35, %v5669_v22  ;;  %v1267_v17 = vadd.f32 %v1266_v36, %v5672_v25  ;;  %v1523_v27 = vmax.f32 %v1150_v26, 0.0  ;;  %v1525_v62 = vmax.f32 %v1263_v13, 0.0 }
 0x268   : > { %v1155_v55 = vpop.f32.mrf.mxu0  ;;  %v1268_v58 = vpop.f32.mrf.mxu1  ;;  %v1647_v18 = vadd.f32 %v1646_v39, %v1522_v1  ;;  %v1689_v45 = vadd.f32 %v1688_v31, %v1524_v32 }
 0x269   : > { %v1532_v51 = vmax.f32 %v1154_v24, 0.0  ;;  %v1156_v40 = vadd.f32 %v1155_v55, %v5677_v33  ;;  %v1269_v61 = vadd.f32 %v1268_v58, %v5680_v9  ;;  %v1534_v28 = vmax.f32 %v1267_v17, 0.0 }
 0x26a   : > { %v1157_v54 = vpop.f32.mrf.mxu0  ;;  %v1270_v63 = vpop.f32.mrf.mxu1  ;;  %v1668_v44 = vadd.f32 %v1667_v46, %v1523_v27  ;;  %v1710_v29 = vadd.f32 %v1709_v7, %v1525_v62 }
 0x26b   : > { %v1533_v0 = vmax.f32 %v1156_v40, 0.0  ;;  %v1158_v11 = vadd.f32 %v1157_v54, %v5669_v22  ;;  %v1535_v12 = vmax.f32 %v1269_v61, 0.0  ;;  %v1271_v38 = vadd.f32 %v1270_v63, %v5672_v25 }
 0x26c   : > { %v1159_v48 = vpop.f32.mrf.mxu0  ;;  %v1272_v59 = vpop.f32.mrf.mxu1  ;;  %v1648_v49 = vadd.f32 %v1647_v18, %v1532_v51  ;;  %v1690_v43 = vadd.f32 %v1689_v45, %v1534_v28 }
 0x26d   : > { %v1542_v16 = vmax.f32 %v1158_v11, 0.0  ;;  %v1160_v10 = vadd.f32 %v1159_v48, %v5677_v33  ;;  %v1544_v19 = vmax.f32 %v1271_v38, 0.0  ;;  %v1273_v30 = vadd.f32 %v1272_v59, %v5680_v9 }
 0x26e   : > { %v5790_v42 = vpop.f32.mrf.mxu0  ;;  %v1921_v34 = vpop.f32.mrf.mxu1  ;;  %v1669_v3 = vadd.f32 %v1668_v44, %v1533_v0  ;;  %v1711_v6 = vadd.f32 %v1710_v29, %v1535_v12 }
 0x26f   : > { %v1649_v26 = vadd.f32 %v1648_v49, %v1542_v16  ;;  %v1543_v20 = vmax.f32 %v1160_v10, 0.0  ;;  %v1922_v4 = vadd.f32 %v1921_v34, %v5515_v52  ;;  %v1691_v13 = vadd.f32 %v1690_v43, %v1544_v19 }
 0x270   : > { %v1545_v35 = vmax.f32 %v1273_v30, 0.0  ;;  %v5793_v36 = vpop.f32.mrf.mxu0  ;;  %v1923_v37 = vpop.f32.mrf.mxu1 }
 0x271   : > { %v1650_v8 = vrot.slane %v1649_v26, 4  ;;  %v1670_v1 = vadd.f32 %v1669_v3, %v1543_v20  ;;  %v1692_v24 = vrot.slane %v1691_v13, 4  ;;  %v2452_v58 = vmax.f32 %v1922_v4, 0.0 }
 0x272   : > { %v1712_v39 = vadd.f32 %v1711_v6, %v1545_v35  ;;  %v5795_v15 = vpop.f32.mrf.mxu0  ;;  %v1925_v32 = vpop.f32.mrf.mxu1  ;;  %v1924_v61 = vadd.f32 %v1923_v37, %v5526_v56 }
 0x273   : > { %v1651_v17 = vadd.f32 %v1650_v8, %v1649_v26  ;;  %v1671_v55 = vrot.slane %v1670_v1, 4  ;;  %v1926_v27 = vadd.f32 %v1925_v32, %v5515_v52  ;;  %v1693_v51 = vadd.f32 %v1692_v24, %v1691_v13  ;;  %v652_v24 = vld [vmem:[#allocation9 + $0x8] sm:$0x3] }
 0x274   : > { %v1713_v40 = vrot.slane %v1712_v39, 4  ;;  %v5799_v23 = vpop.f32.mrf.mxu0  ;;  %v1927_v31 = vpop.f32.mrf.mxu1  ;;  %v2453_v59 = vmax.f32 %v1924_v61, 0.0 }
 0x275   : > { %v1652_v62 = vrot.slane %v1651_v17, 2  ;;  %v1672_v28 = vadd.f32 %v1671_v55, %v1670_v1  ;;  %v2462_v54 = vmax.f32 %v1926_v27, 0.0  ;;  %v1694_v63 = vrot.slane %v1693_v51, 2 }
 0x276   : > { %v1714_v46 = vadd.f32 %v1713_v40, %v1712_v39  ;;  %v1928_v18 = vadd.f32 %v1927_v31, %v5526_v56  ;;  %v5802_v0 = vpop.f32.mrf.mxu0  ;;  %v1931_v11 = vpop.f32.mrf.mxu1 }
 0x277   : > { %v1653_v7 = vadd.f32 %v1652_v62, %v1651_v17  ;;  %v1673_v45 = vrot.slane %v1672_v28, 2  ;;  %v2616_v12 = vadd.f32 %v2462_v54, %v2452_v58  ;;  %v1695_v38 = vadd.f32 %v1694_v63, %v1693_v51 }
 0x278   : > { %v1715_v48 = vrot.slane %v1714_v46, 2  ;;  %v2463_v44 = vmax.f32 %v1928_v18, 0.0  ;;  %v5804_v49 = vpop.f32.mrf.mxu0  ;;  %v1933_v16 = vpop.f32.mrf.mxu1  ;;  %v1932_v43 = vadd.f32 %v1931_v11, %v5515_v52  ;;  %v5817_v62 = vrot.slane %v652_v24, %v5504_v47 }
 0x279   : > { %v1654_v10 = vrot.slane %v1653_v7, 1  ;;  %v1674_v29 = vadd.f32 %v1673_v45, %v1672_v28  ;;  %v1696_v19 = vrot.slane %v1695_v38, 1  ;;  %v1934_v13 = vadd.f32 %v1933_v16, %v5526_v56 }
 0x27a   : > { %v1716_v30 = vadd.f32 %v1715_v48, %v1714_v46  ;;  %v2637_v34 = vadd.f32 %v2463_v44, %v2453_v59  ;;  %v5807_v3 = vpop.f32.mrf.mxu0  ;;  %v1935_v26 = vpop.f32.mrf.mxu1  ;;  %v2472_v4 = vmax.f32 %v1932_v43, 0.0 }
 0x27b   : > { %v1675_v20 = vrot.slane %v1674_v29, 1  ;;  %v1655_v8 = vadd.f32 %v1654_v10, %v1653_v7  ;;  %v1697_v32 = vadd.f32 %v1696_v19, %v1695_v38  ;;  %v2473_v55 = vmax.f32 %v1934_v13, 0.0 }
 0x27c   : > { %v1717_v6 = vrot.slane %v1716_v30, 1  ;;  %v5810_v35 = vpop.f32.mrf.mxu0  ;;  %v1937_v37 = vpop.f32.mrf.mxu1  ;;  %v2617_v39 = vadd.f32 %v2616_v12, %v2472_v4  ;;  %v1936_v58 = vadd.f32 %v1935_v26, %v5515_v52  ;;  %v1310_v10 = vadd.f32 %v5790_v42, %v5817_v62 }
 0x27d   : > { %v1676_v1 = vadd.f32 %v1675_v20, %v1674_v29  ;;  %v1938_v61 = vadd.f32 %v1937_v37, %v5526_v56  ;;  %v2638_v28 = vadd.f32 %v2637_v34, %v2473_v55  ;;  %v1811_v20 = vrot.slane %v1803_v2, %v5666_v21  ;;  %v1548_v37 = vld [vmem:[#allocation2] ss:$2 sm:$0xff] }
 0x27e   : > { %v1718_v17 = vadd.f32 %v1717_v6, %v1716_v30  ;;  %v5813_v27 = vpop.f32.mrf.mxu0  ;;  %v1941_v51 = vpop.f32.mrf.mxu1  ;;  %v2482_v54 = vmax.f32 %v1936_v58, 0.0  ;;  %v5830_v30 = vrot.slane %v652_v24, %v5510_v50  ;;  %v1320_v58 = vadd.f32 %v5802_v0, %v5817_v62 }
 0x27f   : > { %v1773_v40 = vcombine.low %v1655_v8, %v1676_v1  ;;  %v2483_v11 = vmax.f32 %v1938_v61, 0.0  ;;  %v1942_v12 = vadd.f32 %v1941_v51, %v5515_v52  ;;  %v1314_v8 = vadd.f32 %v5795_v15, %v5817_v62 }
 0x280   : > { %v1774_v31 = vcombine.low %v1697_v32, %v1718_v17  ;;  %v5819_v63 = vpop.f32.mrf.mxu0  ;;  %v1943_v46 = vpop.f32.mrf.mxu1  ;;  %v2618_v45 = vadd.f32 %v2617_v39, %v2482_v54  ;;  %v1316_v1 = vadd.f32 %v5799_v23, %v5830_v30  ;;  %v1396_v17 = vmax.f32 %v1310_v10, 0.0 }
 0x281   : > { %v1795_v18 = vrot.slane %v1773_v40, %v5666_v21  ;;  %v2639_v59 = vadd.f32 %v2638_v28, %v2483_v11  ;;  %v1944_v44 = vadd.f32 %v1943_v46, %v5526_v56  ;;  %v2492_v29 = vmax.f32 %v1942_v12, 0.0 }
 0x282   : > { %v1802_v7 = vrot.slane %v1774_v31, %v5666_v21  ;;  %v5824_v38 = vpop.f32.mrf.mxu0  ;;  %v1945_v48 = vpop.f32.mrf.mxu1  ;;  %v1312_v55 = vadd.f32 %v5793_v36, %v5830_v30  ;;  %v1322_v23 = vadd.f32 %v5804_v49, %v5830_v30  ;;  %v1406_v46 = vmax.f32 %v1314_v8, 0.0 }
 0x283   : > { %v2493_v34 = vmax.f32 %v1944_v44, 0.0  ;;  %v1946_v26 = vadd.f32 %v1945_v48, %v5515_v52  ;;  %v2619_v6 = vadd.f32 %v2618_v45, %v2492_v29  ;;  %v1324_v0 = vadd.f32 %v5807_v3, %v5817_v62 }
 0x284   : > { %v1804_v16 = vcombine.low %v1795_v18, %v1802_v7  ;;  %v1335_v43 = vpop.f32.mrf.mxu0  ;;  %v1947_v19 = vpop.f32.mrf.mxu1  ;;  %v1407_v18 = vmax.f32 %v1316_v1, 0.0  ;;  %v1326_v7 = vadd.f32 %v5810_v35, %v5830_v30  ;;  %v1416_v44 = vmax.f32 %v1320_v58, 0.0 }
 0x285   : > { %v2640_v24 = vadd.f32 %v2639_v59, %v2493_v34  ;;  %v2502_v39 = vmax.f32 %v1946_v26, 0.0  ;;  %v1948_v60 = vadd.f32 %v1947_v19, %v5526_v56  ;;  %v1397_v59 = vmax.f32 %v1312_v55, 0.0 }
 0x286   : > { %v1818_v4 = vrot.slane %v1804_v16, %v5666_v21  ;;  %v5838_v13 = vpop.f32.mrf.mxu0  ;;  %v1951_v42 = vpop.f32.mrf.mxu1  ;;  %v1417_v29 = vmax.f32 %v1322_v23, 0.0  ;;  %v1330_v19 = vadd.f32 %v5813_v27, %v5817_v62  ;;  %v1332_v35 = vadd.f32 %v5819_v63, %v5830_v30 }
 0x287   : > { %v2620_v51 = vadd.f32 %v2619_v6, %v2502_v39  ;;  %v1952_v15 = vadd.f32 %v1951_v42, %v5515_v52  ;;  %v2503_v61 = vmax.f32 %v1948_v60, 0.0  ;;  %v1426_v8 = vmax.f32 %v1324_v0, 0.0 }
 0x288   : > { %v1819_v32 = vcombine.low %v1811_v20, %v1818_v4  ;;  %v1341_v41 = vpop.f32.mrf.mxu0  ;;  %v1953_v2 = vpop.f32.mrf.mxu1  ;;  %v1719_v4 = vadd.f32 %v1406_v46, %v1396_v17  ;;  %v1427_v1 = vmax.f32 %v1326_v7, 0.0  ;;  %v1334_v27 = vadd.f32 %v5824_v38, %v5817_v62 }
 0x289   : > { %v1954_v31 = vadd.f32 %v1953_v2, %v5526_v56  ;;  %v2512_v11 = vmax.f32 %v1952_v15, 0.0  ;;  %v2641_v45 = vadd.f32 %v2640_v24, %v2503_v61  ;;  %v1336_v60 = vadd.f32 %v1335_v43, %v5830_v30 }
 0x28a   : > { %v1837_v40 = vadd.f32 %v1819_v32, %v1548_v37  ;;  %v1343_v28 = vpop.f32.mrf.mxu0  ;;  %v1955_v54 = vpop.f32.mrf.mxu1  ;;  %v1740_v37 = vadd.f32 %v1407_v18, %v1397_v59  ;;  %v1720_v55 = vadd.f32 %v1719_v4, %v1416_v44  ;;  %v1436_v63 = vmax.f32 %v1330_v19, 0.0 }
 0x28b   : > { %v1956_v36 = vadd.f32 %v1955_v54, %v5515_v52  ;;  %v2513_v12 = vmax.f32 %v1954_v31, 0.0  ;;  %v2621_v16 = vadd.f32 %v2620_v51, %v2512_v11  ;;  %v1437_v23 = vmax.f32 %v1332_v35, 0.0 }
 0x28c   : > { %1839 = vst [vmem:[#allocation2] ss:$2 sm:$0xff] %v1837_v40  ;;  %v1345_v49 = vpop.f32.mrf.mxu0  ;;  %v1957_v48 = vpop.f32.mrf.mxu1  ;;  %v1741_v58 = vadd.f32 %v1740_v37, %v1417_v29  ;;  %v1340_v61 = vadd.f32 %v5838_v13, %v5817_v62  ;;  %v1721_v46 = vadd.f32 %v1720_v55, %v1426_v8  ;;  %v1342_v38 = vadd.f32 %v1341_v41, %v5830_v30 }
 0x28d   : > { %v2522_v10 = vmax.f32 %v1956_v36, 0.0  ;;  %v2642_v34 = vadd.f32 %v2641_v45, %v2513_v12  ;;  %v1958_v26 = vadd.f32 %v1957_v48, %v5526_v56  ;;  %v1446_v0 = vmax.f32 %v1334_v27, 0.0 }
 0x28e   : > { %v1349_v20 = vpop.f32.mrf.mxu0  ;;  %v1961_v3 = vpop.f32.mrf.mxu1  ;;  %v1742_v18 = vadd.f32 %v1741_v58, %v1427_v1  ;;  %v1447_v7 = vmax.f32 %v1336_v60, 0.0  ;;  %v1722_v48 = vadd.f32 %v1721_v46, %v1436_v63  ;;  %v1344_v59 = vadd.f32 %v1343_v28, %v5817_v62 }
 0x28f   : > { %v2622_v6 = vadd.f32 %v2621_v16, %v2522_v10  ;;  %v1962_v42 = vadd.f32 %v1961_v3, %v5515_v52  ;;  %v2523_v24 = vmax.f32 %v1958_v26, 0.0  ;;  %v1346_v13 = vadd.f32 %v1345_v49, %v5830_v30 }
 0x290   : > { %v1351_v39 = vpop.f32.mrf.mxu0  ;;  %v1963_v32 = vpop.f32.mrf.mxu1  ;;  %v1743_v29 = vadd.f32 %v1742_v18, %v1437_v23  ;;  %v1456_v19 = vmax.f32 %v1340_v61, 0.0  ;;  %v1457_v26 = vmax.f32 %v1342_v38, 0.0  ;;  %v1350_v3 = vadd.f32 %v1349_v20, %v5817_v62 }
 0x291   : > { %v2532_v2 = vmax.f32 %v1962_v42, 0.0  ;;  %v1964_v17 = vadd.f32 %v1963_v32, %v5526_v56  ;;  %v2643_v51 = vadd.f32 %v2642_v34, %v2523_v24  ;;  %v1352_v4 = vadd.f32 %v1351_v39, %v5830_v30 }
 0x292   : > { %v1353_v15 = vpop.f32.mrf.mxu0  ;;  %v1965_v40 = vpop.f32.mrf.mxu1  ;;  %v1723_v37 = vadd.f32 %v1722_v48, %v1446_v0  ;;  %v1744_v28 = vadd.f32 %v1743_v29, %v1447_v7  ;;  %v1466_v1 = vmax.f32 %v1344_v59, 0.0  ;;  %v1467_v24 = vmax.f32 %v1346_v13, 0.0 }
 0x293   : > { %v2623_v31 = vadd.f32 %v2622_v6, %v2532_v2  ;;  %v2533_v54 = vmax.f32 %v1964_v17, 0.0  ;;  %v1966_v43 = vadd.f32 %v1965_v40, %v5515_v52  ;;  %v1354_v32 = vadd.f32 %v1353_v15, %v5817_v62 }
 0x294   : > { %v1355_v11 = vpop.f32.mrf.mxu0  ;;  %v1967_v36 = vpop.f32.mrf.mxu1  ;;  %v1724_v17 = vadd.f32 %v1723_v37, %v1456_v19  ;;  %v1745_v58 = vadd.f32 %v1744_v28, %v1457_v26  ;;  %v1476_v63 = vmax.f32 %v1350_v3, 0.0 }
 0x295   : > { %v2644_v45 = vadd.f32 %v2643_v51, %v2533_v54  ;;  %v1968_v12 = vadd.f32 %v1967_v36, %v5526_v56  ;;  %v2542_v44 = vmax.f32 %v1966_v43, 0.0  ;;  %v1356_v20 = vadd.f32 %v1355_v11, %v5830_v30 }
 0x296   : > { %v1359_v16 = vpop.f32.mrf.mxu0  ;;  %v1971_v10 = vpop.f32.mrf.mxu1  ;;  %v1477_v51 = vmax.f32 %v1352_v4, 0.0  ;;  %v1725_v18 = vadd.f32 %v1724_v17, %v1466_v1  ;;  %v1746_v38 = vadd.f32 %v1745_v58, %v1467_v24  ;;  %v1486_v43 = vmax.f32 %v1354_v32, 0.0 }
 0x297   : > { %v2543_v41 = vmax.f32 %v1968_v12, 0.0  ;;  %v1972_v34 = vadd.f32 %v1971_v10, %v5515_v52  ;;  %v2624_v35 = vadd.f32 %v2623_v31, %v2542_v44  ;;  %v1360_v31 = vadd.f32 %v1359_v16, %v5817_v62 }
 0x298   : > { %v1361_v6 = vpop.f32.mrf.mxu0  ;;  %v1973_v42 = vpop.f32.mrf.mxu1  ;;  %v1487_v7 = vmax.f32 %v1356_v20, 0.0  ;;  %v1726_v59 = vadd.f32 %v1725_v18, %v1476_v63  ;;  %v1747_v13 = vadd.f32 %v1746_v38, %v1477_v51 }
 0x299   : > { %v2645_v8 = vadd.f32 %v2644_v45, %v2543_v41  ;;  %v2552_v49 = vmax.f32 %v1972_v34, 0.0  ;;  %v1974_v27 = vadd.f32 %v1973_v42, %v5526_v56  ;;  %v1362_v15 = vadd.f32 %v1361_v6, %v5830_v30 }
 0x29a   : > { %v1363_v60 = vpop.f32.mrf.mxu0  ;;  %v1975_v2 = vpop.f32.mrf.mxu1  ;;  %v1496_v19 = vmax.f32 %v1360_v31, 0.0  ;;  %v1727_v3 = vadd.f32 %v1726_v59, %v1486_v43  ;;  %v1748_v28 = vadd.f32 %v1747_v13, %v1487_v7 }
 0x29b   : > { %v2625_v55 = vadd.f32 %v2624_v35, %v2552_v49  ;;  %v1976_v39 = vadd.f32 %v1975_v2, %v5515_v52  ;;  %v2553_v40 = vmax.f32 %v1974_v27, 0.0  ;;  %v1364_v45 = vadd.f32 %v1363_v60, %v5817_v62 }
 0x29c   : > { %v1365_v23 = vpop.f32.mrf.mxu0  ;;  %v1977_v61 = vpop.f32.mrf.mxu1  ;;  %v1497_v41 = vmax.f32 %v1362_v15, 0.0  ;;  %v1728_v17 = vadd.f32 %v1727_v3, %v1496_v19 }
 0x29d   : > { %v2562_v54 = vmax.f32 %v1976_v39, 0.0  ;;  %v1978_v46 = vadd.f32 %v1977_v61, %v5526_v56  ;;  %v2646_v11 = vadd.f32 %v2645_v8, %v2553_v40  ;;  %v1366_v44 = vadd.f32 %v1365_v23, %v5830_v30 }
 0x29e   : > { %v1369_v36 = vpop.f32.mrf.mxu0  ;;  %v1981_v0 = vpop.f32.mrf.mxu1  ;;  %v1506_v8 = vmax.f32 %v1364_v45, 0.0  ;;  %v1749_v20 = vadd.f32 %v1748_v28, %v1497_v41 }
 0x29f   : > { %v2626_v12 = vadd.f32 %v2625_v55, %v2562_v54  ;;  %v2563_v48 = vmax.f32 %v1978_v46, 0.0  ;;  %v1982_v16 = vadd.f32 %v1981_v0, %v5515_v52  ;;  %v1370_v4 = vadd.f32 %v1369_v36, %v5817_v62 }
 0x2a0   : > { %v1371_v10 = vpop.f32.mrf.mxu0  ;;  %v1983_v29 = vpop.f32.mrf.mxu1  ;;  %v1507_v24 = vmax.f32 %v1366_v44, 0.0  ;;  %v1729_v31 = vadd.f32 %v1728_v17, %v1506_v8 }
 0x2a1   : > { %v2647_v34 = vadd.f32 %v2646_v11, %v2563_v48  ;;  %v1984_v26 = vadd.f32 %v1983_v29, %v5526_v56  ;;  %v2572_v35 = vmax.f32 %v1982_v16, 0.0  ;;  %v1372_v6 = vadd.f32 %v1371_v10, %v5830_v30 }
 0x2a2   : > { %v1373_v42 = vpop.f32.mrf.mxu0  ;;  %v1985_v37 = vpop.f32.mrf.mxu1  ;;  %v1516_v58 = vmax.f32 %v1370_v4, 0.0  ;;  %v1750_v18 = vadd.f32 %v1749_v20, %v1507_v24 }
 0x2a3   : > { %v2573_v49 = vmax.f32 %v1984_v26, 0.0  ;;  %v1986_v1 = vadd.f32 %v1985_v37, %v5515_v52  ;;  %v2627_v32 = vadd.f32 %v2626_v12, %v2572_v35  ;;  %v1374_v27 = vadd.f32 %v1373_v42, %v5817_v62 }
 0x2a4   : > { %v1375_v60 = vpop.f32.mrf.mxu0  ;;  %v1987_v2 = vpop.f32.mrf.mxu1  ;;  %v1517_v63 = vmax.f32 %v1372_v6, 0.0  ;;  %v1730_v48 = vadd.f32 %v1729_v31, %v1516_v58 }
 0x2a5   : > { %v2648_v55 = vadd.f32 %v2647_v34, %v2573_v49  ;;  %v2582_v39 = vmax.f32 %v1986_v1, 0.0  ;;  %v1376_v51 = vadd.f32 %v1375_v60, %v5830_v30  ;;  %v1988_v40 = vadd.f32 %v1987_v2, %v5526_v56 }
 0x2a6   : > { %v1379_v23 = vpop.f32.mrf.mxu0  ;;  %v1991_v61 = vpop.f32.mrf.mxu1  ;;  %v1526_v38 = vmax.f32 %v1374_v27, 0.0  ;;  %v1751_v59 = vadd.f32 %v1750_v18, %v1517_v63 }
 0x2a7   : > { %v2628_v15 = vadd.f32 %v2627_v32, %v2582_v39  ;;  %v1380_v54 = vadd.f32 %v1379_v23, %v5817_v62  ;;  %v1992_v46 = vadd.f32 %v1991_v61, %v5515_v52  ;;  %v1527_v43 = vmax.f32 %v1376_v51, 0.0 }
 0x2a8   : > { %v2583_v11 = vmax.f32 %v1988_v40, 0.0  ;;  %v1381_v36 = vpop.f32.mrf.mxu0  ;;  %v1993_v0 = vpop.f32.mrf.mxu1  ;;  %v1731_v34 = vadd.f32 %v1730_v48, %v1526_v38 }
 0x2a9   : > { %v2592_v7 = vmax.f32 %v1992_v46, 0.0  ;;  %v1382_v45 = vadd.f32 %v1381_v36, %v5830_v30  ;;  %v1994_v12 = vadd.f32 %v1993_v0, %v5526_v56  ;;  %v1536_v44 = vmax.f32 %v1380_v54, 0.0 }
 0x2aa   : > { %v2649_v13 = vadd.f32 %v2648_v55, %v2583_v11  ;;  %v1383_v16 = vpop.f32.mrf.mxu0  ;;  %v1995_v10 = vpop.f32.mrf.mxu1  ;;  %v1752_v26 = vadd.f32 %v1751_v59, %v1527_v43 }
 0x2ab   : > { %v2629_v29 = vadd.f32 %v2628_v15, %v2592_v7  ;;  %v1537_v19 = vmax.f32 %v1382_v45, 0.0  ;;  %v2593_v41 = vmax.f32 %v1994_v12, 0.0  ;;  %v1384_v3 = vadd.f32 %v1383_v16, %v5817_v62 }
 0x2ac   : > { %v1996_v4 = vadd.f32 %v1995_v10, %v5515_v52  ;;  %v1385_v35 = vpop.f32.mrf.mxu0  ;;  %v1997_v6 = vpop.f32.mrf.mxu1  ;;  %v1732_v8 = vadd.f32 %v1731_v34, %v1536_v44 }
 0x2ad   : > { %v2650_v42 = vadd.f32 %v2649_v13, %v2593_v41  ;;  %v1386_v37 = vadd.f32 %v1385_v35, %v5830_v30  ;;  %v1998_v28 = vadd.f32 %v1997_v6, %v5526_v56  ;;  %v1753_v49 = vadd.f32 %v1752_v26, %v1537_v19 }
 0x2ae   : > { %v1546_v1 = vmax.f32 %v1384_v3, 0.0  ;;  %v2602_v24 = vmax.f32 %v1996_v4, 0.0  ;;  %v2034_v32 = vpop.f32.mrf.mxu0  ;;  %v2147_v27 = vpop.f32.mrf.mxu1 }
 0x2af   : > { %v1547_v60 = vmax.f32 %v1386_v37, 0.0  ;;  %v2603_v2 = vmax.f32 %v1998_v28, 0.0  ;;  %v2035_v17 = vadd.f32 %v2034_v32, %v5518_v53  ;;  %v2148_v20 = vadd.f32 %v2147_v27, %v5669_v22 }
 0x2b0   : > { %v1733_v52 = vadd.f32 %v1732_v8, %v1546_v1  ;;  %v2630_v55 = vadd.f32 %v2629_v29, %v2602_v24  ;;  %v2036_v39 = vpop.f32.mrf.mxu0  ;;  %v2149_v58 = vpop.f32.mrf.mxu1 }
 0x2b1   : > { %v1754_v63 = vadd.f32 %v1753_v49, %v1547_v60  ;;  %v2651_v51 = vadd.f32 %v2650_v42, %v2603_v2  ;;  %v2454_v40 = vmax.f32 %v2035_v17, 0.0  ;;  %v2456_v56 = vmax.f32 %v2148_v20, 0.0 }
 0x2b2   : > { %v1734_v23 = vrot.slane %v1733_v52, 4  ;;  %v2631_v61 = vrot.slane %v2630_v55, 4  ;;  %v2037_v31 = vadd.f32 %v2036_v39, %v5529_v57  ;;  %v2150_v15 = vadd.f32 %v2149_v58, %v5677_v33  ;;  %v2038_v54 = vpop.f32.mrf.mxu0  ;;  %v2151_v46 = vpop.f32.mrf.mxu1 }
 0x2b3   : > { %v1755_v18 = vrot.slane %v1754_v63, 4  ;;  %v2652_v38 = vrot.slane %v2651_v51, 4  ;;  %v2039_v43 = vadd.f32 %v2038_v54, %v5518_v53  ;;  %v2152_v11 = vadd.f32 %v2151_v46, %v5669_v22 }
 0x2b4   : > { %v1735_v36 = vadd.f32 %v1734_v23, %v1733_v52  ;;  %v2632_v0 = vadd.f32 %v2631_v61, %v2630_v55  ;;  %v2455_v7 = vmax.f32 %v2037_v31, 0.0  ;;  %v2457_v45 = vmax.f32 %v2150_v15, 0.0  ;;  %v2040_v12 = vpop.f32.mrf.mxu0  ;;  %v2153_v48 = vpop.f32.mrf.mxu1 }
 0x2b5   : > { %v1756_v59 = vadd.f32 %v1755_v18, %v1754_v63  ;;  %v2653_v13 = vadd.f32 %v2652_v38, %v2651_v51  ;;  %v2464_v44 = vmax.f32 %v2039_v43, 0.0  ;;  %v2466_v16 = vmax.f32 %v2152_v11, 0.0 }
 0x2b6   : > { %v1736_v10 = vrot.slane %v1735_v36, 2  ;;  %v2633_v29 = vrot.slane %v2632_v0, 2  ;;  %v2041_v19 = vadd.f32 %v2040_v12, %v5529_v57  ;;  %v2154_v41 = vadd.f32 %v2153_v48, %v5677_v33  ;;  %v2044_v34 = vpop.f32.mrf.mxu0  ;;  %v2157_v26 = vpop.f32.mrf.mxu1 }
 0x2b7   : > { %v1757_v3 = vrot.slane %v1756_v59, 2  ;;  %v2654_v4 = vrot.slane %v2653_v13, 2  ;;  %v2658_v35 = vadd.f32 %v2464_v44, %v2454_v40  ;;  %v2700_v6 = vadd.f32 %v2466_v16, %v2456_v56 }
 0x2b8   : > { %v1737_v42 = vadd.f32 %v1736_v10, %v1735_v36  ;;  %v2634_v37 = vadd.f32 %v2633_v29, %v2632_v0  ;;  %v2465_v28 = vmax.f32 %v2041_v19, 0.0  ;;  %v2467_v8 = vmax.f32 %v2154_v41, 0.0  ;;  %v2046_v49 = vpop.f32.mrf.mxu0  ;;  %v2159_v1 = vpop.f32.mrf.mxu1 }
 0x2b9   : > { %v1758_v24 = vadd.f32 %v1757_v3, %v1756_v59  ;;  %v2655_v32 = vadd.f32 %v2654_v4, %v2653_v13  ;;  %v2045_v27 = vadd.f32 %v2044_v34, %v5518_v53  ;;  %v2158_v60 = vadd.f32 %v2157_v26, %v5669_v22 }
 0x2ba   : > { %v1738_v2 = vrot.slane %v1737_v42, 1  ;;  %v2635_v17 = vrot.slane %v2634_v37, 1  ;;  %v2679_v20 = vadd.f32 %v2465_v28, %v2455_v7  ;;  %v2721_v52 = vadd.f32 %v2467_v8, %v2457_v45  ;;  %v2048_v55 = vpop.f32.mrf.mxu0  ;;  %v2161_v39 = vpop.f32.mrf.mxu1 }
 0x2bb   : > { %v1759_v58 = vrot.slane %v1758_v24, 1  ;;  %v2656_v63 = vrot.slane %v2655_v32, 1  ;;  %v2474_v51 = vmax.f32 %v2045_v27, 0.0  ;;  %v2476_v40 = vmax.f32 %v2158_v60, 0.0 }
 0x2bc   : > { %v1739_v56 = vadd.f32 %v1738_v2, %v1737_v42  ;;  %v5913_v23 = vadd.f32 %v2635_v17, %v2634_v37  ;;  %v2047_v61 = vadd.f32 %v2046_v49, %v5529_v57  ;;  %v2160_v31 = vadd.f32 %v2159_v1, %v5677_v33  ;;  %v2050_v15 = vpop.f32.mrf.mxu0  ;;  %v2163_v54 = vpop.f32.mrf.mxu1 }
 0x2bd   : > { %v1760_v46 = vadd.f32 %v1759_v58, %v1758_v24  ;;  %v5917_v18 = vadd.f32 %v2656_v63, %v2655_v32  ;;  %v2659_v38 = vadd.f32 %v2658_v35, %v2474_v51  ;;  %v2701_v43 = vadd.f32 %v2700_v6, %v2476_v40  ;;  %v1550_v6 = vld [vmem:[#allocation2 + $0x10] ss:$2 sm:$0x3] }
 0x2be   : > { %v2475_v11 = vmax.f32 %v2047_v61, 0.0  ;;  %v2477_v36 = vmax.f32 %v2160_v31, 0.0  ;;  %v2049_v0 = vadd.f32 %v2048_v55, %v5518_v53  ;;  %v2162_v7 = vadd.f32 %v2161_v39, %v5669_v22  ;;  %v2054_v45 = vpop.f32.mrf.mxu0  ;;  %v2167_v12 = vpop.f32.mrf.mxu1 }
 0x2bf   : > { %v1820_v48 = vcombine.low %v1739_v56, %v1760_v46  ;;  %v2836_v59 = vcombine.low %v5913_v23, %v5917_v18  ;;  %v2051_v13 = vadd.f32 %v2050_v15, %v5529_v57  ;;  %v2164_v44 = vadd.f32 %v2163_v54, %v5677_v33 }
 0x2c0   : > { %v2680_v16 = vadd.f32 %v2679_v20, %v2475_v11  ;;  %v2722_v10 = vadd.f32 %v2721_v52, %v2477_v36  ;;  %v2484_v29 = vmax.f32 %v2049_v0, 0.0  ;;  %v2486_v19 = vmax.f32 %v2162_v7, 0.0  ;;  %v2056_v41 = vpop.f32.mrf.mxu0  ;;  %v2169_v34 = vpop.f32.mrf.mxu1 }
 0x2c1   : > { %v1827_v26 = vrot.slane %v1820_v48, %v5666_v21  ;;  %v2485_v4 = vmax.f32 %v2051_v13, 0.0  ;;  %v2487_v35 = vmax.f32 %v2164_v44, 0.0  ;;  %v2055_v28 = vadd.f32 %v2054_v45, %v5518_v53 }
 0x2c2   : > { %v2660_v42 = vadd.f32 %v2659_v38, %v2484_v29  ;;  %v2702_v37 = vadd.f32 %v2701_v43, %v2486_v19  ;;  %v2168_v8 = vadd.f32 %v2167_v12, %v5669_v22  ;;  %v2058_v49 = vpop.f32.mrf.mxu0  ;;  %v2171_v1 = vpop.f32.mrf.mxu1  ;;  %v2057_v5 = vadd.f32 %v2056_v41, %v5529_v57 }
 0x2c3   : > { %v1834_v24 = vrot.slane %v1827_v26, %v5666_v21  ;;  %v2681_v32 = vadd.f32 %v2680_v16, %v2485_v4  ;;  %v2723_v27 = vadd.f32 %v2722_v10, %v2487_v35  ;;  %v2494_v60 = vmax.f32 %v2055_v28, 0.0 }
 0x2c4   : > { %v2496_v2 = vmax.f32 %v2168_v8, 0.0  ;;  %v2170_v17 = vadd.f32 %v2169_v34, %v5677_v33  ;;  %v2059_v20 = vadd.f32 %v2058_v49, %v5518_v53  ;;  %v2060_v52 = vpop.f32.mrf.mxu0  ;;  %v2173_v55 = vpop.f32.mrf.mxu1  ;;  %v2495_v58 = vmax.f32 %v2057_v5, 0.0 }
 0x2c5   : > { %v1838_v39 = vadd.f32 %v1834_v24, %v1550_v6  ;;  %v2172_v63 = vadd.f32 %v2171_v1, %v5669_v22  ;;  %v2061_v51 = vadd.f32 %v2060_v52, %v5529_v57  ;;  %v2661_v40 = vadd.f32 %v2660_v42, %v2494_v60 }
 0x2c6   : > { %v2703_v56 = vadd.f32 %v2702_v37, %v2496_v2  ;;  %v2497_v61 = vmax.f32 %v2170_v17, 0.0  ;;  %v2504_v31 = vmax.f32 %v2059_v20, 0.0  ;;  %v2064_v15 = vpop.f32.mrf.mxu0  ;;  %v2177_v54 = vpop.f32.mrf.mxu1  ;;  %v2682_v46 = vadd.f32 %v2681_v32, %v2495_v58 }
 0x2c7   : > { %1844 = vst.msk [vmem:[#allocation2 + $0x10] ss:$2 sm:$0x3] %vm5927_vm2, %v1838_v39  ;;  %v2506_v38 = vmax.f32 %v2172_v63, 0.0  ;;  %v2505_v43 = vmax.f32 %v2061_v51, 0.0  ;;  %v2174_v11 = vadd.f32 %v2173_v55, %v5677_v33  ;;  %v2065_v7 = vadd.f32 %v2064_v15, %v5518_v53 }
 0x2c8   : > { %v2724_v36 = vadd.f32 %v2723_v27, %v2497_v61  ;;  %v2662_v0 = vadd.f32 %v2661_v40, %v2504_v31  ;;  %v2178_v45 = vadd.f32 %v2177_v54, %v5669_v22  ;;  %v2066_v12 = vpop.f32.mrf.mxu0  ;;  %v2179_v48 = vpop.f32.mrf.mxu1 }
 0x2c9   : > { %v2704_v13 = vadd.f32 %v2703_v56, %v2506_v38  ;;  %v2683_v44 = vadd.f32 %v2682_v46, %v2505_v43  ;;  %v2507_v16 = vmax.f32 %v2174_v11, 0.0  ;;  %v2067_v10 = vadd.f32 %v2066_v12, %v5529_v57 }
 0x2ca   : > { %v2514_v29 = vmax.f32 %v2065_v7, 0.0  ;;  %v2516_v19 = vmax.f32 %v2178_v45, 0.0  ;;  %v2180_v41 = vadd.f32 %v2179_v48, %v5677_v33  ;;  %v2068_v34 = vpop.f32.mrf.mxu0  ;;  %v2181_v26 = vpop.f32.mrf.mxu1 }
 0x2cb   : > { %v2725_v4 = vadd.f32 %v2724_v36, %v2507_v16  ;;  %v2515_v35 = vmax.f32 %v2067_v10, 0.0  ;;  %v2069_v6 = vadd.f32 %v2068_v34, %v5518_v53  ;;  %v2182_v42 = vadd.f32 %v2181_v26, %v5669_v22 }
 0x2cc   : > { %v2663_v37 = vadd.f32 %v2662_v0, %v2514_v29  ;;  %v2705_v28 = vadd.f32 %v2704_v13, %v2516_v19  ;;  %v2517_v8 = vmax.f32 %v2180_v41, 0.0  ;;  %v2070_v49 = vpop.f32.mrf.mxu0  ;;  %v2183_v1 = vpop.f32.mrf.mxu1 }
 0x2cd   : > { %v2684_v24 = vadd.f32 %v2683_v44, %v2515_v35  ;;  %v2524_v32 = vmax.f32 %v2069_v6, 0.0  ;;  %v2526_v27 = vmax.f32 %v2182_v42, 0.0  ;;  %v2071_v5 = vadd.f32 %v2070_v49, %v5529_v57 }
 0x2ce   : > { %v2726_v60 = vadd.f32 %v2725_v4, %v2517_v8  ;;  %v2184_v2 = vadd.f32 %v2183_v1, %v5677_v33  ;;  %v2074_v17 = vpop.f32.mrf.mxu0  ;;  %v2187_v20 = vpop.f32.mrf.mxu1 }
 0x2cf   : > { %v2664_v52 = vadd.f32 %v2663_v37, %v2524_v32  ;;  %v2706_v55 = vadd.f32 %v2705_v28, %v2526_v27  ;;  %v2525_v39 = vmax.f32 %v2071_v5, 0.0  ;;  %v2075_v58 = vadd.f32 %v2074_v17, %v5518_v53 }
 0x2d0   : > { %v2527_v63 = vmax.f32 %v2184_v2, 0.0  ;;  %v2188_v51 = vadd.f32 %v2187_v20, %v5669_v22  ;;  %v2076_v40 = vpop.f32.mrf.mxu0  ;;  %v2189_v56 = vpop.f32.mrf.mxu1 }
 0x2d1   : > { %v2685_v61 = vadd.f32 %v2684_v24, %v2525_v39  ;;  %v2534_v31 = vmax.f32 %v2075_v58, 0.0  ;;  %v2077_v15 = vadd.f32 %v2076_v40, %v5529_v57  ;;  %v2190_v54 = vadd.f32 %v2189_v56, %v5677_v33 }
 0x2d2   : > { %v2727_v46 = vadd.f32 %v2726_v60, %v2527_v63  ;;  %v2536_v38 = vmax.f32 %v2188_v51, 0.0  ;;  %v2078_v43 = vpop.f32.mrf.mxu0  ;;  %v2191_v11 = vpop.f32.mrf.mxu1 }
 0x2d3   : > { %v2665_v36 = vadd.f32 %v2664_v52, %v2534_v31  ;;  %v2535_v0 = vmax.f32 %v2077_v15, 0.0  ;;  %v2537_v7 = vmax.f32 %v2190_v54, 0.0  ;;  %v2079_v45 = vadd.f32 %v2078_v43, %v5518_v53 }
 0x2d4   : > { %v2707_v12 = vadd.f32 %v2706_v55, %v2536_v38  ;;  %v2192_v48 = vadd.f32 %v2191_v11, %v5669_v22  ;;  %v2080_v13 = vpop.f32.mrf.mxu0  ;;  %v2193_v44 = vpop.f32.mrf.mxu1 }
 0x2d5   : > { %v2686_v16 = vadd.f32 %v2685_v61, %v2535_v0  ;;  %v2728_v10 = vadd.f32 %v2727_v46, %v2537_v7  ;;  %v2544_v29 = vmax.f32 %v2079_v45, 0.0  ;;  %v2081_v19 = vadd.f32 %v2080_v13, %v5529_v57 }
 0x2d6   : > { %v2546_v41 = vmax.f32 %v2192_v48, 0.0  ;;  %v2194_v34 = vadd.f32 %v2193_v44, %v5677_v33  ;;  %v2084_v26 = vpop.f32.mrf.mxu0  ;;  %v2197_v4 = vpop.f32.mrf.mxu1 }
 0x2d7   : > { %v2666_v35 = vadd.f32 %v2665_v36, %v2544_v29  ;;  %v2545_v6 = vmax.f32 %v2081_v19, 0.0  ;;  %v2085_v42 = vadd.f32 %v2084_v26, %v5518_v53  ;;  %v2198_v37 = vadd.f32 %v2197_v4, %v5669_v22 }
 0x2d8   : > { %v2708_v28 = vadd.f32 %v2707_v12, %v2546_v41  ;;  %v2547_v8 = vmax.f32 %v2194_v34, 0.0  ;;  %v2086_v49 = vpop.f32.mrf.mxu0  ;;  %v2199_v1 = vpop.f32.mrf.mxu1 }
 0x2d9   : > { %v2687_v24 = vadd.f32 %v2686_v16, %v2545_v6  ;;  %v2554_v32 = vmax.f32 %v2085_v42, 0.0  ;;  %v2556_v27 = vmax.f32 %v2198_v37, 0.0  ;;  %v2087_v5 = vadd.f32 %v2086_v49, %v5529_v57 }
 0x2da   : > { %v2729_v60 = vadd.f32 %v2728_v10, %v2547_v8  ;;  %v2200_v2 = vadd.f32 %v2199_v1, %v5677_v33  ;;  %v2088_v17 = vpop.f32.mrf.mxu0  ;;  %v2201_v20 = vpop.f32.mrf.mxu1 }
 0x2db   : > { %v2667_v52 = vadd.f32 %v2666_v35, %v2554_v32  ;;  %v2709_v55 = vadd.f32 %v2708_v28, %v2556_v27  ;;  %v2555_v39 = vmax.f32 %v2087_v5, 0.0  ;;  %v2089_v58 = vadd.f32 %v2088_v17, %v5518_v53 }
 0x2dc   : > { %v2557_v63 = vmax.f32 %v2200_v2, 0.0  ;;  %v2202_v51 = vadd.f32 %v2201_v20, %v5669_v22  ;;  %v2090_v40 = vpop.f32.mrf.mxu0  ;;  %v2203_v56 = vpop.f32.mrf.mxu1 }
 0x2dd   : > { %v2688_v61 = vadd.f32 %v2687_v24, %v2555_v39  ;;  %v2564_v31 = vmax.f32 %v2089_v58, 0.0  ;;  %v2091_v15 = vadd.f32 %v2090_v40, %v5529_v57  ;;  %v2204_v54 = vadd.f32 %v2203_v56, %v5677_v33 }
 0x2de   : > { %v2730_v46 = vadd.f32 %v2729_v60, %v2557_v63  ;;  %v2566_v38 = vmax.f32 %v2202_v51, 0.0  ;;  %v2094_v43 = vpop.f32.mrf.mxu0  ;;  %v2207_v11 = vpop.f32.mrf.mxu1 }
 0x2df   : > { %v2668_v36 = vadd.f32 %v2667_v52, %v2564_v31  ;;  %v2565_v0 = vmax.f32 %v2091_v15, 0.0  ;;  %v2567_v7 = vmax.f32 %v2204_v54, 0.0  ;;  %v2095_v45 = vadd.f32 %v2094_v43, %v5518_v53 }
 0x2e0   : > { %v2710_v12 = vadd.f32 %v2709_v55, %v2566_v38  ;;  %v2208_v48 = vadd.f32 %v2207_v11, %v5669_v22  ;;  %v2096_v13 = vpop.f32.mrf.mxu0  ;;  %v2209_v44 = vpop.f32.mrf.mxu1 }
 0x2e1   : > { %v2689_v16 = vadd.f32 %v2688_v61, %v2565_v0  ;;  %v2731_v10 = vadd.f32 %v2730_v46, %v2567_v7  ;;  %v2574_v29 = vmax.f32 %v2095_v45, 0.0  ;;  %v2097_v19 = vadd.f32 %v2096_v13, %v5529_v57 }
 0x2e2   : > { %v2576_v41 = vmax.f32 %v2208_v48, 0.0  ;;  %v2210_v34 = vadd.f32 %v2209_v44, %v5677_v33  ;;  %v2098_v26 = vpop.f32.mrf.mxu0  ;;  %v2211_v4 = vpop.f32.mrf.mxu1 }
 0x2e3   : > { %v2669_v35 = vadd.f32 %v2668_v36, %v2574_v29  ;;  %v2575_v6 = vmax.f32 %v2097_v19, 0.0  ;;  %v2099_v42 = vadd.f32 %v2098_v26, %v5518_v53  ;;  %v2212_v37 = vadd.f32 %v2211_v4, %v5669_v22 }
 0x2e4   : > { %v2711_v28 = vadd.f32 %v2710_v12, %v2576_v41  ;;  %v2577_v8 = vmax.f32 %v2210_v34, 0.0  ;;  %v2100_v49 = vpop.f32.mrf.mxu0  ;;  %v2213_v1 = vpop.f32.mrf.mxu1 }
 0x2e5   : > { %v2690_v24 = vadd.f32 %v2689_v16, %v2575_v6  ;;  %v2584_v32 = vmax.f32 %v2099_v42, 0.0  ;;  %v2586_v27 = vmax.f32 %v2212_v37, 0.0  ;;  %v2101_v5 = vadd.f32 %v2100_v49, %v5529_v57 }
 0x2e6   : > { %v2732_v60 = vadd.f32 %v2731_v10, %v2577_v8  ;;  %v2214_v2 = vadd.f32 %v2213_v1, %v5677_v33  ;;  %v2104_v17 = vpop.f32.mrf.mxu0  ;;  %v2217_v20 = vpop.f32.mrf.mxu1 }
 0x2e7   : > { %v2670_v52 = vadd.f32 %v2669_v35, %v2584_v32  ;;  %v2712_v55 = vadd.f32 %v2711_v28, %v2586_v27  ;;  %v2585_v39 = vmax.f32 %v2101_v5, 0.0  ;;  %v2105_v58 = vadd.f32 %v2104_v17, %v5518_v53 }
 0x2e8   : > { %v2587_v63 = vmax.f32 %v2214_v2, 0.0  ;;  %v2218_v51 = vadd.f32 %v2217_v20, %v5669_v22  ;;  %v2106_v40 = vpop.f32.mrf.mxu0  ;;  %v2219_v56 = vpop.f32.mrf.mxu1 }
 0x2e9   : > { %v2691_v61 = vadd.f32 %v2690_v24, %v2585_v39  ;;  %v2594_v31 = vmax.f32 %v2105_v58, 0.0  ;;  %v2107_v15 = vadd.f32 %v2106_v40, %v5529_v57  ;;  %v2220_v54 = vadd.f32 %v2219_v56, %v5677_v33 }
 0x2ea   : > { %v2733_v46 = vadd.f32 %v2732_v60, %v2587_v63  ;;  %v2596_v38 = vmax.f32 %v2218_v51, 0.0  ;;  %v2108_v43 = vpop.f32.mrf.mxu0  ;;  %v2221_v11 = vpop.f32.mrf.mxu1 }
 0x2eb   : > { %v2671_v36 = vadd.f32 %v2670_v52, %v2594_v31  ;;  %v2595_v0 = vmax.f32 %v2107_v15, 0.0  ;;  %v2597_v7 = vmax.f32 %v2220_v54, 0.0  ;;  %v2109_v45 = vadd.f32 %v2108_v43, %v5518_v53 }
 0x2ec   : > { %v2713_v12 = vadd.f32 %v2712_v55, %v2596_v38  ;;  %v2222_v48 = vadd.f32 %v2221_v11, %v5669_v22  ;;  %v2110_v13 = vpop.f32.mrf.mxu0  ;;  %v2223_v44 = vpop.f32.mrf.mxu1 }
 0x2ed   : > { %v2692_v16 = vadd.f32 %v2691_v61, %v2595_v0  ;;  %v2734_v10 = vadd.f32 %v2733_v46, %v2597_v7  ;;  %v2604_v29 = vmax.f32 %v2109_v45, 0.0  ;;  %v2111_v19 = vadd.f32 %v2110_v13, %v5529_v57 }
 0x2ee   : > { %v2606_v41 = vmax.f32 %v2222_v48, 0.0  ;;  %v2224_v34 = vadd.f32 %v2223_v44, %v5677_v33  ;;  %v2260_v26 = vpop.f32.mrf.mxu0  ;;  %v2373_v4 = vpop.f32.mrf.mxu1 }
 0x2ef   : > { %v2672_v35 = vadd.f32 %v2671_v36, %v2604_v29  ;;  %v2605_v6 = vmax.f32 %v2111_v19, 0.0 }
 0x2f0   : > { %v2714_v42 = vadd.f32 %v2713_v12, %v2606_v41  ;;  %v2607_v37 = vmax.f32 %v2224_v34, 0.0  ;;  %v2262_v53 = vpop.f32.mrf.mxu0  ;;  %v2375_v28 = vpop.f32.mrf.mxu1 }
 0x2f1   : > { %v2673_v8 = vrot.slane %v2672_v35, 4  ;;  %v2693_v22 = vadd.f32 %v2692_v16, %v2605_v6  ;;  %v5994_v6 = vrot.slane %v2836_v59, %v5666_v21  ;;  %v2263_v23 = vadd.f32 %v2262_v53, %v5680_v9 }
 0x2f2   : > { %v2715_v49 = vrot.slane %v2714_v42, 4  ;;  %v2735_v1 = vadd.f32 %v2734_v10, %v2607_v37  ;;  %v2264_v24 = vpop.f32.mrf.mxu0  ;;  %v2377_v32 = vpop.f32.mrf.mxu1  ;;  %v2261_v37 = vadd.f32 %v2260_v26, %v5672_v25  ;;  %v2376_v18 = vadd.f32 %v2375_v28, %v5830_v30 }
 0x2f3   : > { %v2674_v27 = vadd.f32 %v2673_v8, %v2672_v35  ;;  %v2694_v5 = vrot.slane %v2693_v22, 4  ;;  %v2265_v41 = vadd.f32 %v2264_v24, %v5672_v25  ;;  %v2378_v34 = vadd.f32 %v2377_v32, %v5817_v62 }
 0x2f4   : > { %v2716_v57 = vadd.f32 %v2715_v49, %v2714_v42  ;;  %v2736_v60 = vrot.slane %v2735_v1, 4  ;;  %v2266_v2 = vpop.f32.mrf.mxu0  ;;  %v2379_v33 = vpop.f32.mrf.mxu1  ;;  %v2374_v49 = vadd.f32 %v2373_v4, %v5817_v62 }
 0x2f5   : > { %v2675_v17 = vrot.slane %v2674_v27, 2  ;;  %v2695_v20 = vadd.f32 %v2694_v5, %v2693_v22  ;;  %v2267_v8 = vadd.f32 %v2266_v2, %v5680_v9  ;;  %v2468_v5 = vmax.f32 %v2265_v41, 0.0 }
 0x2f6   : > { %v2717_v52 = vrot.slane %v2716_v57, 2  ;;  %v2737_v55 = vadd.f32 %v2736_v60, %v2735_v1  ;;  %v2270_v39 = vpop.f32.mrf.mxu0  ;;  %v2383_v51 = vpop.f32.mrf.mxu1  ;;  %v2380_v1 = vadd.f32 %v2379_v33, %v5830_v30  ;;  %v2470_v26 = vmax.f32 %v2378_v34, 0.0 }
 0x2f7   : > { %v2676_v58 = vadd.f32 %v2675_v17, %v2674_v27  ;;  %v2696_v63 = vrot.slane %v2695_v20, 2  ;;  %v2271_v59 = vadd.f32 %v2270_v39, %v5672_v25  ;;  %v2458_v2 = vmax.f32 %v2261_v37, 0.0 }
 0x2f8   : > { %v2718_v40 = vadd.f32 %v2717_v52, %v2716_v57  ;;  %v2738_v56 = vrot.slane %v2737_v55, 2  ;;  %v2272_v61 = vpop.f32.mrf.mxu0  ;;  %v2385_v54 = vpop.f32.mrf.mxu1  ;;  %v2384_v57 = vadd.f32 %v2383_v51, %v5817_v62  ;;  %v2469_v4 = vmax.f32 %v2267_v8, 0.0 }
 0x2f9   : > { %v2677_v31 = vrot.slane %v2676_v58, 1  ;;  %v2697_v15 = vadd.f32 %v2696_v63, %v2695_v20  ;;  %v2273_v33 = vadd.f32 %v2272_v61, %v5680_v9  ;;  %v2386_v17 = vadd.f32 %v2385_v54, %v5830_v30 }
 0x2fa   : > { %v2719_v46 = vrot.slane %v2718_v40, 1  ;;  %v2739_v38 = vadd.f32 %v2738_v56, %v2737_v55  ;;  %v2274_v43 = vpop.f32.mrf.mxu0  ;;  %v2387_v36 = vpop.f32.mrf.mxu1  ;;  %v2460_v52 = vmax.f32 %v2374_v49, 0.0  ;;  %v2471_v55 = vmax.f32 %v2380_v1, 0.0 }
 0x2fb   : > { %v2698_v11 = vrot.slane %v2697_v15, 1  ;;  %v2678_v45 = vadd.f32 %v2677_v31, %v2676_v58  ;;  %v2275_v53 = vadd.f32 %v2274_v43, %v5672_v25  ;;  %v2388_v28 = vadd.f32 %v2387_v36, %v5817_v62 }
 0x2fc   : > { %v2740_v0 = vrot.slane %v2739_v38, 1  ;;  %v2276_v7 = vpop.f32.mrf.mxu0  ;;  %v2389_v48 = vpop.f32.mrf.mxu1  ;;  %v5982_v13 = vadd.f32 %v2719_v46, %v2718_v40  ;;  %v2459_v58 = vmax.f32 %v2263_v23, 0.0  ;;  %v2461_v63 = vmax.f32 %v2376_v18, 0.0 }
 0x2fd   : > { %v2699_v12 = vadd.f32 %v2698_v11, %v2697_v15  ;;  %v2478_v40 = vmax.f32 %v2271_v59, 0.0  ;;  %v2277_v51 = vadd.f32 %v2276_v7, %v5680_v9  ;;  %v2742_v31 = vadd.f32 %v2468_v5, %v2458_v2 }
 0x2fe   : > { %v5984_v44 = vadd.f32 %v2740_v0, %v2739_v38  ;;  %v2280_v16 = vpop.f32.mrf.mxu0  ;;  %v2393_v29 = vpop.f32.mrf.mxu1  ;;  %v2784_v15 = vadd.f32 %v2470_v26, %v2460_v52  ;;  %v2480_v46 = vmax.f32 %v2384_v57, 0.0  ;;  %v2390_v61 = vadd.f32 %v2389_v48, %v5830_v30 }
 0x2ff   : > { %v2837_v10 = vcombine.low %v2678_v45, %v2699_v12  ;;  %v2763_v38 = vadd.f32 %v2469_v4, %v2459_v58  ;;  %v2479_v11 = vmax.f32 %v2273_v33, 0.0  ;;  %v2481_v0 = vmax.f32 %v2386_v17, 0.0 }
 0x300   : > { %v2838_v19 = vcombine.low %v5982_v13, %v5984_v44  ;;  %v2282_v35 = vpop.f32.mrf.mxu0  ;;  %v2395_v22 = vpop.f32.mrf.mxu1  ;;  %v2281_v43 = vadd.f32 %v2280_v16, %v5672_v25  ;;  %v2805_v36 = vadd.f32 %v2471_v55, %v2461_v63  ;;  %v2488_v12 = vmax.f32 %v2275_v53, 0.0 }
 0x301   : > { %v5997_v42 = vrot.slane %v2837_v10, %v5666_v21  ;;  %v2490_v10 = vmax.f32 %v2388_v28, 0.0  ;;  %v2394_v41 = vadd.f32 %v2393_v29, %v5817_v62  ;;  %v2743_v7 = vadd.f32 %v2742_v31, %v2478_v40 }
 0x302   : > { %v2284_v24 = vpop.f32.mrf.mxu0  ;;  %v2397_v27 = vpop.f32.mrf.mxu1  ;;  %v2489_v37 = vmax.f32 %v2277_v51, 0.0  ;;  %v2283_v8 = vadd.f32 %v2282_v35, %v5680_v9  ;;  %v2396_v49 = vadd.f32 %v2395_v22, %v5830_v30  ;;  %v2785_v1 = vadd.f32 %v2784_v15, %v2480_v46 }
 0x303   : > { %v2868_v32 = vcombine.low %v5994_v6, %v5997_v42  ;;  %v2491_v23 = vmax.f32 %v2390_v61, 0.0  ;;  %v2285_v18 = vadd.f32 %v2284_v24, %v5672_v25  ;;  %v2398_v16 = vadd.f32 %v2397_v27, %v5817_v62 }
 0x304   : > { %v2286_v60 = vpop.f32.mrf.mxu0  ;;  %v2399_v20 = vpop.f32.mrf.mxu1  ;;  %v2764_v5 = vadd.f32 %v2763_v38, %v2479_v11  ;;  %v2806_v26 = vadd.f32 %v2805_v36, %v2481_v0  ;;  %v2498_v57 = vmax.f32 %v2281_v43, 0.0  ;;  %v2744_v4 = vadd.f32 %v2743_v7, %v2488_v12 }
 0x305   : > { %v2287_v29 = vadd.f32 %v2286_v60, %v5680_v9  ;;  %v2786_v33 = vadd.f32 %v2785_v1, %v2490_v10  ;;  %v2500_v17 = vmax.f32 %v2394_v41, 0.0  ;;  %v2400_v35 = vadd.f32 %v2399_v20, %v5830_v30 }
 0x306   : > { %v2290_v39 = vpop.f32.mrf.mxu0  ;;  %v2403_v56 = vpop.f32.mrf.mxu1  ;;  %v2765_v52 = vadd.f32 %v2764_v5, %v2489_v37  ;;  %v2499_v55 = vmax.f32 %v2283_v8, 0.0  ;;  %v2501_v53 = vmax.f32 %v2396_v49, 0.0  ;;  %v2807_v27 = vadd.f32 %v2806_v26, %v2491_v23 }
 0x307   : > { %v2291_v24 = vadd.f32 %v2290_v39, %v5672_v25  ;;  %v2508_v58 = vmax.f32 %v2285_v18, 0.0  ;;  %v2510_v63 = vmax.f32 %v2398_v16, 0.0  ;;  %v2404_v40 = vadd.f32 %v2403_v56, %v5817_v62 }
 0x308   : > { %v2292_v54 = vpop.f32.mrf.mxu0  ;;  %v2405_v45 = vpop.f32.mrf.mxu1  ;;  %v2745_v60 = vadd.f32 %v2744_v4, %v2498_v57  ;;  %v2509_v31 = vmax.f32 %v2287_v29, 0.0  ;;  %v2787_v61 = vadd.f32 %v2786_v33, %v2500_v17  ;;  %v2511_v38 = vmax.f32 %v2400_v35, 0.0 }
 0x309   : > { %v2293_v15 = vadd.f32 %v2292_v54, %v5680_v9  ;;  %v2406_v46 = vadd.f32 %v2405_v45, %v5830_v30  ;;  %v2766_v43 = vadd.f32 %v2765_v52, %v2499_v55  ;;  %v2808_v36 = vadd.f32 %v2807_v27, %v2501_v53 }
 0x30a   : > { %v2294_v34 = vpop.f32.mrf.mxu0  ;;  %v2407_v48 = vpop.f32.mrf.mxu1  ;;  %v2518_v12 = vmax.f32 %v2291_v24, 0.0  ;;  %v2746_v41 = vadd.f32 %v2745_v60, %v2508_v58  ;;  %v2788_v7 = vadd.f32 %v2787_v61, %v2510_v63  ;;  %v2520_v37 = vmax.f32 %v2404_v40, 0.0 }
 0x30b   : > { %v2295_v11 = vadd.f32 %v2294_v34, %v5672_v25  ;;  %v2408_v39 = vadd.f32 %v2407_v48, %v5817_v62  ;;  %v2767_v8 = vadd.f32 %v2766_v43, %v2509_v31  ;;  %v2519_v49 = vmax.f32 %v2293_v15, 0.0 }
 0x30c   : > { %v2296_v59 = vpop.f32.mrf.mxu0  ;;  %v2409_v2 = vpop.f32.mrf.mxu1  ;;  %v2521_v1 = vmax.f32 %v2406_v46, 0.0  ;;  %v2809_v48 = vadd.f32 %v2808_v36, %v2511_v38  ;;  %v2789_v33 = vadd.f32 %v2788_v7, %v2520_v37 }
 0x30d   : > { %v2297_v56 = vadd.f32 %v2296_v59, %v5680_v9  ;;  %v2410_v54 = vadd.f32 %v2409_v2, %v5830_v30  ;;  %v2528_v18 = vmax.f32 %v2295_v11, 0.0  ;;  %v2530_v16 = vmax.f32 %v2408_v39, 0.0 }
 0x30e   : > { %v2300_v22 = vpop.f32.mrf.mxu0  ;;  %v2413_v28 = vpop.f32.mrf.mxu1  ;;  %v2747_v59 = vadd.f32 %v2746_v41, %v2518_v12  ;;  %v2768_v55 = vadd.f32 %v2767_v8, %v2519_v49  ;;  %v2810_v53 = vadd.f32 %v2809_v48, %v2521_v1 }
 0x30f   : > { %v2301_v34 = vadd.f32 %v2300_v22, %v5672_v25  ;;  %v2414_v5 = vadd.f32 %v2413_v28, %v5817_v62  ;;  %v2529_v57 = vmax.f32 %v2297_v56, 0.0  ;;  %v2531_v17 = vmax.f32 %v2410_v54, 0.0 }
 0x310   : > { %v2302_v51 = vpop.f32.mrf.mxu0  ;;  %v2415_v20 = vpop.f32.mrf.mxu1  ;;  %v2748_v58 = vadd.f32 %v2747_v59, %v2528_v18  ;;  %v2790_v63 = vadd.f32 %v2789_v33, %v2530_v16 }
 0x311   : > { %v2303_v29 = vadd.f32 %v2302_v51, %v5680_v9  ;;  %v2416_v4 = vadd.f32 %v2415_v20, %v5830_v30  ;;  %v2538_v24 = vmax.f32 %v2301_v34, 0.0  ;;  %v2540_v40 = vmax.f32 %v2414_v5, 0.0 }
 0x312   : > { %v2304_v0 = vpop.f32.mrf.mxu0  ;;  %v2417_v10 = vpop.f32.mrf.mxu1  ;;  %v2769_v31 = vadd.f32 %v2768_v55, %v2529_v57  ;;  %v2811_v38 = vadd.f32 %v2810_v53, %v2531_v17 }
 0x313   : > { %v2305_v35 = vadd.f32 %v2304_v0, %v5672_v25  ;;  %v2418_v22 = vadd.f32 %v2417_v10, %v5817_v62  ;;  %v2539_v15 = vmax.f32 %v2303_v29, 0.0  ;;  %v2541_v46 = vmax.f32 %v2416_v4, 0.0 }
 0x314   : > { %v2306_v45 = vpop.f32.mrf.mxu0  ;;  %v2419_v23 = vpop.f32.mrf.mxu1  ;;  %v2749_v36 = vadd.f32 %v2748_v58, %v2538_v24  ;;  %v2791_v7 = vadd.f32 %v2790_v63, %v2540_v40 }
 0x315   : > { %v2307_v28 = vadd.f32 %v2306_v45, %v5680_v9  ;;  %v2420_v51 = vadd.f32 %v2419_v23, %v5830_v30  ;;  %v2548_v11 = vmax.f32 %v2305_v35, 0.0  ;;  %v2550_v39 = vmax.f32 %v2418_v22, 0.0 }
 0x316   : > { %v2310_v26 = vpop.f32.mrf.mxu0  ;;  %v2423_v2 = vpop.f32.mrf.mxu1  ;;  %v2770_v49 = vadd.f32 %v2769_v31, %v2539_v15  ;;  %v2812_v1 = vadd.f32 %v2811_v38, %v2541_v46 }
 0x317   : > { %v2311_v20 = vadd.f32 %v2310_v26, %v5672_v25  ;;  %v2424_v0 = vadd.f32 %v2423_v2, %v5817_v62  ;;  %v2549_v12 = vmax.f32 %v2307_v28, 0.0  ;;  %v2551_v37 = vmax.f32 %v2420_v51, 0.0 }
 0x318   : > { %v2312_v52 = vpop.f32.mrf.mxu0  ;;  %v2425_v27 = vpop.f32.mrf.mxu1  ;;  %v2750_v18 = vadd.f32 %v2749_v36, %v2548_v11  ;;  %v2792_v16 = vadd.f32 %v2791_v7, %v2550_v39 }
 0x319   : > { %v2313_v56 = vadd.f32 %v2312_v52, %v5680_v9  ;;  %v2426_v10 = vadd.f32 %v2425_v27, %v5830_v30  ;;  %v2558_v34 = vmax.f32 %v2311_v20, 0.0  ;;  %v2560_v5 = vmax.f32 %v2424_v0, 0.0 }
 0x31a   : > { %v2314_v60 = vpop.f32.mrf.mxu0  ;;  %v2427_v61 = vpop.f32.mrf.mxu1  ;;  %v2771_v57 = vadd.f32 %v2770_v49, %v2549_v12  ;;  %v2813_v17 = vadd.f32 %v2812_v1, %v2551_v37 }
 0x31b   : > { %v2315_v54 = vadd.f32 %v2314_v60, %v5672_v25  ;;  %v2428_v45 = vadd.f32 %v2427_v61, %v5817_v62  ;;  %v2559_v29 = vmax.f32 %v2313_v56, 0.0  ;;  %v2561_v4 = vmax.f32 %v2426_v10, 0.0 }
 0x31c   : > { %v2316_v43 = vpop.f32.mrf.mxu0  ;;  %v2429_v41 = vpop.f32.mrf.mxu1  ;;  %v2751_v53 = vadd.f32 %v2750_v18, %v2558_v34  ;;  %v2793_v63 = vadd.f32 %v2792_v16, %v2560_v5 }
 0x31d   : > { %v2317_v23 = vadd.f32 %v2316_v43, %v5680_v9  ;;  %v2430_v26 = vadd.f32 %v2429_v41, %v5830_v30  ;;  %v2568_v35 = vmax.f32 %v2315_v54, 0.0  ;;  %v2570_v22 = vmax.f32 %v2428_v45, 0.0 }
 0x31e   : > { %v2320_v8 = vpop.f32.mrf.mxu0  ;;  %v2433_v48 = vpop.f32.mrf.mxu1  ;;  %v2772_v15 = vadd.f32 %v2771_v57, %v2559_v29  ;;  %v2814_v46 = vadd.f32 %v2813_v17, %v2561_v4 }
 0x31f   : > { %v2321_v2 = vadd.f32 %v2320_v8, %v5672_v25  ;;  %v2434_v52 = vadd.f32 %v2433_v48, %v5817_v62  ;;  %v2569_v24 = vmax.f32 %v2317_v23, 0.0  ;;  %v2571_v40 = vmax.f32 %v2430_v26, 0.0 }
 0x320   : > { %v2322_v59 = vpop.f32.mrf.mxu0  ;;  %v2435_v33 = vpop.f32.mrf.mxu1  ;;  %v2752_v11 = vadd.f32 %v2751_v53, %v2568_v35  ;;  %v2794_v39 = vadd.f32 %v2793_v63, %v2570_v22 }
 0x321   : > { %v2323_v28 = vadd.f32 %v2322_v59, %v5680_v9  ;;  %v2436_v51 = vadd.f32 %v2435_v33, %v5830_v30  ;;  %v2578_v20 = vmax.f32 %v2321_v2, 0.0  ;;  %v2580_v0 = vmax.f32 %v2434_v52, 0.0 }
 0x322   : > { %v2324_v55 = vpop.f32.mrf.mxu0  ;;  %v2437_v58 = vpop.f32.mrf.mxu1  ;;  %v2773_v12 = vadd.f32 %v2772_v15, %v2569_v24  ;;  %v2815_v37 = vadd.f32 %v2814_v46, %v2571_v40 }
 0x323   : > { %v2325_v27 = vadd.f32 %v2324_v55, %v5672_v25  ;;  %v2438_v60 = vadd.f32 %v2437_v58, %v5817_v62  ;;  %v2579_v56 = vmax.f32 %v2323_v28, 0.0  ;;  %v2581_v54 = vmax.f32 %v2436_v51, 0.0 }
 0x324   : > { %v2326_v31 = vpop.f32.mrf.mxu0  ;;  %v2439_v38 = vpop.f32.mrf.mxu1  ;;  %v2753_v1 = vadd.f32 %v2752_v11, %v2578_v20  ;;  %v2795_v16 = vadd.f32 %v2794_v39, %v2580_v0 }
 0x325   : > { %v2327_v61 = vadd.f32 %v2326_v31, %v5680_v9  ;;  %v2440_v43 = vadd.f32 %v2439_v38, %v5830_v30  ;;  %v2588_v10 = vmax.f32 %v2325_v27, 0.0  ;;  %v2590_v45 = vmax.f32 %v2438_v60, 0.0 }
 0x326   : > { %v2330_v36 = vpop.f32.mrf.mxu0  ;;  %v2443_v7 = vpop.f32.mrf.mxu1  ;;  %v2774_v29 = vadd.f32 %v2773_v12, %v2579_v56  ;;  %v2816_v35 = vadd.f32 %v2815_v37, %v2581_v54 }
 0x327   : > { %v2331_v41 = vadd.f32 %v2330_v36, %v5672_v25  ;;  %v2444_v8 = vadd.f32 %v2443_v7, %v5817_v62  ;;  %v2589_v34 = vmax.f32 %v2327_v61, 0.0  ;;  %v2591_v5 = vmax.f32 %v2440_v43, 0.0 }
 0x328   : > { %v2332_v49 = vpop.f32.mrf.mxu0  ;;  %v2445_v18 = vpop.f32.mrf.mxu1  ;;  %v2754_v4 = vadd.f32 %v2753_v1, %v2588_v10  ;;  %v2796_v22 = vadd.f32 %v2795_v16, %v2590_v45 }
 0x329   : > { %v2598_v23 = vmax.f32 %v2331_v41, 0.0  ;;  %v2333_v48 = vadd.f32 %v2332_v49, %v5680_v9  ;;  %v2600_v26 = vmax.f32 %v2444_v8, 0.0  ;;  %v2446_v59 = vadd.f32 %v2445_v18, %v5830_v30 }
 0x32a   : > { %v2334_v57 = vpop.f32.mrf.mxu0  ;;  %v2447_v17 = vpop.f32.mrf.mxu1  ;;  %v2775_v24 = vadd.f32 %v2774_v29, %v2589_v34  ;;  %v2817_v40 = vadd.f32 %v2816_v35, %v2591_v5  ;;  %v2860_v29 = vrot.slane %v2838_v19, %v5666_v21 }
 0x32b   : > { %v2599_v2 = vmax.f32 %v2333_v48, 0.0  ;;  %v2335_v33 = vadd.f32 %v2334_v57, %v5672_v25  ;;  %v2601_v52 = vmax.f32 %v2446_v59, 0.0  ;;  %v2448_v55 = vadd.f32 %v2447_v17, %v5817_v62  ;;  %v2615_v17 = vld [vmem:[#allocation2 + $0x11] ss:$2 sm:$0x3] }
 0x32c   : > { %v2336_v53 = vpop.f32.mrf.mxu0  ;;  %v2755_v28 = vadd.f32 %v2754_v4, %v2598_v23  ;;  %v2449_v63 = vpop.f32.mrf.mxu1  ;;  %v2797_v51 = vadd.f32 %v2796_v22, %v2600_v26  ;;  %v2876_v22 = vrot.slane %v2868_v32, %v5666_v21 }
 0x32d   : > { %v2608_v27 = vmax.f32 %v2335_v33, 0.0  ;;  %v2337_v58 = vadd.f32 %v2336_v53, %v5680_v9  ;;  %v2610_v60 = vmax.f32 %v2448_v55, 0.0  ;;  %v2450_v31 = vadd.f32 %v2449_v63, %v5830_v30  ;;  %v2613_v55 = vld [vmem:[#allocation2 + $0x1] ss:$2 sm:$0xff] }
 0x32e   : > { %v2776_v15 = vadd.f32 %v2775_v24, %v2599_v2  ;;  %v2818_v20 = vadd.f32 %v2817_v40, %v2601_v52 }
 0x32f   : > { %v2756_v25 = vadd.f32 %v2755_v28, %v2608_v27  ;;  %v2609_v46 = vmax.f32 %v2337_v58, 0.0  ;;  %v2798_v61 = vadd.f32 %v2797_v51, %v2610_v60  ;;  %v2611_v38 = vmax.f32 %v2450_v31, 0.0 }
 0x331   : > { %v2757_v11 = vrot.slane %v2756_v25, 4  ;;  %v2777_v62 = vadd.f32 %v2776_v15, %v2609_v46  ;;  %v2799_v39 = vrot.slane %v2798_v61, 4  ;;  %v2819_v0 = vadd.f32 %v2818_v20, %v2611_v38 }
 0x333   : > { %v2758_v43 = vadd.f32 %v2757_v11, %v2756_v25  ;;  %v2778_v36 = vrot.slane %v2777_v62, 4  ;;  %v2800_v12 = vadd.f32 %v2799_v39, %v2798_v61  ;;  %v2820_v9 = vrot.slane %v2819_v0, 4 }
 0x335   : > { %v2759_v56 = vrot.slane %v2758_v43, 2  ;;  %v2779_v10 = vadd.f32 %v2778_v36, %v2777_v62  ;;  %v2801_v41 = vrot.slane %v2800_v12, 2  ;;  %v2821_v7 = vadd.f32 %v2820_v9, %v2819_v0 }
 0x337   : > { %v2760_v37 = vadd.f32 %v2759_v56, %v2758_v43  ;;  %v2780_v30 = vrot.slane %v2779_v10, 2  ;;  %v2802_v54 = vadd.f32 %v2801_v41, %v2800_v12  ;;  %v2822_v45 = vrot.slane %v2821_v7, 2 }
 0x339   : > { %v2761_v8 = vrot.slane %v2760_v37, 1  ;;  %v2781_v49 = vadd.f32 %v2780_v30, %v2779_v10  ;;  %v2803_v1 = vrot.slane %v2802_v54, 1  ;;  %v2823_v34 = vadd.f32 %v2822_v45, %v2821_v7 }
 0x33b   : > { %v2782_v23 = vrot.slane %v2781_v49, 1  ;;  %v2824_v48 = vrot.slane %v2823_v34, 1  ;;  %v2762_v18 = vadd.f32 %v2761_v8, %v2760_v37  ;;  %v2804_v5 = vadd.f32 %v2803_v1, %v2802_v54 }
 0x33d   : > { %v2783_v16 = vadd.f32 %v2782_v23, %v2781_v49  ;;  %v2825_v26 = vadd.f32 %v2824_v48, %v2823_v34 }
 0x33f   : > { %v2839_v59 = vcombine.low %v2762_v18, %v2783_v16  ;;  %v2885_v57 = vcombine.low %v2804_v5, %v2825_v26 }
 0x341   : > { %v2867_v4 = vrot.slane %v2839_v59, %v5666_v21  ;;  %v2892_v2 = vrot.slane %v2885_v57, %v5666_v21 }
 0x343   : > { %v2869_v33 = vcombine.low %v2860_v29, %v2867_v4  ;;  %v2899_v35 = vrot.slane %v2892_v2, %v5666_v21 }
 0x345   : > { %v2883_v52 = vrot.slane %v2869_v33, %v5666_v21  ;;  %v2903_v53 = vadd.f32 %v2899_v35, %v2615_v17 }
 0x347   : > { %v2884_v24 = vcombine.low %v2876_v22, %v2883_v52  ;;  %2905 = vst.msk [vmem:[#allocation2 + $0x11] ss:$2 sm:$0x3] %vm5927_vm2, %v2903_v53  ;;  %2909 = sbr.rel (%p4351_p8) target bundleno = 1773 (0x6ed), region = 158 }
 0x349   : > { %v2902_v13 = vadd.f32 %v2884_v24, %v2613_v55 }
 0x34b   : > { %2904 = vst [vmem:[#allocation2 + $0x1] ss:$2 sm:$0xff] %v2902_v13 }
 0x34c   : > { %v2917_v44 = vld [vmem:[#allocation10] sm:$0x3]  ;;  %v4999_v28 = vmov 0.0   ;;  %vm5000_vm3 = vmmov 0   ;;  %vm2925_vm4 = vcmask 15360   ;;  %v3009_v21 = vld [vmem:[#allocation13 + $0x30] sm:$0xff] }
 0x34d   : > { %v2916_v19 = vld [vmem:[#allocation4] sm:$0x3]  ;;  %4408 = vmatprep.subr.mxu0 %v4999_v28  ;;  %4410 = vmatprep.mubr.msk.f32.mxu0 %vm5000_vm3, %v4999_v28  ;;  %v3008_v3 = vld [vmem:[#allocation13 + $0x28] sm:$0xff]  ;;  %v3007_v42 = vld [vmem:[#allocation13 + $0x20] sm:$0xff]  ;;  %vm3018_vm5 = vcmask 523264   ;;  %vm4051_vm6 = vcmask 9216  }
 0x34e   : > { %v3010_v6 = vld [vmem:[#allocation13 + $0x38] sm:$0xff]  ;;  %4409 = vmatpush3.msk.msra.mxu0 %vm792_vm0, %v2917_v44  ;;  %4413 = vmatprep.subr.mxu1 %v4999_v28  ;;  %v3005_v27 = vld [vmem:[#allocation13 + $0x10] sm:$0xff]  ;;  %v3004_v58 = vld [vmem:[#allocation13 + $0x8] sm:$0xff] }
 0x34f   : > { %4411 = vmatmul.mubr.msk.f32.vlgmr.msra.gmra.mxu0 %vm2925_vm4, %v2916_v19  ;;  %4414 = vmatpush3.msra.mxu1 %v3010_v6  ;;  %v3006_v32 = vld [vmem:[#allocation13 + $0x18] sm:$0xff]  ;;  %v3003_v63 = vld [vmem:[#allocation13] sm:$0xff]  ;;  %v3442_v31 = vld [vmem:[#allocation18 + $0xe8] sm:$0xff] }
 0x350   : > { %4415 = vmatprep.subr.mxu1 %v4999_v28  ;;  %4429 = vmatprep.mubr.msk.f32.mxu1 %vm5000_vm3, %v4999_v28  ;;  %v3124_v40 = vld [vmem:[#allocation16 + $0xf8] sm:$0xff]  ;;  %v3443_v60 = vld [vmem:[#allocation18 + $0xf0] sm:$0xff]  ;;  %v3441_v15 = vld [vmem:[#allocation18 + $0xe0] sm:$0xff] }
 0x351   : > { %4416 = vmatpush3.msra.mxu1 %v3009_v21  ;;  %3509 = vmatprep.mubr.f32.mxu0 %v4999_v28  ;;  %v3444_v51 = vld [vmem:[#allocation18 + $0xf8] sm:$0xff]  ;;  %v3439_v46 = vld [vmem:[#allocation18 + $0xd0] sm:$0xff]  ;;  %v3438_v20 = vld [vmem:[#allocation18 + $0xc8] sm:$0xff] }
 0x352   : > { %4417 = vmatprep.subr.mxu1 %v4999_v28  ;;  %3445 = vmatprep.subr.mxu0 %v3444_v51  ;;  %v3440_v25 = vld [vmem:[#allocation18 + $0xd8] sm:$0xff]  ;;  %v3437_v61 = vld [vmem:[#allocation18 + $0xc0] sm:$0xff]  ;;  %v3435_v11 = vld [vmem:[#allocation18 + $0xb0] sm:$0xff] }
 0x353   : > { %4418 = vmatpush3.msra.mxu1 %v3008_v3  ;;  %3446 = vmatpush1.msra.mxu0 %v3443_v60  ;;  %v3436_v38 = vld [vmem:[#allocation18 + $0xb8] sm:$0xff]  ;;  %v3434_v62 = vld [vmem:[#allocation18 + $0xa8] sm:$0xff]  ;;  %v3433_v39 = vld [vmem:[#allocation18 + $0xa0] sm:$0xff] }
 0x354   : > { %4419 = vmatprep.subr.mxu1 %v4999_v28  ;;  %3447 = vmatprep.subr.mxu0 %v3442_v31  ;;  %v3432_v0 = vld [vmem:[#allocation18 + $0x98] sm:$0xff]  ;;  %v3431_v43 = vld [vmem:[#allocation18 + $0x90] sm:$0xff]  ;;  %v3430_v36 = vld [vmem:[#allocation18 + $0x88] sm:$0xff] }
 0x355   : > { %4420 = vmatpush3.msra.mxu1 %v3007_v42  ;;  %3448 = vmatpush1.msra.mxu0 %v3441_v15  ;;  %v3429_v12 = vld [vmem:[#allocation18 + $0x80] sm:$0xff]  ;;  %v3428_v9 = vld [vmem:[#allocation18 + $0x78] sm:$0xff]  ;;  %v3427_v56 = vld [vmem:[#allocation18 + $0x70] sm:$0xff] }
 0x356   : > { %4421 = vmatprep.subr.mxu1 %v4999_v28  ;;  %3449 = vmatprep.subr.mxu0 %v3440_v25  ;;  %v3426_v10 = vld [vmem:[#allocation18 + $0x68] sm:$0xff]  ;;  %v3425_v41 = vld [vmem:[#allocation18 + $0x60] sm:$0xff]  ;;  %v3424_v7 = vld [vmem:[#allocation18 + $0x58] sm:$0xff] }
 0x357   : > { %4422 = vmatpush3.msra.mxu1 %v3006_v32  ;;  %3450 = vmatpush1.msra.mxu0 %v3439_v46  ;;  %v3423_v37 = vld [vmem:[#allocation18 + $0x50] sm:$0xff]  ;;  %v3422_v30 = vld [vmem:[#allocation18 + $0x48] sm:$0xff]  ;;  %v3421_v54 = vld [vmem:[#allocation18 + $0x40] sm:$0xff] }
 0x358   : > { %4423 = vmatprep.subr.mxu1 %v4999_v28  ;;  %3451 = vmatprep.subr.mxu0 %v3438_v20  ;;  %v3420_v45 = vld [vmem:[#allocation18 + $0x38] sm:$0xff]  ;;  %v3419_v8 = vld [vmem:[#allocation18 + $0x30] sm:$0xff]  ;;  %v3418_v49 = vld [vmem:[#allocation18 + $0x28] sm:$0xff] }
 0x359   : > { %4424 = vmatpush3.msra.mxu1 %v3005_v27  ;;  %3452 = vmatpush1.msra.mxu0 %v3437_v61  ;;  %v3417_v1 = vld [vmem:[#allocation18 + $0x20] sm:$0xff]  ;;  %v4352_v34 = vld [vmem:[#allocation12] ss:$0 sm:$0xff]  ;;  %v3123_v5 = vld [vmem:[#allocation16 + $0xf0] sm:$0xff] }
 0x35a   : > { %4425 = vmatprep.subr.mxu1 %v4999_v28  ;;  %3453 = vmatprep.subr.mxu0 %v3436_v38  ;;  %v3122_v26 = vld [vmem:[#allocation16 + $0xe8] sm:$0xff]  ;;  %v3121_v59 = vld [vmem:[#allocation16 + $0xe0] sm:$0xff]  ;;  %v3120_v57 = vld [vmem:[#allocation16 + $0xd8] sm:$0xff] }
 0x35b   : > { %4426 = vmatpush3.msra.mxu1 %v3004_v58  ;;  %3454 = vmatpush1.msra.mxu0 %v3435_v11  ;;  %v3119_v29 = vld [vmem:[#allocation16 + $0xd0] sm:$0xff]  ;;  %v3118_v4 = vld [vmem:[#allocation16 + $0xc8] sm:$0xff]  ;;  %v3117_v2 = vld [vmem:[#allocation16 + $0xc0] sm:$0xff] }
 0x35c   : > { %4427 = vmatprep.subr.mxu1 %v4999_v28  ;;  %3455 = vmatprep.subr.mxu0 %v3434_v62  ;;  %v3116_v33 = vld [vmem:[#allocation16 + $0xb8] sm:$0xff]  ;;  %v3115_v17 = vld [vmem:[#allocation16 + $0xb0] sm:$0xff]  ;;  %v3114_v35 = vld [vmem:[#allocation16 + $0xa8] sm:$0xff] }
 0x35d   : > { %4428 = vmatpush3.msra.mxu1 %v3003_v63  ;;  %3456 = vmatpush1.msra.mxu0 %v3433_v39  ;;  %v3113_v22 = vld [vmem:[#allocation16 + $0xa0] sm:$0xff]  ;;  %v3112_v52 = vld [vmem:[#allocation16 + $0x98] sm:$0xff]  ;;  %v3111_v55 = vld [vmem:[#allocation16 + $0x90] sm:$0xff] }
 0x35e   : > { %3571 = vmatprep.subr.mxu1 %v3124_v40  ;;  %3457 = vmatprep.subr.mxu0 %v3432_v0  ;;  %v3110_v53 = vld [vmem:[#allocation16 + $0x88] sm:$0xff]  ;;  %v3109_v24 = vld [vmem:[#allocation16 + $0x80] sm:$0xff]  ;;  %v3108_v13 = vld [vmem:[#allocation16 + $0x78] sm:$0xff] }
 0x35f   : > { %3458 = vmatpush1.msra.mxu0 %v3431_v43  ;;  %v3107_v44 = vld [vmem:[#allocation16 + $0x70] sm:$0xff]  ;;  %v3106_v19 = vld [vmem:[#allocation16 + $0x68] sm:$0xff]  ;;  %v3105_v28 = vld [vmem:[#allocation16 + $0x60] sm:$0xff] }
 0x360   : > { %3459 = vmatprep.subr.mxu0 %v3430_v36  ;;  %v3104_v6 = vld [vmem:[#allocation16 + $0x58] sm:$0xff]  ;;  %v3103_v21 = vld [vmem:[#allocation16 + $0x50] sm:$0xff]  ;;  %v3102_v3 = vld [vmem:[#allocation16 + $0x48] sm:$0xff] }
 0x361   : > { %3460 = vmatpush1.msra.mxu0 %v3429_v12  ;;  %v3101_v42 = vld [vmem:[#allocation16 + $0x40] sm:$0xff]  ;;  %v3100_v32 = vld [vmem:[#allocation16 + $0x38] sm:$0xff]  ;;  %v3099_v27 = vld [vmem:[#allocation16 + $0x30] sm:$0xff] }
 0x362   : > { %3461 = vmatprep.subr.mxu0 %v3428_v9  ;;  %v3098_v58 = vld [vmem:[#allocation16 + $0x28] sm:$0xff]  ;;  %v3097_v63 = vld [vmem:[#allocation16 + $0x20] sm:$0xff]  ;;  %v3096_v40 = vld [vmem:[#allocation16 + $0x18] sm:$0xff] }
 0x363   : > { %3462 = vmatpush1.msra.mxu0 %v3427_v56  ;;  %v3095_v51 = vld [vmem:[#allocation16 + $0x10] sm:$0xff]  ;;  %v3094_v60 = vld [vmem:[#allocation16 + $0x8] sm:$0xff]  ;;  %v3093_v31 = vld [vmem:[#allocation16] sm:$0xff] }
 0x364   : > { %3463 = vmatprep.subr.mxu0 %v3426_v10  ;;  %v3156_v15 = vld [vmem:[#allocation16 + $0x1f8] sm:$0xff]  ;;  %v3155_v25 = vld [vmem:[#allocation16 + $0x1f0] sm:$0xff]  ;;  %v3154_v46 = vld [vmem:[#allocation16 + $0x1e8] sm:$0xff] }
 0x365   : > { %3464 = vmatpush1.msra.mxu0 %v3425_v41  ;;  %v3153_v20 = vld [vmem:[#allocation16 + $0x1e0] sm:$0xff]  ;;  %v3152_v61 = vld [vmem:[#allocation16 + $0x1d8] sm:$0xff]  ;;  %v3151_v38 = vld [vmem:[#allocation16 + $0x1d0] sm:$0xff] }
 0x366   : > { %3465 = vmatprep.subr.mxu0 %v3424_v7  ;;  %v3150_v11 = vld [vmem:[#allocation16 + $0x1c8] sm:$0xff]  ;;  %v3149_v62 = vld [vmem:[#allocation16 + $0x1c0] sm:$0xff]  ;;  %v3148_v39 = vld [vmem:[#allocation16 + $0x1b8] sm:$0xff] }
 0x367   : > { %3466 = vmatpush1.msra.mxu0 %v3423_v37  ;;  %v3147_v0 = vld [vmem:[#allocation16 + $0x1b0] sm:$0xff]  ;;  %v3146_v43 = vld [vmem:[#allocation16 + $0x1a8] sm:$0xff]  ;;  %v3145_v36 = vld [vmem:[#allocation16 + $0x1a0] sm:$0xff] }
 0x368   : > { %3467 = vmatprep.subr.mxu0 %v3422_v30  ;;  %v3144_v12 = vld [vmem:[#allocation16 + $0x198] sm:$0xff]  ;;  %v3143_v9 = vld [vmem:[#allocation16 + $0x190] sm:$0xff]  ;;  %v3142_v56 = vld [vmem:[#allocation16 + $0x188] sm:$0xff] }
 0x369   : > { %3468 = vmatpush1.msra.mxu0 %v3421_v54  ;;  %v3141_v10 = vld [vmem:[#allocation16 + $0x180] sm:$0xff]  ;;  %v3140_v41 = vld [vmem:[#allocation16 + $0x178] sm:$0xff]  ;;  %v3139_v7 = vld [vmem:[#allocation16 + $0x170] sm:$0xff] }
 0x36a   : > { %3469 = vmatprep.subr.mxu0 %v3420_v45  ;;  %v3138_v37 = vld [vmem:[#allocation16 + $0x168] sm:$0xff]  ;;  %v3137_v30 = vld [vmem:[#allocation16 + $0x160] sm:$0xff]  ;;  %v3136_v54 = vld [vmem:[#allocation16 + $0x158] sm:$0xff] }
 0x36b   : > { %3470 = vmatpush1.msra.mxu0 %v3419_v8  ;;  %v3135_v45 = vld [vmem:[#allocation16 + $0x150] sm:$0xff]  ;;  %v3134_v8 = vld [vmem:[#allocation16 + $0x148] sm:$0xff] }
 0x36c   : > { %3471 = vmatprep.subr.mxu0 %v3418_v49  ;;  %v3133_v49 = vld [vmem:[#allocation16 + $0x140] sm:$0xff] }
 0x36d   : > { %3472 = vmatpush1.msra.mxu0 %v3417_v1  ;;  %v3132_v1 = vld [vmem:[#allocation16 + $0x138] sm:$0xff] }
 0x40f   : > { %v2998_v23 = vpop.f32.mrf.mxu0 }
 0x410   : > { %v2999_v48 = vadd.f32 %v4352_v34, %v2998_v23  ;;  %v3131_v34 = vld [vmem:[#allocation16 + $0x130] sm:$0xff]  ;;  %v3130_v23 = vld [vmem:[#allocation16 + $0x128] sm:$0xff] }
 0x411   : > { %v4412_v18 = vpop.f32.mrf.mxu0 }
 0x412   : > { %v3002_v16 = vmax.f32 %v2999_v48, 0.0  ;;  %v3129_v48 = vld [vmem:[#allocation16 + $0x120] sm:$0xff] }
 0x413   : > { %v2910_v18 = vld [vmem:[#allocation2] sm:$0xff] }
 0x414   : > { %4430 = vmatmul.mubr.msk.f32.vlgmr.msra.gmra.mxu1 %vm3018_vm5, %v3002_v16  ;;  %v6079_v16 = vmul.f32 0.00390625, %v2910_v18  ;;  %v3268_v18 = vld [vmem:[#allocation16 + $0x578] sm:$0xff] }
 0x415   : > { %3572 = vmatpush1.msra.mxu1 %v3123_v5  ;;  %v3416_v5 = vld [vmem:[#allocation18 + $0x18] sm:$0xff] }
 0x416   : > { %3573 = vmatprep.subr.mxu1 %v3122_v26  ;;  %v3128_v26 = vld [vmem:[#allocation16 + $0x118] sm:$0xff]  ;;  %3473 = vmatprep.subr.mxu0 %v3416_v5  ;;  %v3267_v5 = vld [vmem:[#allocation16 + $0x570] sm:$0xff] }
 0x417   : > { %3574 = vmatpush1.msra.mxu1 %v3121_v59  ;;  %v3415_v59 = vld [vmem:[#allocation18 + $0x10] sm:$0xff] }
 0x418   : > { %3575 = vmatprep.subr.mxu1 %v3120_v57  ;;  %v3127_v57 = vld [vmem:[#allocation16 + $0x110] sm:$0xff]  ;;  %3474 = vmatpush1.msra.mxu0 %v3415_v59  ;;  %v3265_v59 = vld [vmem:[#allocation16 + $0x560] sm:$0xff] }
 0x419   : > { %3576 = vmatpush1.msra.mxu1 %v3119_v29  ;;  %v3526_v29 = vrot.slane %v6079_v16, %v5270_v14 }
 0x41a   : > { %3577 = vmatprep.subr.mxu1 %v3118_v4  ;;  %v3414_v4 = vld [vmem:[#allocation18 + $0x8] sm:$0xff] }
 0x41b   : > { %3578 = vmatpush1.msra.mxu1 %v3117_v2  ;;  %v3126_v2 = vld [vmem:[#allocation16 + $0x108] sm:$0xff]  ;;  %3475 = vmatprep.subr.mxu0 %v3414_v4 }
 0x41c   : > { %3579 = vmatprep.subr.mxu1 %v3116_v33  ;;  %v3413_v33 = vld [vmem:[#allocation18] sm:$0xff]  ;;  %v3262_v4 = vld [vmem:[#allocation16 + $0x548] sm:$0xff] }
 0x41d   : > { %3580 = vmatpush1.msra.mxu1 %v3115_v17  ;;  %v3125_v17 = vld [vmem:[#allocation16 + $0x100] sm:$0xff]  ;;  %3476 = vmatpush1.msra.mxu0 %v3413_v33  ;;  %v3260_v33 = vld [vmem:[#allocation16 + $0x538] sm:$0xff] }
 0x41e   : > { %3581 = vmatprep.subr.mxu1 %v3114_v35  ;;  %v3534_v35 = vcombine.high %v3526_v29, %v3526_v29 }
 0x41f   : > { %3582 = vmatpush1.msra.mxu1 %v3113_v22  ;;  %v3188_v22 = vld [vmem:[#allocation16 + $0x2f8] sm:$0xff] }
 0x420   : > { %3583 = vmatprep.subr.mxu1 %v3112_v52  ;;  %v3252_v52 = vld [vmem:[#allocation16 + $0x4f8] sm:$0xff]  ;;  %3635 = vmatprep.mubr.f32.mxu1 %v3534_v35  ;;  %v3258_v35 = vld [vmem:[#allocation16 + $0x528] sm:$0xff] }
 0x421   : > { %3584 = vmatpush1.msra.mxu1 %v3111_v55  ;;  %3642 = vmatprep.subr.mxu0 %v3188_v22  ;;  %v3251_v55 = vld [vmem:[#allocation16 + $0x4f0] sm:$0xff]  ;;  %v2911_v22 = vld [vmem:[#allocation2 + $0x8] sm:$0xff] }
 0x422   : > { %3585 = vmatprep.subr.mxu1 %v3110_v53  ;;  %v3250_v53 = vld [vmem:[#allocation16 + $0x4e8] sm:$0xff] }
 0x423   : > { %3586 = vmatpush1.msra.mxu1 %v3109_v24  ;;  %v3249_v24 = vld [vmem:[#allocation16 + $0x4e0] sm:$0xff] }
 0x424   : > { %3587 = vmatprep.subr.mxu1 %v3108_v13  ;;  %v3248_v13 = vld [vmem:[#allocation16 + $0x4d8] sm:$0xff] }
 0x425   : > { %3588 = vmatpush1.msra.mxu1 %v3107_v44  ;;  %v3247_v44 = vld [vmem:[#allocation16 + $0x4d0] sm:$0xff] }
 0x426   : > { %3589 = vmatprep.subr.mxu1 %v3106_v19  ;;  %v3246_v19 = vld [vmem:[#allocation16 + $0x4c8] sm:$0xff] }
 0x427   : > { %3590 = vmatpush1.msra.mxu1 %v3105_v28  ;;  %v3245_v28 = vld [vmem:[#allocation16 + $0x4c0] sm:$0xff] }
 0x428   : > { %3591 = vmatprep.subr.mxu1 %v3104_v6  ;;  %v3244_v6 = vld [vmem:[#allocation16 + $0x4b8] sm:$0xff] }
 0x429   : > { %3592 = vmatpush1.msra.mxu1 %v3103_v21  ;;  %v3243_v21 = vld [vmem:[#allocation16 + $0x4b0] sm:$0xff] }
 0x42a   : > { %3593 = vmatprep.subr.mxu1 %v3102_v3  ;;  %v3242_v3 = vld [vmem:[#allocation16 + $0x4a8] sm:$0xff] }
 0x42b   : > { %3594 = vmatpush1.msra.mxu1 %v3101_v42  ;;  %v3241_v42 = vld [vmem:[#allocation16 + $0x4a0] sm:$0xff] }
 0x42c   : > { %3595 = vmatprep.subr.mxu1 %v3100_v32  ;;  %v3240_v32 = vld [vmem:[#allocation16 + $0x498] sm:$0xff] }
 0x42d   : > { %3596 = vmatpush1.msra.mxu1 %v3099_v27  ;;  %v3239_v27 = vld [vmem:[#allocation16 + $0x490] sm:$0xff] }
 0x42e   : > { %3597 = vmatprep.subr.mxu1 %v3098_v58  ;;  %v3238_v58 = vld [vmem:[#allocation16 + $0x488] sm:$0xff] }
 0x42f   : > { %3598 = vmatpush1.msra.mxu1 %v3097_v63  ;;  %v3237_v63 = vld [vmem:[#allocation16 + $0x480] sm:$0xff] }
 0x430   : > { %3599 = vmatprep.subr.mxu1 %v3096_v40  ;;  %v3236_v40 = vld [vmem:[#allocation16 + $0x478] sm:$0xff] }
 0x431   : > { %3600 = vmatpush1.msra.mxu1 %v3095_v51  ;;  %v3235_v51 = vld [vmem:[#allocation16 + $0x470] sm:$0xff] }
 0x432   : > { %3601 = vmatprep.subr.mxu1 %v3094_v60  ;;  %v3234_v60 = vld [vmem:[#allocation16 + $0x468] sm:$0xff] }
 0x433   : > { %3602 = vmatpush1.msra.mxu1 %v3093_v31  ;;  %v3233_v31 = vld [vmem:[#allocation16 + $0x460] sm:$0xff] }
 0x434   : > { %3603 = vmatprep.subr.mxu1 %v3156_v15  ;;  %v3232_v15 = vld [vmem:[#allocation16 + $0x458] sm:$0xff] }
 0x435   : > { %3604 = vmatpush2.msra.mxu1 %v3155_v25  ;;  %v3231_v25 = vld [vmem:[#allocation16 + $0x450] sm:$0xff] }
 0x436   : > { %3605 = vmatprep.subr.mxu1 %v3154_v46  ;;  %v3230_v46 = vld [vmem:[#allocation16 + $0x448] sm:$0xff] }
 0x437   : > { %3606 = vmatpush2.msra.mxu1 %v3153_v20  ;;  %v3229_v20 = vld [vmem:[#allocation16 + $0x440] sm:$0xff] }
 0x438   : > { %3607 = vmatprep.subr.mxu1 %v3152_v61  ;;  %v3228_v61 = vld [vmem:[#allocation16 + $0x438] sm:$0xff] }
 0x439   : > { %3608 = vmatpush2.msra.mxu1 %v3151_v38  ;;  %v3227_v38 = vld [vmem:[#allocation16 + $0x430] sm:$0xff] }
 0x43a   : > { %3609 = vmatprep.subr.mxu1 %v3150_v11  ;;  %v3226_v11 = vld [vmem:[#allocation16 + $0x428] sm:$0xff] }
 0x43b   : > { %3610 = vmatpush2.msra.mxu1 %v3149_v62  ;;  %v3225_v62 = vld [vmem:[#allocation16 + $0x420] sm:$0xff] }
 0x43c   : > { %3611 = vmatprep.subr.mxu1 %v3148_v39  ;;  %v3224_v39 = vld [vmem:[#allocation16 + $0x418] sm:$0xff] }
 0x43d   : > { %3612 = vmatpush2.msra.mxu1 %v3147_v0  ;;  %v3223_v0 = vld [vmem:[#allocation16 + $0x410] sm:$0xff] }
 0x43e   : > { %3613 = vmatprep.subr.mxu1 %v3146_v43  ;;  %v3222_v43 = vld [vmem:[#allocation16 + $0x408] sm:$0xff] }
 0x43f   : > { %3614 = vmatpush2.msra.mxu1 %v3145_v36  ;;  %v3221_v36 = vld [vmem:[#allocation16 + $0x400] sm:$0xff] }
 0x440   : > { %3615 = vmatprep.subr.mxu1 %v3144_v12  ;;  %v3284_v12 = vld [vmem:[#allocation16 + $0x5f8] sm:$0xff] }
 0x441   : > { %3616 = vmatpush2.msra.mxu1 %v3143_v9  ;;  %v3283_v9 = vld [vmem:[#allocation16 + $0x5f0] sm:$0xff] }
 0x442   : > { %3617 = vmatprep.subr.mxu1 %v3142_v56  ;;  %v3282_v56 = vld [vmem:[#allocation16 + $0x5e8] sm:$0xff] }
 0x443   : > { %3618 = vmatpush2.msra.mxu1 %v3141_v10  ;;  %v3281_v10 = vld [vmem:[#allocation16 + $0x5e0] sm:$0xff] }
 0x444   : > { %3619 = vmatprep.subr.mxu1 %v3140_v41  ;;  %v3280_v41 = vld [vmem:[#allocation16 + $0x5d8] sm:$0xff] }
 0x445   : > { %3620 = vmatpush2.msra.mxu1 %v3139_v7  ;;  %v3279_v7 = vld [vmem:[#allocation16 + $0x5d0] sm:$0xff] }
 0x446   : > { %3621 = vmatprep.subr.mxu1 %v3138_v37  ;;  %v3278_v37 = vld [vmem:[#allocation16 + $0x5c8] sm:$0xff] }
 0x447   : > { %3622 = vmatpush2.msra.mxu1 %v3137_v30  ;;  %v3277_v30 = vld [vmem:[#allocation16 + $0x5c0] sm:$0xff] }
 0x448   : > { %3623 = vmatprep.subr.mxu1 %v3136_v54  ;;  %v3276_v54 = vld [vmem:[#allocation16 + $0x5b8] sm:$0xff] }
 0x449   : > { %3624 = vmatpush2.msra.mxu1 %v3135_v45  ;;  %v3275_v45 = vld [vmem:[#allocation16 + $0x5b0] sm:$0xff] }
 0x44a   : > { %3625 = vmatprep.subr.mxu1 %v3134_v8  ;;  %v3274_v8 = vld [vmem:[#allocation16 + $0x5a8] sm:$0xff] }
 0x44b   : > { %3626 = vmatpush2.msra.mxu1 %v3133_v49  ;;  %v3273_v49 = vld [vmem:[#allocation16 + $0x5a0] sm:$0xff] }
 0x44c   : > { %3627 = vmatprep.subr.mxu1 %v3132_v1  ;;  %v3272_v1 = vld [vmem:[#allocation16 + $0x598] sm:$0xff] }
 0x44d   : > { %3628 = vmatpush2.msra.mxu1 %v3131_v34  ;;  %v3271_v34 = vld [vmem:[#allocation16 + $0x590] sm:$0xff] }
 0x44e   : > { %3629 = vmatprep.subr.mxu1 %v3130_v23  ;;  %v3270_v23 = vld [vmem:[#allocation16 + $0x588] sm:$0xff] }
 0x44f   : > { %3630 = vmatpush2.msra.mxu1 %v3129_v48  ;;  %v3269_v48 = vld [vmem:[#allocation16 + $0x580] sm:$0xff] }
 0x450   : > { %3631 = vmatprep.subr.mxu1 %v3128_v26  ;;  %v3266_v26 = vld [vmem:[#allocation16 + $0x568] sm:$0xff] }
 0x451   : > { %3632 = vmatpush2.msra.mxu1 %v3127_v57  ;;  %v3264_v57 = vld [vmem:[#allocation16 + $0x558] sm:$0xff] }
 0x452   : > { %3633 = vmatprep.subr.mxu1 %v3126_v2  ;;  %v3261_v2 = vld [vmem:[#allocation16 + $0x540] sm:$0xff] }
 0x453   : > { %3634 = vmatpush2.msra.mxu1 %v3125_v17  ;;  %v3259_v17 = vld [vmem:[#allocation16 + $0x530] sm:$0xff] }
 0x454   : > { %3713 = vmatprep.subr.mxu1 %v3252_v52  ;;  %3636 = vmatmul.mubr.f32.vlgmr.msra.gmra.mxu1 %v3526_v29  ;;  %v3263_v29 = vld [vmem:[#allocation16 + $0x550] sm:$0xff]  ;;  %v3257_v52 = vld [vmem:[#allocation16 + $0x520] sm:$0xff] }
 0x455   : > { %3714 = vmatpush1.msra.mxu1 %v3251_v55  ;;  %v6083_v55 = vmul.f32 0.00390625, %v2911_v22  ;;  %v3393_v22 = vld [vmem:[#allocation16 + $0x960] sm:$0xff] }
 0x456   : > { %3715 = vmatprep.subr.mxu1 %v3250_v53  ;;  %v3256_v53 = vld [vmem:[#allocation16 + $0x518] sm:$0xff] }
 0x457   : > { %3716 = vmatpush1.msra.mxu1 %v3249_v24  ;;  %v3255_v24 = vld [vmem:[#allocation16 + $0x510] sm:$0xff] }
 0x458   : > { %3717 = vmatprep.subr.mxu1 %v3248_v13  ;;  %v3543_v13 = vrot.slane %v6083_v55, %v5270_v14 }
 0x459   : > { %3718 = vmatpush1.msra.mxu1 %v3247_v44  ;;  %v3254_v44 = vld [vmem:[#allocation16 + $0x508] sm:$0xff] }
 0x45a   : > { %3719 = vmatprep.subr.mxu1 %v3246_v19  ;;  %v3253_v19 = vld [vmem:[#allocation16 + $0x500] sm:$0xff] }
 0x45b   : > { %3720 = vmatpush1.msra.mxu1 %v3245_v28  ;;  %v3551_v28 = vcombine.high %v3543_v13, %v3543_v13 }
 0x45c   : > { %3721 = vmatprep.subr.mxu1 %v3244_v6  ;;  %v3380_v6 = vld [vmem:[#allocation16 + $0x8f8] sm:$0xff] }
 0x45d   : > { %3722 = vmatpush1.msra.mxu1 %v3243_v21  ;;  %3777 = vmatprep.mubr.f32.mxu1 %v3551_v28  ;;  %v3379_v21 = vld [vmem:[#allocation16 + $0x8f0] sm:$0xff] }
 0x45e   : > { %3723 = vmatprep.subr.mxu1 %v3242_v3  ;;  %v3378_v3 = vld [vmem:[#allocation16 + $0x8e8] sm:$0xff]  ;;  %v3387_v28 = vld [vmem:[#allocation16 + $0x930] sm:$0xff] }
 0x45f   : > { %3724 = vmatpush1.msra.mxu1 %v3241_v42  ;;  %v3377_v42 = vld [vmem:[#allocation16 + $0x8e0] sm:$0xff] }
 0x460   : > { %3725 = vmatprep.subr.mxu1 %v3240_v32  ;;  %v3376_v32 = vld [vmem:[#allocation16 + $0x8d8] sm:$0xff] }
 0x461   : > { %3726 = vmatpush1.msra.mxu1 %v3239_v27  ;;  %v3375_v27 = vld [vmem:[#allocation16 + $0x8d0] sm:$0xff] }
 0x462   : > { %3727 = vmatprep.subr.mxu1 %v3238_v58  ;;  %v3374_v58 = vld [vmem:[#allocation16 + $0x8c8] sm:$0xff] }
 0x463   : > { %3728 = vmatpush1.msra.mxu1 %v3237_v63  ;;  %v3373_v63 = vld [vmem:[#allocation16 + $0x8c0] sm:$0xff] }
 0x464   : > { %3729 = vmatprep.subr.mxu1 %v3236_v40  ;;  %v3372_v40 = vld [vmem:[#allocation16 + $0x8b8] sm:$0xff] }
 0x465   : > { %3730 = vmatpush1.msra.mxu1 %v3235_v51  ;;  %v3371_v51 = vld [vmem:[#allocation16 + $0x8b0] sm:$0xff] }
 0x466   : > { %3731 = vmatprep.subr.mxu1 %v3234_v60  ;;  %v3370_v60 = vld [vmem:[#allocation16 + $0x8a8] sm:$0xff] }
 0x467   : > { %3732 = vmatpush1.msra.mxu1 %v3233_v31  ;;  %v3369_v31 = vld [vmem:[#allocation16 + $0x8a0] sm:$0xff] }
 0x468   : > { %3733 = vmatprep.subr.mxu1 %v3232_v15  ;;  %v3368_v15 = vld [vmem:[#allocation16 + $0x898] sm:$0xff] }
 0x469   : > { %3734 = vmatpush1.msra.mxu1 %v3231_v25  ;;  %v3367_v25 = vld [vmem:[#allocation16 + $0x890] sm:$0xff] }
 0x46a   : > { %3735 = vmatprep.subr.mxu1 %v3230_v46  ;;  %v3366_v46 = vld [vmem:[#allocation16 + $0x888] sm:$0xff] }
 0x46b   : > { %3736 = vmatpush1.msra.mxu1 %v3229_v20  ;;  %v3365_v20 = vld [vmem:[#allocation16 + $0x880] sm:$0xff] }
 0x46c   : > { %3737 = vmatprep.subr.mxu1 %v3228_v61  ;;  %v3364_v61 = vld [vmem:[#allocation16 + $0x878] sm:$0xff] }
 0x46d   : > { %3738 = vmatpush1.msra.mxu1 %v3227_v38  ;;  %v3363_v38 = vld [vmem:[#allocation16 + $0x870] sm:$0xff] }
 0x46e   : > { %3739 = vmatprep.subr.mxu1 %v3226_v11  ;;  %v3362_v11 = vld [vmem:[#allocation16 + $0x868] sm:$0xff] }
 0x46f   : > { %3740 = vmatpush1.msra.mxu1 %v3225_v62  ;;  %v3361_v62 = vld [vmem:[#allocation16 + $0x860] sm:$0xff] }
 0x470   : > { %3741 = vmatprep.subr.mxu1 %v3224_v39  ;;  %v3360_v39 = vld [vmem:[#allocation16 + $0x858] sm:$0xff] }
 0x471   : > { %3742 = vmatpush1.msra.mxu1 %v3223_v0  ;;  %v3359_v0 = vld [vmem:[#allocation16 + $0x850] sm:$0xff] }
 0x472   : > { %3743 = vmatprep.subr.mxu1 %v3222_v43  ;;  %v3358_v43 = vld [vmem:[#allocation16 + $0x848] sm:$0xff] }
 0x473   : > { %3744 = vmatpush1.msra.mxu1 %v3221_v36  ;;  %v3357_v36 = vld [vmem:[#allocation16 + $0x840] sm:$0xff] }
 0x474   : > { %3745 = vmatprep.subr.mxu1 %v3284_v12  ;;  %v3356_v12 = vld [vmem:[#allocation16 + $0x838] sm:$0xff] }
 0x475   : > { %3746 = vmatpush2.msra.mxu1 %v3283_v9  ;;  %v3355_v9 = vld [vmem:[#allocation16 + $0x830] sm:$0xff] }
 0x476   : > { %3747 = vmatprep.subr.mxu1 %v3282_v56  ;;  %v3354_v56 = vld [vmem:[#allocation16 + $0x828] sm:$0xff] }
 0x477   : > { %3748 = vmatpush2.msra.mxu1 %v3281_v10  ;;  %v3353_v10 = vld [vmem:[#allocation16 + $0x820] sm:$0xff] }
 0x478   : > { %3749 = vmatprep.subr.mxu1 %v3280_v41  ;;  %v3352_v41 = vld [vmem:[#allocation16 + $0x818] sm:$0xff] }
 0x479   : > { %3750 = vmatpush2.msra.mxu1 %v3279_v7  ;;  %v3351_v7 = vld [vmem:[#allocation16 + $0x810] sm:$0xff] }
 0x47a   : > { %3751 = vmatprep.subr.mxu1 %v3278_v37  ;;  %v3350_v37 = vld [vmem:[#allocation16 + $0x808] sm:$0xff] }
 0x47b   : > { %3752 = vmatpush2.msra.mxu1 %v3277_v30  ;;  %v3349_v30 = vld [vmem:[#allocation16 + $0x800] sm:$0xff] }
 0x47c   : > { %3753 = vmatprep.subr.mxu1 %v3276_v54  ;;  %v3412_v54 = vld [vmem:[#allocation16 + $0x9f8] sm:$0xff] }
 0x47d   : > { %3754 = vmatpush2.msra.mxu1 %v3275_v45  ;;  %v3411_v45 = vld [vmem:[#allocation16 + $0x9f0] sm:$0xff] }
 0x47e   : > { %3755 = vmatprep.subr.mxu1 %v3274_v8  ;;  %v3410_v8 = vld [vmem:[#allocation16 + $0x9e8] sm:$0xff] }
 0x47f   : > { %3756 = vmatpush2.msra.mxu1 %v3273_v49  ;;  %v3409_v49 = vld [vmem:[#allocation16 + $0x9e0] sm:$0xff] }
 0x480   : > { %3757 = vmatprep.subr.mxu1 %v3272_v1  ;;  %v3408_v1 = vld [vmem:[#allocation16 + $0x9d8] sm:$0xff] }
 0x481   : > { %3758 = vmatpush2.msra.mxu1 %v3271_v34  ;;  %v3407_v34 = vld [vmem:[#allocation16 + $0x9d0] sm:$0xff] }
 0x482   : > { %3759 = vmatprep.subr.mxu1 %v3270_v23  ;;  %v3406_v23 = vld [vmem:[#allocation16 + $0x9c8] sm:$0xff] }
 0x483   : > { %3760 = vmatpush2.msra.mxu1 %v3269_v48  ;;  %v3405_v48 = vld [vmem:[#allocation16 + $0x9c0] sm:$0xff] }
 0x484   : > { %3761 = vmatprep.subr.mxu1 %v3268_v18  ;;  %v3404_v18 = vld [vmem:[#allocation16 + $0x9b8] sm:$0xff] }
 0x485   : > { %3762 = vmatpush2.msra.mxu1 %v3267_v5  ;;  %v3403_v5 = vld [vmem:[#allocation16 + $0x9b0] sm:$0xff] }
 0x486   : > { %3763 = vmatprep.subr.mxu1 %v3266_v26  ;;  %v3402_v26 = vld [vmem:[#allocation16 + $0x9a8] sm:$0xff] }
 0x487   : > { %3764 = vmatpush2.msra.mxu1 %v3265_v59  ;;  %v3401_v59 = vld [vmem:[#allocation16 + $0x9a0] sm:$0xff] }
 0x488   : > { %3765 = vmatprep.subr.mxu1 %v3264_v57  ;;  %v3400_v57 = vld [vmem:[#allocation16 + $0x998] sm:$0xff] }
 0x489   : > { %3766 = vmatpush2.msra.mxu1 %v3263_v29  ;;  %v3399_v29 = vld [vmem:[#allocation16 + $0x990] sm:$0xff] }
 0x48a   : > { %3767 = vmatprep.subr.mxu1 %v3262_v4  ;;  %v3398_v4 = vld [vmem:[#allocation16 + $0x988] sm:$0xff] }
 0x48b   : > { %3768 = vmatpush2.msra.mxu1 %v3261_v2  ;;  %v3397_v2 = vld [vmem:[#allocation16 + $0x980] sm:$0xff] }
 0x48c   : > { %3769 = vmatprep.subr.mxu1 %v3260_v33  ;;  %v3396_v33 = vld [vmem:[#allocation16 + $0x978] sm:$0xff] }
 0x48d   : > { %3770 = vmatpush2.msra.mxu1 %v3259_v17  ;;  %v3395_v17 = vld [vmem:[#allocation16 + $0x970] sm:$0xff] }
 0x48e   : > { %3771 = vmatprep.subr.mxu1 %v3258_v35  ;;  %v3394_v35 = vld [vmem:[#allocation16 + $0x968] sm:$0xff] }
 0x48f   : > { %3772 = vmatpush2.msra.mxu1 %v3257_v52  ;;  %v3392_v52 = vld [vmem:[#allocation16 + $0x958] sm:$0xff] }
 0x490   : > { %3773 = vmatprep.subr.mxu1 %v3256_v53  ;;  %v3391_v53 = vld [vmem:[#allocation16 + $0x950] sm:$0xff] }
 0x491   : > { %3774 = vmatpush2.msra.mxu1 %v3255_v24  ;;  %v3519_v24 = vcombine.high %v6079_v16, %v6079_v16  ;;  %v3384_v16 = vld [vmem:[#allocation16 + $0x918] sm:$0xff] }
 0x492   : > { %3775 = vmatprep.subr.mxu1 %v3254_v44  ;;  %v3389_v44 = vld [vmem:[#allocation16 + $0x940] sm:$0xff] }
 0x493   : > { %3776 = vmatpush2.msra.mxu1 %v3253_v19  ;;  %v3388_v19 = vld [vmem:[#allocation16 + $0x938] sm:$0xff] }
 0x494   : > { %3855 = vmatprep.subr.mxu1 %v3380_v6  ;;  %3778 = vmatmul.mubr.f32.vlgmr.msra.gmra.mxu1 %v3543_v13  ;;  %v3390_v13 = vld [vmem:[#allocation16 + $0x948] sm:$0xff] }
 0x495   : > { %3856 = vmatpush1.msra.mxu1 %v3379_v21  ;;  %v2912_v6 = vld [vmem:[#allocation2 + $0x10] sm:$0xf]  ;;  %v4355_v21 = vld [vmem:[#allocation15] ss:$0 sm:$0xff] }
 0x496   : > { %3857 = vmatprep.subr.mxu1 %v3378_v3  ;;  %v6090_v3 = vrot.slane %v3519_v24, %v5270_v14  ;;  %v3213_v24 = vld [vmem:[#allocation16 + $0x3c0] sm:$0xff] }
 0x497   : > { %3858 = vmatpush1.msra.mxu1 %v3377_v42  ;;  %v3386_v42 = vld [vmem:[#allocation16 + $0x928] sm:$0xff] }
 0x498   : > { %3859 = vmatprep.subr.mxu1 %v3376_v32  ;;  %v2915_v32 = vmul.f32 0.00390625, %v2912_v6  ;;  %v3208_v6 = vld [vmem:[#allocation16 + $0x398] sm:$0xff] }
 0x499   : > { %3860 = vmatpush1.msra.mxu1 %v3375_v27  ;;  %v3385_v27 = vld [vmem:[#allocation16 + $0x920] sm:$0xff] }
 0x49a   : > { %3861 = vmatprep.subr.mxu1 %v3374_v58 }
 0x49b   : > { %3862 = vmatpush1.msra.mxu1 %v3373_v63  ;;  %v3559_v63 = vrot.slane %v2915_v32, %v5270_v14  ;;  %v3205_v32 = vld [vmem:[#allocation16 + $0x380] sm:$0xff] }
 0x49c   : > { %3863 = vmatprep.subr.mxu1 %v3372_v40 }
 0x49d   : > { %3864 = vmatpush1.msra.mxu1 %v3371_v51  ;;  %v3383_v51 = vld [vmem:[#allocation16 + $0x910] sm:$0xff] }
 0x49e   : > { %3865 = vmatprep.subr.mxu1 %v3370_v60 }
 0x49f   : > { %3866 = vmatpush1.msra.mxu1 %v3369_v31  ;;  %v3535_v31 = vcombine.high %v6090_v3, %v6090_v3 }
 0x4a0   : > { %3867 = vmatprep.subr.mxu1 %v3368_v15  ;;  %v3382_v15 = vld [vmem:[#allocation16 + $0x908] sm:$0xff] }
 0x4a1   : > { %3868 = vmatpush1.msra.mxu1 %v3367_v25  ;;  %v3560_v25 = vcombine.high %v3559_v63, %v3559_v63 }
 0x4a2   : > { %3869 = vmatprep.subr.mxu1 %v3366_v46 }
 0x4a3   : > { %3870 = vmatpush1.msra.mxu1 %v3365_v20  ;;  %v3187_v20 = vld [vmem:[#allocation16 + $0x2f0] sm:$0xff]  ;;  %3919 = vmatprep.mubr.f32.mxu1 %v3560_v25  ;;  %v3536_v25 = vcombine.high %v6083_v55, %v6083_v55 }
 0x4a4   : > { %3871 = vmatprep.subr.mxu1 %v3364_v61  ;;  %v3381_v61 = vld [vmem:[#allocation16 + $0x900] sm:$0xff] }
 0x4a5   : > { %3872 = vmatpush1.msra.mxu1 %v3363_v38  ;;  %v3186_v38 = vld [vmem:[#allocation16 + $0x2e8] sm:$0xff] }
 0x4a6   : > { %3873 = vmatprep.subr.mxu1 %v3362_v11  ;;  %v3185_v11 = vld [vmem:[#allocation16 + $0x2e0] sm:$0xff] }
 0x4a7   : > { %3874 = vmatpush1.msra.mxu1 %v3361_v62  ;;  %v3184_v62 = vld [vmem:[#allocation16 + $0x2d8] sm:$0xff] }
 0x4a8   : > { %3875 = vmatprep.subr.mxu1 %v3360_v39  ;;  %v3183_v39 = vld [vmem:[#allocation16 + $0x2d0] sm:$0xff] }
 0x4a9   : > { %3876 = vmatpush1.msra.mxu1 %v3359_v0  ;;  %v3182_v0 = vld [vmem:[#allocation16 + $0x2c8] sm:$0xff] }
 0x4aa   : > { %3877 = vmatprep.subr.mxu1 %v3358_v43  ;;  %v3181_v43 = vld [vmem:[#allocation16 + $0x2c0] sm:$0xff] }
 0x4ab   : > { %3878 = vmatpush1.msra.mxu1 %v3357_v36  ;;  %v3180_v36 = vld [vmem:[#allocation16 + $0x2b8] sm:$0xff] }
 0x4ac   : > { %3879 = vmatprep.subr.mxu1 %v3356_v12  ;;  %v3179_v12 = vld [vmem:[#allocation16 + $0x2b0] sm:$0xff] }
 0x4ad   : > { %3880 = vmatpush1.msra.mxu1 %v3355_v9  ;;  %v3178_v9 = vld [vmem:[#allocation16 + $0x2a8] sm:$0xff] }
 0x4ae   : > { %3881 = vmatprep.subr.mxu1 %v3354_v56  ;;  %v3177_v56 = vld [vmem:[#allocation16 + $0x2a0] sm:$0xff] }
 0x4af   : > { %3882 = vmatpush1.msra.mxu1 %v3353_v10  ;;  %v3176_v10 = vld [vmem:[#allocation16 + $0x298] sm:$0xff] }
 0x4b0   : > { %3883 = vmatprep.subr.mxu1 %v3352_v41  ;;  %v3175_v41 = vld [vmem:[#allocation16 + $0x290] sm:$0xff] }
 0x4b1   : > { %3884 = vmatpush1.msra.mxu1 %v3351_v7  ;;  %v3174_v7 = vld [vmem:[#allocation16 + $0x288] sm:$0xff] }
 0x4b2   : > { %3885 = vmatprep.subr.mxu1 %v3350_v37  ;;  %v3173_v37 = vld [vmem:[#allocation16 + $0x280] sm:$0xff] }
 0x4b3   : > { %3886 = vmatpush1.msra.mxu1 %v3349_v30  ;;  %v3172_v30 = vld [vmem:[#allocation16 + $0x278] sm:$0xff] }
 0x4b4   : > { %3887 = vmatprep.subr.mxu1 %v3412_v54  ;;  %v3171_v54 = vld [vmem:[#allocation16 + $0x270] sm:$0xff] }
 0x4b5   : > { %3888 = vmatpush2.msra.mxu1 %v3411_v45  ;;  %v3170_v45 = vld [vmem:[#allocation16 + $0x268] sm:$0xff] }
 0x4b6   : > { %3889 = vmatprep.subr.mxu1 %v3410_v8  ;;  %v3169_v8 = vld [vmem:[#allocation16 + $0x260] sm:$0xff] }
 0x4b7   : > { %3890 = vmatpush2.msra.mxu1 %v3409_v49  ;;  %v3168_v49 = vld [vmem:[#allocation16 + $0x258] sm:$0xff] }
 0x4b8   : > { %3891 = vmatprep.subr.mxu1 %v3408_v1  ;;  %v3167_v1 = vld [vmem:[#allocation16 + $0x250] sm:$0xff] }
 0x4b9   : > { %3892 = vmatpush2.msra.mxu1 %v3407_v34  ;;  %v3166_v34 = vld [vmem:[#allocation16 + $0x248] sm:$0xff] }
 0x4ba   : > { %3893 = vmatprep.subr.mxu1 %v3406_v23  ;;  %v3165_v23 = vld [vmem:[#allocation16 + $0x240] sm:$0xff] }
 0x4bb   : > { %3894 = vmatpush2.msra.mxu1 %v3405_v48  ;;  %v3164_v48 = vld [vmem:[#allocation16 + $0x238] sm:$0xff] }
 0x4bc   : > { %3895 = vmatprep.subr.mxu1 %v3404_v18  ;;  %v3163_v18 = vld [vmem:[#allocation16 + $0x230] sm:$0xff] }
 0x4bd   : > { %3896 = vmatpush2.msra.mxu1 %v3403_v5  ;;  %v3162_v5 = vld [vmem:[#allocation16 + $0x228] sm:$0xff] }
 0x4be   : > { %3897 = vmatprep.subr.mxu1 %v3402_v26  ;;  %v3161_v26 = vld [vmem:[#allocation16 + $0x220] sm:$0xff] }
 0x4bf   : > { %3898 = vmatpush2.msra.mxu1 %v3401_v59  ;;  %v3160_v59 = vld [vmem:[#allocation16 + $0x218] sm:$0xff] }
 0x4c0   : > { %3899 = vmatprep.subr.mxu1 %v3400_v57  ;;  %v3159_v57 = vld [vmem:[#allocation16 + $0x210] sm:$0xff] }
 0x4c1   : > { %3900 = vmatpush2.msra.mxu1 %v3399_v29  ;;  %v3158_v29 = vld [vmem:[#allocation16 + $0x208] sm:$0xff] }
 0x4c2   : > { %3901 = vmatprep.subr.mxu1 %v3398_v4  ;;  %v3157_v4 = vld [vmem:[#allocation16 + $0x200] sm:$0xff] }
 0x4c3   : > { %3902 = vmatpush2.msra.mxu1 %v3397_v2  ;;  %v3220_v2 = vld [vmem:[#allocation16 + $0x3f8] sm:$0xff] }
 0x4c4   : > { %3903 = vmatprep.subr.mxu1 %v3396_v33  ;;  %v3219_v33 = vld [vmem:[#allocation16 + $0x3f0] sm:$0xff] }
 0x4c5   : > { %3904 = vmatpush2.msra.mxu1 %v3395_v17  ;;  %v3218_v17 = vld [vmem:[#allocation16 + $0x3e8] sm:$0xff] }
 0x4c6   : > { %3905 = vmatprep.subr.mxu1 %v3394_v35  ;;  %v3217_v35 = vld [vmem:[#allocation16 + $0x3e0] sm:$0xff] }
 0x4c7   : > { %3906 = vmatpush2.msra.mxu1 %v3393_v22  ;;  %v3216_v22 = vld [vmem:[#allocation16 + $0x3d8] sm:$0xff] }
 0x4c8   : > { %3907 = vmatprep.subr.mxu1 %v3392_v52  ;;  %v3215_v52 = vld [vmem:[#allocation16 + $0x3d0] sm:$0xff] }
 0x4c9   : > { %3908 = vmatpush2.msra.mxu1 %v3391_v53  ;;  %v3214_v53 = vld [vmem:[#allocation16 + $0x3c8] sm:$0xff] }
 0x4ca   : > { %3909 = vmatprep.subr.mxu1 %v3390_v13  ;;  %v3212_v13 = vld [vmem:[#allocation16 + $0x3b8] sm:$0xff] }
 0x4cb   : > { %3910 = vmatpush2.msra.mxu1 %v3389_v44  ;;  %v3211_v44 = vld [vmem:[#allocation16 + $0x3b0] sm:$0xff] }
 0x4cc   : > { %3911 = vmatprep.subr.mxu1 %v3388_v19  ;;  %v3210_v19 = vld [vmem:[#allocation16 + $0x3a8] sm:$0xff] }
 0x4cd   : > { %3912 = vmatpush2.msra.mxu1 %v3387_v28  ;;  %v3209_v28 = vld [vmem:[#allocation16 + $0x3a0] sm:$0xff] }
 0x4ce   : > { %3913 = vmatprep.subr.mxu1 %v3386_v42  ;;  %v3206_v42 = vld [vmem:[#allocation16 + $0x388] sm:$0xff] }
 0x4cf   : > { %3914 = vmatpush2.msra.mxu1 %v3385_v27  ;;  %v3204_v27 = vld [vmem:[#allocation16 + $0x378] sm:$0xff] }
 0x4d0   : > { %3915 = vmatprep.subr.mxu1 %v3384_v16  ;;  %v3202_v16 = vld [vmem:[#allocation16 + $0x368] sm:$0xff] }
 0x4d1   : > { %3916 = vmatpush2.msra.mxu1 %v3383_v51  ;;  %v3199_v51 = vld [vmem:[#allocation16 + $0x350] sm:$0xff] }
 0x4d2   : > { %3917 = vmatprep.subr.mxu1 %v3382_v15  ;;  %v3196_v15 = vld [vmem:[#allocation16 + $0x338] sm:$0xff] }
 0x4d3   : > { %3918 = vmatpush2.msra.mxu1 %v3381_v61  ;;  %v3193_v61 = vld [vmem:[#allocation16 + $0x320] sm:$0xff] }
 0x4d4   : > { %v3088_v58 = vpop.f32.mrf.mxu1  ;;  %3920 = vmatmul.mubr.f32.vlgmr.msra.gmra.mxu1 %v3559_v63  ;;  %v3201_v63 = vld [vmem:[#allocation16 + $0x360] sm:$0xff] }
 0x4d5   : > { %v3089_v40 = vadd.f32 %v4355_v21, %v3088_v58  ;;  %v3207_v21 = vld [vmem:[#allocation16 + $0x390] sm:$0xff] }
 0x4d6   : > { %v4431_v60 = vpop.f32.mrf.mxu1  ;;  %v3203_v58 = vld [vmem:[#allocation16 + $0x370] sm:$0xff] }
 0x4d7   : > { %v3092_v46 = vmax.f32 %v3089_v40, 0.0  ;;  %v3200_v40 = vld [vmem:[#allocation16 + $0x358] sm:$0xff]  ;;  %v3198_v60 = vld [vmem:[#allocation16 + $0x348] sm:$0xff] }
 0x4d9   : > { %3510 = vmatmul.mubr.f32.vlgmr.msra.gmra.mxu0 %v3092_v46  ;;  %v3195_v46 = vld [vmem:[#allocation16 + $0x330] sm:$0xff] }
 0x4da   : > { %3643 = vmatpush1.msra.mxu0 %v3187_v20  ;;  %3706 = vmatprep.mubr.f32.mxu0 %v3535_v31  ;;  %v3197_v31 = vld [vmem:[#allocation16 + $0x340] sm:$0xff]  ;;  %v3194_v20 = vld [vmem:[#allocation16 + $0x328] sm:$0xff] }
 0x4db   : > { %3644 = vmatprep.subr.mxu0 %v3186_v38  ;;  %v3192_v38 = vld [vmem:[#allocation16 + $0x318] sm:$0xff] }
 0x4dc   : > { %3645 = vmatpush1.msra.mxu0 %v3185_v11  ;;  %v6098_v11 = vrot.slane %v3536_v25, %v5270_v14  ;;  %v3313_v14 = vld [vmem:[#allocation16 + $0x6e0] sm:$0xff]  ;;  %v3328_v25 = vld [vmem:[#allocation16 + $0x758] sm:$0xff] }
 0x4dd   : > { %3646 = vmatprep.subr.mxu0 %v3184_v62  ;;  %v3191_v62 = vld [vmem:[#allocation16 + $0x310] sm:$0xff] }
 0x4de   : > { %3647 = vmatpush1.msra.mxu0 %v3183_v39  ;;  %v3190_v39 = vld [vmem:[#allocation16 + $0x308] sm:$0xff]  ;;  %v3552_v55 = vcombine.high %v6098_v11, %v6098_v11 }
 0x4df   : > { %3648 = vmatprep.subr.mxu0 %v3182_v0  ;;  %v3189_v0 = vld [vmem:[#allocation16 + $0x300] sm:$0xff] }
 0x4e0   : > { %3649 = vmatpush1.msra.mxu0 %v3181_v43  ;;  %v3316_v43 = vld [vmem:[#allocation16 + $0x6f8] sm:$0xff] }
 0x4e1   : > { %3650 = vmatprep.subr.mxu0 %v3180_v36  ;;  %v3315_v36 = vld [vmem:[#allocation16 + $0x6f0] sm:$0xff] }
 0x4e2   : > { %3651 = vmatpush1.msra.mxu0 %v3179_v12  ;;  %v3314_v12 = vld [vmem:[#allocation16 + $0x6e8] sm:$0xff] }
 0x4e3   : > { %3652 = vmatprep.subr.mxu0 %v3178_v9  ;;  %v3312_v9 = vld [vmem:[#allocation16 + $0x6d8] sm:$0xff] }
 0x4e4   : > { %3653 = vmatpush1.msra.mxu0 %v3177_v56  ;;  %v3311_v56 = vld [vmem:[#allocation16 + $0x6d0] sm:$0xff] }
 0x4e5   : > { %3654 = vmatprep.subr.mxu0 %v3176_v10  ;;  %v3310_v10 = vld [vmem:[#allocation16 + $0x6c8] sm:$0xff] }
 0x4e6   : > { %3655 = vmatpush1.msra.mxu0 %v3175_v41  ;;  %v3309_v41 = vld [vmem:[#allocation16 + $0x6c0] sm:$0xff] }
 0x4e7   : > { %3656 = vmatprep.subr.mxu0 %v3174_v7  ;;  %v3308_v7 = vld [vmem:[#allocation16 + $0x6b8] sm:$0xff] }
 0x4e8   : > { %3657 = vmatpush1.msra.mxu0 %v3173_v37  ;;  %v3307_v37 = vld [vmem:[#allocation16 + $0x6b0] sm:$0xff] }
 0x4e9   : > { %3658 = vmatprep.subr.mxu0 %v3172_v30  ;;  %v3306_v30 = vld [vmem:[#allocation16 + $0x6a8] sm:$0xff] }
 0x4ea   : > { %3659 = vmatpush1.msra.mxu0 %v3171_v54  ;;  %v3305_v54 = vld [vmem:[#allocation16 + $0x6a0] sm:$0xff] }
 0x4eb   : > { %3660 = vmatprep.subr.mxu0 %v3170_v45  ;;  %v3303_v45 = vld [vmem:[#allocation16 + $0x690] sm:$0xff] }
 0x4ec   : > { %3661 = vmatpush1.msra.mxu0 %v3169_v8  ;;  %v3302_v8 = vld [vmem:[#allocation16 + $0x688] sm:$0xff] }
 0x4ed   : > { %3662 = vmatprep.subr.mxu0 %v3168_v49  ;;  %v3301_v49 = vld [vmem:[#allocation16 + $0x680] sm:$0xff] }
 0x4ee   : > { %3663 = vmatpush1.msra.mxu0 %v3167_v1  ;;  %v3300_v1 = vld [vmem:[#allocation16 + $0x678] sm:$0xff] }
 0x4ef   : > { %3664 = vmatprep.subr.mxu0 %v3166_v34  ;;  %v3299_v34 = vld [vmem:[#allocation16 + $0x670] sm:$0xff] }
 0x4f0   : > { %3665 = vmatpush1.msra.mxu0 %v3165_v23  ;;  %v3298_v23 = vld [vmem:[#allocation16 + $0x668] sm:$0xff] }
 0x4f1   : > { %3666 = vmatprep.subr.mxu0 %v3164_v48  ;;  %v3297_v48 = vld [vmem:[#allocation16 + $0x660] sm:$0xff] }
 0x4f2   : > { %3667 = vmatpush1.msra.mxu0 %v3163_v18  ;;  %v3296_v18 = vld [vmem:[#allocation16 + $0x658] sm:$0xff] }
 0x4f3   : > { %3668 = vmatprep.subr.mxu0 %v3162_v5  ;;  %v3295_v5 = vld [vmem:[#allocation16 + $0x650] sm:$0xff] }
 0x4f4   : > { %3669 = vmatpush1.msra.mxu0 %v3161_v26  ;;  %v3294_v26 = vld [vmem:[#allocation16 + $0x648] sm:$0xff] }
 0x4f5   : > { %3670 = vmatprep.subr.mxu0 %v3160_v59  ;;  %v3293_v59 = vld [vmem:[#allocation16 + $0x640] sm:$0xff] }
 0x4f6   : > { %3671 = vmatpush1.msra.mxu0 %v3159_v57  ;;  %v3292_v57 = vld [vmem:[#allocation16 + $0x638] sm:$0xff] }
 0x4f7   : > { %3672 = vmatprep.subr.mxu0 %v3158_v29  ;;  %v3291_v29 = vld [vmem:[#allocation16 + $0x630] sm:$0xff] }
 0x4f8   : > { %3673 = vmatpush1.msra.mxu0 %v3157_v4  ;;  %v3290_v4 = vld [vmem:[#allocation16 + $0x628] sm:$0xff] }
 0x4f9   : > { %3674 = vmatprep.subr.mxu0 %v3220_v2  ;;  %v3289_v2 = vld [vmem:[#allocation16 + $0x620] sm:$0xff] }
 0x4fa   : > { %3675 = vmatpush2.msra.mxu0 %v3219_v33  ;;  %v3288_v33 = vld [vmem:[#allocation16 + $0x618] sm:$0xff] }
 0x4fb   : > { %3676 = vmatprep.subr.mxu0 %v3218_v17  ;;  %v3287_v17 = vld [vmem:[#allocation16 + $0x610] sm:$0xff] }
 0x4fc   : > { %3677 = vmatpush2.msra.mxu0 %v3217_v35  ;;  %v3286_v35 = vld [vmem:[#allocation16 + $0x608] sm:$0xff] }
 0x4fd   : > { %3678 = vmatprep.subr.mxu0 %v3216_v22  ;;  %v3285_v22 = vld [vmem:[#allocation16 + $0x600] sm:$0xff] }
 0x4fe   : > { %3679 = vmatpush2.msra.mxu0 %v3215_v52  ;;  %v3348_v52 = vld [vmem:[#allocation16 + $0x7f8] sm:$0xff] }
 0x4ff   : > { %3680 = vmatprep.subr.mxu0 %v3214_v53  ;;  %v3347_v53 = vld [vmem:[#allocation16 + $0x7f0] sm:$0xff] }
 0x500   : > { %3681 = vmatpush2.msra.mxu0 %v3213_v24  ;;  %v3346_v24 = vld [vmem:[#allocation16 + $0x7e8] sm:$0xff] }
 0x501   : > { %3682 = vmatprep.subr.mxu0 %v3212_v13  ;;  %v3345_v13 = vld [vmem:[#allocation16 + $0x7e0] sm:$0xff] }
 0x502   : > { %3683 = vmatpush2.msra.mxu0 %v3211_v44  ;;  %v3344_v44 = vld [vmem:[#allocation16 + $0x7d8] sm:$0xff] }
 0x503   : > { %3684 = vmatprep.subr.mxu0 %v3210_v19  ;;  %v3343_v19 = vld [vmem:[#allocation16 + $0x7d0] sm:$0xff] }
 0x504   : > { %3685 = vmatpush2.msra.mxu0 %v3209_v28  ;;  %v3342_v28 = vld [vmem:[#allocation16 + $0x7c8] sm:$0xff] }
 0x505   : > { %3686 = vmatprep.subr.mxu0 %v3208_v6  ;;  %v3341_v6 = vld [vmem:[#allocation16 + $0x7c0] sm:$0xff] }
 0x506   : > { %3687 = vmatpush2.msra.mxu0 %v3207_v21  ;;  %v3340_v21 = vld [vmem:[#allocation16 + $0x7b8] sm:$0xff] }
 0x507   : > { %3688 = vmatprep.subr.mxu0 %v3206_v42  ;;  %v3339_v42 = vld [vmem:[#allocation16 + $0x7b0] sm:$0xff] }
 0x508   : > { %3689 = vmatpush2.msra.mxu0 %v3205_v32  ;;  %v3338_v32 = vld [vmem:[#allocation16 + $0x7a8] sm:$0xff] }
 0x509   : > { %3690 = vmatprep.subr.mxu0 %v3204_v27  ;;  %v3337_v27 = vld [vmem:[#allocation16 + $0x7a0] sm:$0xff] }
 0x50a   : > { %3691 = vmatpush2.msra.mxu0 %v3203_v58  ;;  %v3336_v58 = vld [vmem:[#allocation16 + $0x798] sm:$0xff] }
 0x50b   : > { %3692 = vmatprep.subr.mxu0 %v3202_v16  ;;  %v3335_v16 = vld [vmem:[#allocation16 + $0x790] sm:$0xff] }
 0x50c   : > { %3693 = vmatpush2.msra.mxu0 %v3201_v63  ;;  %v3334_v63 = vld [vmem:[#allocation16 + $0x788] sm:$0xff] }
 0x50d   : > { %3694 = vmatprep.subr.mxu0 %v3200_v40  ;;  %v3333_v40 = vld [vmem:[#allocation16 + $0x780] sm:$0xff] }
 0x50e   : > { %3695 = vmatpush2.msra.mxu0 %v3199_v51  ;;  %v3332_v51 = vld [vmem:[#allocation16 + $0x778] sm:$0xff] }
 0x50f   : > { %3696 = vmatprep.subr.mxu0 %v3198_v60  ;;  %v3331_v60 = vld [vmem:[#allocation16 + $0x770] sm:$0xff] }
 0x510   : > { %3697 = vmatpush2.msra.mxu0 %v3197_v31  ;;  %v3330_v31 = vld [vmem:[#allocation16 + $0x768] sm:$0xff] }
 0x511   : > { %3698 = vmatprep.subr.mxu0 %v3196_v15  ;;  %v3329_v15 = vld [vmem:[#allocation16 + $0x760] sm:$0xff] }
 0x512   : > { %3699 = vmatpush2.msra.mxu0 %v3195_v46  ;;  %v3327_v46 = vld [vmem:[#allocation16 + $0x750] sm:$0xff] }
 0x513   : > { %3700 = vmatprep.subr.mxu0 %v3194_v20  ;;  %v3326_v20 = vld [vmem:[#allocation16 + $0x748] sm:$0xff] }
 0x514   : > { %3701 = vmatpush2.msra.mxu0 %v3193_v61  ;;  %v3325_v61 = vld [vmem:[#allocation16 + $0x740] sm:$0xff] }
 0x515   : > { %3702 = vmatprep.subr.mxu0 %v3192_v38  ;;  %v3324_v38 = vld [vmem:[#allocation16 + $0x738] sm:$0xff] }
 0x516   : > { %3703 = vmatpush2.msra.mxu0 %v3191_v62  ;;  %v3323_v62 = vld [vmem:[#allocation16 + $0x730] sm:$0xff] }
 0x517   : > { %3704 = vmatprep.subr.mxu0 %v3190_v39  ;;  %v3322_v39 = vld [vmem:[#allocation16 + $0x728] sm:$0xff] }
 0x518   : > { %3705 = vmatpush2.msra.mxu0 %v3189_v0  ;;  %v3321_v0 = vld [vmem:[#allocation16 + $0x720] sm:$0xff] }
 0x519   : > { %3707 = vmatmul.mubr.f32.vlgmr.msra.gmra.mxu0 %v6090_v3  ;;  %3784 = vmatprep.subr.mxu0 %v3316_v43  ;;  %v3304_v3 = vld [vmem:[#allocation16 + $0x698] sm:$0xff] }
 0x51a   : > { %3785 = vmatpush1.msra.mxu0 %v3315_v36  ;;  %3848 = vmatprep.mubr.f32.mxu0 %v3552_v55  ;;  %v3320_v43 = vld [vmem:[#allocation16 + $0x718] sm:$0xff]  ;;  %v3319_v55 = vld [vmem:[#allocation16 + $0x710] sm:$0xff]  ;;  %v3318_v36 = vld [vmem:[#allocation16 + $0x708] sm:$0xff] }
 0x51b   : > { %3786 = vmatprep.subr.mxu0 %v3314_v12  ;;  %v3317_v12 = vld [vmem:[#allocation16 + $0x700] sm:$0xff] }
 0x51c   : > { %3787 = vmatpush1.msra.mxu0 %v3313_v14  ;;  %v3973_v14 = vld [vmem:[%s6245_s11 + $0xf8] sm:$0xff] }
 0x51d   : > { %3788 = vmatprep.subr.mxu0 %v3312_v9  ;;  %v3957_v9 = vld [vmem:[%s6245_s11 + $0x78] sm:$0xff] }
 0x51e   : > { %3789 = vmatpush1.msra.mxu0 %v3311_v56  ;;  %v3972_v56 = vld [vmem:[%s6245_s11 + $0xf0] sm:$0xff] }
 0x51f   : > { %3790 = vmatprep.subr.mxu0 %v3310_v10  ;;  %v3956_v10 = vld [vmem:[%s6245_s11 + $0x70] sm:$0xff] }
 0x520   : > { %3791 = vmatpush1.msra.mxu0 %v3309_v41  ;;  %v3955_v41 = vld [vmem:[%s6245_s11 + $0x68] sm:$0xff] }
 0x521   : > { %3792 = vmatprep.subr.mxu0 %v3308_v7  ;;  %v3970_v7 = vld [vmem:[%s6245_s11 + $0xe0] sm:$0xff] }
 0x522   : > { %3793 = vmatpush1.msra.mxu0 %v3307_v37  ;;  %v3954_v37 = vld [vmem:[%s6245_s11 + $0x60] sm:$0xff] }
 0x523   : > { %3794 = vmatprep.subr.mxu0 %v3306_v30  ;;  %v3969_v30 = vld [vmem:[%s6245_s11 + $0xd8] sm:$0xff] }
 0x524   : > { %3795 = vmatpush1.msra.mxu0 %v3305_v54  ;;  %v3953_v54 = vld [vmem:[%s6245_s11 + $0x58] sm:$0xff] }
 0x525   : > { %3796 = vmatprep.subr.mxu0 %v3304_v3  ;;  %v3968_v3 = vld [vmem:[%s6245_s11 + $0xd0] sm:$0xff] }
 0x526   : > { %3797 = vmatpush1.msra.mxu0 %v3303_v45  ;;  %v3952_v45 = vld [vmem:[%s6245_s11 + $0x50] sm:$0xff] }
 0x527   : > { %3798 = vmatprep.subr.mxu0 %v3302_v8  ;;  %v3967_v8 = vld [vmem:[%s6245_s11 + $0xc8] sm:$0xff] }
 0x528   : > { %3799 = vmatpush1.msra.mxu0 %v3301_v49  ;;  %v3951_v49 = vld [vmem:[%s6245_s11 + $0x48] sm:$0xff] }
 0x529   : > { %3800 = vmatprep.subr.mxu0 %v3300_v1  ;;  %v3966_v1 = vld [vmem:[%s6245_s11 + $0xc0] sm:$0xff] }
 0x52a   : > { %3801 = vmatpush1.msra.mxu0 %v3299_v34  ;;  %v3950_v34 = vld [vmem:[%s6245_s11 + $0x40] sm:$0xff] }
 0x52b   : > { %3802 = vmatprep.subr.mxu0 %v3298_v23  ;;  %v3965_v23 = vld [vmem:[%s6245_s11 + $0xb8] sm:$0xff] }
 0x52c   : > { %3803 = vmatpush1.msra.mxu0 %v3297_v48  ;;  %v3949_v48 = vld [vmem:[%s6245_s11 + $0x38] sm:$0xff] }
 0x52d   : > { %3804 = vmatprep.subr.mxu0 %v3296_v18  ;;  %v3964_v18 = vld [vmem:[%s6245_s11 + $0xb0] sm:$0xff] }
 0x52e   : > { %3805 = vmatpush1.msra.mxu0 %v3295_v5  ;;  %v3948_v5 = vld [vmem:[%s6245_s11 + $0x30] sm:$0xff] }
 0x52f   : > { %3806 = vmatprep.subr.mxu0 %v3294_v26  ;;  %v3963_v26 = vld [vmem:[%s6245_s11 + $0xa8] sm:$0xff] }
 0x530   : > { %3807 = vmatpush1.msra.mxu0 %v3293_v59  ;;  %v3947_v59 = vld [vmem:[%s6245_s11 + $0x28] sm:$0xff] }
 0x531   : > { %3808 = vmatprep.subr.mxu0 %v3292_v57  ;;  %v3962_v57 = vld [vmem:[%s6245_s11 + $0xa0] sm:$0xff] }
 0x532   : > { %3809 = vmatpush1.msra.mxu0 %v3291_v29  ;;  %v3946_v29 = vld [vmem:[%s6245_s11 + $0x20] sm:$0xff] }
 0x533   : > { %3810 = vmatprep.subr.mxu0 %v3290_v4  ;;  %v3961_v4 = vld [vmem:[%s6245_s11 + $0x98] sm:$0xff] }
 0x534   : > { %3811 = vmatpush1.msra.mxu0 %v3289_v2  ;;  %v3945_v2 = vld [vmem:[%s6245_s11 + $0x18] sm:$0xff] }
 0x535   : > { %3812 = vmatprep.subr.mxu0 %v3288_v33  ;;  %v3960_v33 = vld [vmem:[%s6245_s11 + $0x90] sm:$0xff] }
 0x536   : > { %3813 = vmatpush1.msra.mxu0 %v3287_v17  ;;  %v3944_v17 = vld [vmem:[%s6245_s11 + $0x10] sm:$0xff] }
 0x537   : > { %3814 = vmatprep.subr.mxu0 %v3286_v35  ;;  %v3959_v35 = vld [vmem:[%s6245_s11 + $0x88] sm:$0xff] }
 0x538   : > { %3815 = vmatpush1.msra.mxu0 %v3285_v22  ;;  %v3943_v22 = vld [vmem:[%s6245_s11 + $0x8] sm:$0xff] }
 0x539   : > { %3816 = vmatprep.subr.mxu0 %v3348_v52  ;;  %v3958_v52 = vld [vmem:[%s6245_s11 + $0x80] sm:$0xff] }
 0x53a   : > { %3817 = vmatpush2.msra.mxu0 %v3347_v53  ;;  %v3942_v53 = vld [vmem:[%s6245_s11] sm:$0xff] }
 0x53b   : > { %3818 = vmatprep.subr.mxu0 %v3346_v24 }
 0x53c   : > { %3819 = vmatpush2.msra.mxu0 %v3345_v13  ;;  %v3637_v13 = vpop.f32.mrf.mxu1 }
 0x53d   : > { %3820 = vmatprep.subr.mxu0 %v3344_v44 }
 0x53e   : > { %3821 = vmatpush2.msra.mxu0 %v3343_v19 }
 0x53f   : > { %3822 = vmatprep.subr.mxu0 %v3342_v28  ;;  %v3639_v28 = vpop.f32.mrf.mxu1 }
 0x540   : > { %3823 = vmatpush2.msra.mxu0 %v3341_v6 }
 0x541   : > { %3824 = vmatprep.subr.mxu0 %v3340_v21 }
 0x542   : > { %3825 = vmatpush2.msra.mxu0 %v3339_v42 }
 0x543   : > { %3826 = vmatprep.subr.mxu0 %v3338_v32 }
 0x544   : > { %3827 = vmatpush2.msra.mxu0 %v3337_v27 }
 0x545   : > { %3828 = vmatprep.subr.mxu0 %v3336_v58 }
 0x546   : > { %3829 = vmatpush2.msra.mxu0 %v3335_v16 }
 0x547   : > { %3830 = vmatprep.subr.mxu0 %v3334_v63 }
 0x548   : > { %3831 = vmatpush2.msra.mxu0 %v3333_v40  ;;  %v3926_v40 = vld [vmem:[#allocation19] sm:$0x3] }
 0x549   : > { %3832 = vmatprep.subr.mxu0 %v3332_v51 }
 0x54a   : > { %3833 = vmatpush2.msra.mxu0 %v3331_v60 }
 0x54b   : > { %3834 = vmatprep.subr.mxu0 %v3330_v31 }
 0x54c   : > { %3835 = vmatpush2.msra.mxu0 %v3329_v15 }
 0x54d   : > { %3836 = vmatprep.subr.mxu0 %v3328_v25  ;;  %v3931_v25 = vrot.slane %v3926_v40, %v5504_v47 }
 0x54e   : > { %3837 = vmatpush2.msra.mxu0 %v3327_v46 }
 0x54f   : > { %3838 = vmatprep.subr.mxu0 %v3326_v20 }
 0x550   : > { %3839 = vmatpush2.msra.mxu0 %v3325_v61 }
 0x551   : > { %3840 = vmatprep.subr.mxu0 %v3324_v38  ;;  %v3935_v38 = vrot.slane %v3926_v40, %v5510_v50 }
 0x552   : > { %3841 = vmatpush2.msra.mxu0 %v3323_v62 }
 0x553   : > { %3842 = vmatprep.subr.mxu0 %v3322_v39 }
 0x554   : > { %3843 = vmatpush2.msra.mxu0 %v3321_v0  ;;  %v3779_v21 = vpop.f32.mrf.mxu1 }
 0x555   : > { %3844 = vmatprep.subr.mxu0 %v3320_v43 }
 0x556   : > { %3845 = vmatpush2.msra.mxu0 %v3319_v55  ;;  %v3781_v16 = vpop.f32.mrf.mxu1 }
 0x557   : > { %3846 = vmatprep.subr.mxu0 %v3318_v36 }
 0x558   : > { %3847 = vmatpush2.msra.mxu0 %v3317_v12 }
 0x559   : > { %3849 = vmatmul.mubr.f32.vlgmr.msra.gmra.mxu0 %v6098_v11  ;;  %4373 = vmatprep.subr.mxu0 %v3973_v14  ;;  %v3971_v11 = vld [vmem:[%s6245_s11 + $0xe8] sm:$0xff]  ;;  %v4357_v14 = vld [vmem:[#allocation21] ss:$0 sm:$0xff] }
 0x55a   : > { %4374 = vmatpush3.msra.mxu0 %v3957_v9 }
 0x55b   : > { %4375 = vmatprep.subr.mxu0 %v3972_v56 }
 0x55c   : > { %4376 = vmatpush3.msra.mxu0 %v3956_v10 }
 0x55d   : > { %4377 = vmatprep.subr.mxu0 %v3971_v11 }
 0x55e   : > { %4378 = vmatpush3.msra.mxu0 %v3955_v41 }
 0x55f   : > { %4379 = vmatprep.subr.mxu0 %v3970_v7 }
 0x560   : > { %4380 = vmatpush3.msra.mxu0 %v3954_v37 }
 0x561   : > { %4381 = vmatprep.subr.mxu0 %v3969_v30 }
 0x562   : > { %4382 = vmatpush3.msra.mxu0 %v3953_v54 }
 0x563   : > { %4383 = vmatprep.subr.mxu0 %v3968_v3 }
 0x564   : > { %4384 = vmatpush3.msra.mxu0 %v3952_v45 }
 0x565   : > { %4385 = vmatprep.subr.mxu0 %v3967_v8 }
 0x566   : > { %4386 = vmatpush3.msra.mxu0 %v3951_v49 }
 0x567   : > { %4387 = vmatprep.subr.mxu0 %v3966_v1 }
 0x568   : > { %4388 = vmatpush3.msra.mxu0 %v3950_v34 }
 0x569   : > { %4389 = vmatprep.subr.mxu0 %v3965_v23 }
 0x56a   : > { %4390 = vmatpush3.msra.mxu0 %v3949_v48 }
 0x56b   : > { %4391 = vmatprep.subr.mxu0 %v3964_v18 }
 0x56c   : > { %4392 = vmatpush3.msra.mxu0 %v3948_v5 }
 0x56d   : > { %4393 = vmatprep.subr.mxu0 %v3963_v26 }
 0x56e   : > { %4394 = vmatpush3.msra.mxu0 %v3947_v59 }
 0x56f   : > { %4395 = vmatprep.subr.mxu0 %v3962_v57 }
 0x570   : > { %4396 = vmatpush3.msra.mxu0 %v3946_v29 }
 0x571   : > { %4397 = vmatprep.subr.mxu0 %v3961_v4 }
 0x572   : > { %4398 = vmatpush3.msra.mxu0 %v3945_v2 }
 0x573   : > { %4399 = vmatprep.subr.mxu0 %v3960_v33 }
 0x574   : > { %4400 = vmatpush3.msra.mxu0 %v3944_v17 }
 0x575   : > { %4401 = vmatprep.subr.mxu0 %v3959_v35 }
 0x576   : > { %4402 = vmatpush3.msra.mxu0 %v3943_v22 }
 0x577   : > { %4403 = vmatprep.subr.mxu0 %v3958_v52 }
 0x578   : > { %4404 = vmatpush3.msra.mxu0 %v3942_v53 }
 0x594   : > { %v3921_v60 = vpop.f32.mrf.mxu1 }
 0x596   : > { %v3923_v62 = vpop.f32.mrf.mxu1 }
 0x599   : > { %v3511_v24 = vpop.f32.mrf.mxu0 }
 0x59a   : > { %v3638_v6 = vadd.f32 %v3637_v13, %v3511_v24 }
 0x59b   : > { %v3513_v44 = vpop.f32.mrf.mxu0 }
 0x59c   : > { %v3640_v32 = vadd.f32 %v3639_v28, %v3513_v44 }
 0x5d9   : > { %v3708_v19 = vpop.f32.mrf.mxu0 }
 0x5da   : > { %v3709_v27 = vadd.f32 %v3708_v19, %v3638_v6 }
 0x5db   : > { %v3710_v42 = vpop.f32.mrf.mxu0 }
 0x5dc   : > { %v3711_v58 = vadd.f32 %v3710_v42, %v3640_v32  ;;  %v3780_v63 = vadd.f32 %v3779_v21, %v3709_v27 }
 0x5de   : > { %v3782_v31 = vadd.f32 %v3781_v16, %v3711_v58 }
 0x619   : > { %v3850_v51 = vpop.f32.mrf.mxu0 }
 0x61a   : > { %v3851_v15 = vadd.f32 %v3850_v51, %v3780_v63 }
 0x61b   : > { %v3852_v46 = vpop.f32.mrf.mxu0 }
 0x61c   : > { %v3922_v20 = vadd.f32 %v3921_v60, %v3851_v15  ;;  %v3853_v61 = vadd.f32 %v3852_v46, %v3782_v31 }
 0x61e   : > { %v3924_v39 = vadd.f32 %v3923_v62, %v3853_v61  ;;  %v3938_v0 = vadd.f32 %v3931_v25, %v3922_v20 }
 0x620   : > { %v3939_v43 = vadd.f32 %v3935_v38, %v3924_v39  ;;  %v3940_v36 = vmax.f32 %v3938_v0, 0.0 }
 0x622   : > { %v3941_v55 = vmax.f32 %v3939_v43, 0.0 }
 0x624   : > { %4045 = vmatprep.mubr.f32.mxu0 %v3941_v55 }
 0x625   : > { %4046 = vmatmul.mubr.f32.vlgmr.msra.gmra.mxu0 %v3940_v36 }
 0x6e5   : > { %v4405_v12 = vpop.f32.mrf.mxu0 }
 0x6e7   : > { %v4406_v9 = vpop.f32.mrf.mxu0 }
 0x6e8   : > { %v4407_v56 = vadd.f32 %v4406_v9, %v4405_v12 }
 0x6ea   : > { %v4048_v10 = vadd.f32 %v4407_v56, %v4357_v14 }
 0x6ec   : > { %4052 = vst.msk [vmem:[#allocation22] sm:$0x3] %vm4051_vm6, %v4048_v10 }
 0x6ed PF: > { %s6274_s23 = sadd.s32 4294967295, %s4978_s29   ;;  %s5001_s22 = smov [#allocation22]  }
 0x6ee   : > { %p6204_p3 = scmp.eq.s32.totalorder %s6274_s23, 1  ;;  %s4062_s20 = sshll.u32 %s5001_s22, 4  ;;  %s4063_s20 = int_to_ptr.vmem [resolvable:$true] %s4062_s20 }
 0x6ef   : > { %s4888_s25 = scalar_lea.vmem %s4063_s20, 32  ;;  %p4895_p13 = scmp.lt.s32.totalorder %s4063_s20, %s4063_s20 }
 0x6f0   : > { %p4889_p6 = scmp.ne.s32.totalorder %s4063_s20, %s4888_s25  ;;  %p4896_p0 = scmp.lt.s32.totalorder %s4888_s25, %s4888_s25 }
 0x6f2   : > { %p4890_p9 = pnand %p4889_p6, %p6204_p3  ;;  %p4897_p1 = por %p4896_p0, %p4895_p13 }
 0x6f4   : > { %p4891_p12 = pneg %p4890_p9 }
 0x6f6   : > { %p4898_p2 = pnand %p4897_p1, %p4891_p12 }
 0x6f8   : > { %4901 = shalt.err (!%p4898_p2)
}
 0x6f9   : > { %s6276_s19 = sld [smem:[#allocation34_spill]] }
 0x6ff   : > { %4477 = dma.vmem_to_hbm [thread:$0]  (%p6204_p3), %s4063_s20, 32, %s6276_s19, [#allocation6]  }
 0x700   : > { %4957 = dma.done.wait (%p6204_p3), [#allocation6], 32  }
 0x701   : > { %4959 = vsyncadd (%p6204_p3), [#allocation6], 4294967264 }
 0x702 PF: > { %s30_s29 = sadd.s32 1, %s4978_s29   ;;  %s6277_s4 = sld [smem:[#allocation31_spill]] }
 0x703   : > { %p27_p4 = scmp.ge.s32.totalorder %s30_s29, 4   ;;  %s6278_s13 = sld [smem:[#allocation30_spill]] }
 0x704   : > { %s6279_s25 = smov %s4966_s26  ;;  %s6281_s27 = smov %s4974_s28 }
 0x705   :  { %29 = sbr.rel (!%p27_p4) target bundleno = 13 (0xd), region = 197 }
 0x708   : > { %s6280_s26 = smov %s6277_s4 }
 0x709   : > { %s6282_s28 = smov %s6278_s13 }
 0x70a   :  { %4075 = vsyncpa [#allocation5], 1 }
 0x70b   :  { %4077 = vsyncpa [#allocation5 + $0x1], 1 }
 0x70c   :  { %4078 = vsyncpa [#allocation8], 1 }
 0x70d   :  { %4079 = vsyncpa [#allocation11], 1 }
 0x70e   :  { %4080 = vsyncpa [#allocation14], 1 }
 0x70f   :  { %4081 = vsyncpa [#allocation17], 1 }
 0x710   :  { %4082 = vsyncpa [#allocation20], 1 }
 0x711   :  { %4083 = vsyncpa [#allocation6], 1 }
 0x712   :  { %4085 = vsyncpa [#allocation6 + $0x1], 1 }

</bundles_post_ra>
